<compile_context>
chip_gen: v7x
topology: tpu7x:2x2x1
jax: 0.10.0
libtpu: 0.0.40
codegen_flags: <defaults>
</compile_context>

<pallas_src>
import functools

import jax
import jax.numpy as jnp
from jax.experimental import pallas as pl
from jax.experimental.pallas import tpu as pltpu


_PMAX = 4  # max |lane shift| over all layers of this architecture (dilation<=4)


def _rnd8(n):
    return ((n + 7) // 8) * 8


# ----------------------------------------------------------------------------
# Fused whole-network kernel: one grid step == one batch tile (B_TILE samples)
# Activations: [C, N] with N = B_TILE * L, batch-major lanes (p = b*L + l),
# strided stages kept at full N lanes in a dilated (zero-spaced) layout.
# ----------------------------------------------------------------------------
def _generator_kernel(x_ref, w_ref, gb_ref, bias_ref, o_ref,
                      stack_ref, xpad_ref, *, L, B_TILE, cin, cd):
    cd2 = 2 * cd
    N = B_TILE * L
    f32 = jnp.float32

    # ---- static index machinery, built ONCE and reused by every layer ----
    p = jax.lax.broadcasted_iota(jnp.int32, (1, N), 1)          # global lane id
    bid = jnp.zeros((1, N), jnp.int32)
    for blk in range(1, B_TILE):                                 # batch-block id
        bid = bid + (p >= blk * L).astype(jnp.int32)
    q = p - bid * L                                              # pos within sample

    # per-sample block-sum / broadcast matrices for InstanceNorm (linear in N)
    rN = jax.lax.broadcasted_iota(jnp.int32, (N, B_TILE), 0)
    cB = jax.lax.broadcasted_iota(jnp.int32, (N, B_TILE), 1)
    ind = jnp.where((rN >= cB * L) & (rN < (cB + 1) * L), 1.0, 0.0).astype(f32)
    rB = jax.lax.broadcasted_iota(jnp.int32, (B_TILE, N), 0)
    cN = jax.lax.broadcasted_iota(jnp.int32, (B_TILE, N), 1)
    indT = jnp.where((cN >= rB * L) & (cN < (rB + 1) * L), 1.0, 0.0).astype(f32)

    _shift_masks = {}
    def shift_mask(delta):                       # source stays inside its sample
        if delta not in _shift_masks:
            _shift_masks[delta] = (q + delta >= 0) & (q + delta < L)
        return _shift_masks[delta]

    _valid_masks = {}
    def valid_mask(dil):                         # lanes carrying real data at dil
        if dil not in _valid_masks:
            _valid_masks[dil] = (q & (dil - 1)) == 0
        return _valid_masks[dil]

    # clear scratch so padded rows / pad columns never feed NaNs to the MXU
    stack_ref[...] = jnp.zeros_like(stack_ref)
    xpad_ref[...] = jnp.zeros_like(xpad_ref)

    def conv(x, idx, cout, c_in, deltas):
        """Fused-tap conv / tconv: y[:, p] = sum_k W_k @ x[:, p + deltas[k]]."""
        K = len(deltas)
        cp = _rnd8(c_in)
        # stage x into a zero-padded VMEM buffer so every tap is a static slice
        xpad_ref[0:c_in, _PMAX:_PMAX + N] = x
        for k, d in enumerate(deltas):
            sl = xpad_ref[0:c_in, _PMAX + d: _PMAX + d + N]
            stack_ref[k * cp: k * cp + c_in, :] = jnp.where(shift_mask(d), sl, 0.0)
        w = w_ref[idx][0:cout, 0:K * cp]                        # [cout, K*cp]
        return jnp.dot(w, stack_ref[0:K * cp, :],
                       preferred_element_type=f32)              # [cout, N]

    def inorm(y, off, c, dil):
        """InstanceNorm1d(affine, eps=1e-5) over the L//dil valid lanes/sample."""
        vm = valid_mask(dil)
        y0 = jnp.where(vm, y, 0.0)
        inv_n = 1.0 / float(L // dil)
        mean = jnp.dot(y0, ind, preferred_element_type=f32) * inv_n        # [c,B]
        msq = jnp.dot(y0 * y0, ind, preferred_element_type=f32) * inv_n    # E[y^2]
        var = msq - mean * mean
        gamma = gb_ref[off: off + c, 0:1]                                   # [c,1]
        beta = gb_ref[off: off + c, 1:2]
        a = jax.lax.rsqrt(var + 1e-5) * gamma                               # [c,B]
        sft = beta - mean * a
        a_full = jnp.dot(a, indT, preferred_element_type=f32)               # [c,N]
        s_full = jnp.dot(sft, indT, preferred_element_type=f32)
        # keep the "invalid lanes are exactly zero" invariant for later layers
        return jnp.where(vm, y0 * a_full + s_full, 0.0)

    def lrelu(y):
        return jnp.where(y >= 0, y, 0.01 * y)

    x = x_ref[...]                                               # [cin, N]

    # conv1 -> in1 -> LeakyReLU         (dilation 1 -> 2); conv bias cancelled by IN
    h = lrelu(inorm(conv(x, 0, cd, cin, (-1, 0, 1, 2)), 0, cd, 2))
    # conv2 -> in2 -> LeakyReLU         (dilation 2 -> 4)
    h = lrelu(inorm(conv(h, 1, cd2, cd, (-2, 0, 2, 4)), cd, cd2, 4))
    # ResBlock 1 (reference ResBlock.forward has NO residual add)
    t = jnp.maximum(inorm(conv(h, 2, cd2, cd2, (-4, 0, 4)), cd + cd2, cd2, 4), 0.0)
    h = inorm(conv(t, 3, cd2, cd2, (-4, 0, 4)), cd + 2 * cd2, cd2, 4)
    # ResBlock 2
    t = jnp.maximum(inorm(conv(h, 4, cd2, cd2, (-4, 0, 4)), cd + 3 * cd2, cd2, 4), 0.0)
    h = inorm(conv(t, 5, cd2, cd2, (-4, 0, 4)), cd + 4 * cd2, cd2, 4)
    # tcnv1 -> in3 -> LeakyReLU         (dilation 4 -> 2); bias cancelled by IN
    h = lrelu(inorm(conv(h, 6, cd, cd2, (2, 0, -2, -4)), cd + 5 * cd2, cd, 2))
    # tcnv2 (+bias) -> tanh             (dilation 2 -> 1)
    h = conv(h, 7, 1, cd, (1, 0, -1, -2)) + bias_ref[...]
    o_ref[...] = jnp.tanh(h)


def _pick_btile(B, L):
    # whole batch in one step when tiny; otherwise largest divisor of B whose
    # lane width is a multiple of 128 (BlockSpec tiling constraint, lane-dense)
    if B * L <= 2048:
        return B
    for d in range(B - 1, 0, -1):
        if B % d == 0 and (d * L) % 128 == 0:
            return d
    return B


def generator_forward(x, params):
    B, cin, L = x.shape
    assert L % 4 == 0, "length must be divisible by 4 (two stride-2 stages)"
    cd = params.conv_dim
    b_tile = _pick_btile(B, L)
    n = b_tile * L
    cmax = max(cin, 2 * cd)

    # host-side layout plumbing: batch-major lane-dense [Cin, B*L]
    x_c = jnp.transpose(x, (1, 0, 2)).reshape(cin, B * L)

    kernel = functools.partial(_generator_kernel, L=L, B_TILE=b_tile, cin=cin, cd=cd)
    out = pl.pallas_call(
        kernel,
        out_shape=jax.ShapeDtypeStruct((1, B * L), jnp.float32),
        grid=(B // b_tile,),
        in_specs=[
            pl.BlockSpec((cin, n), lambda i: (0, i)),
            pl.BlockSpec(params.w_all.shape, lambda i: (0, 0, 0)),
            pl.BlockSpec(params.gb_all.shape, lambda i: (0, 0)),
            pl.BlockSpec(params.bias.shape, lambda i: (0, 0)),
        ],
        out_specs=pl.BlockSpec((1, n), lambda i: (0, i)),
        scratch_shapes=[
            pltpu.VMEM((params.kcin_max, n), jnp.float32),        # stacked taps
            pltpu.VMEM((cmax, n + 2 * _PMAX), jnp.float32),       # zero-padded x
        ],
        compiler_params=pltpu.CompilerParams(
            dimension_semantics=("parallel",),
        ),
    )(x_c, params.w_all, params.gb_all, params.bias)

    return jnp.transpose(out.reshape(1, B, L), (1, 0, 2))


# ----------------------------------------------------------------------------
# Parameter container mirroring the PyTorch Generator(num_dim, conv_dim)
# ----------------------------------------------------------------------------
class GeneratorPallas:
    def __init__(self, num_dim, conv_dim, key):
        cd, cd2 = conv_dim, conv_dim * 2
        cin = 2 + num_dim
        self.conv_dim = cd
        ks = jax.random.split(key, 9)

        def rnd(k_, shape):
            return 0.1 * jax.random.normal(k_, shape, jnp.float32)

        # PyTorch layouts: Conv1d [Cout, Cin, K]; ConvTranspose1d [Cin, Cout, K]
        w_conv1 = rnd(ks[0], (cd, cin, 4))
        w_conv2 = rnd(ks[1], (cd2, cd, 4))
        w_r1a = rnd(ks[2], (cd2, cd2, 3))
        w_r1b = rnd(ks[3], (cd2, cd2, 3))
        w_r2a = rnd(ks[4], (cd2, cd2, 3))
        w_r2b = rnd(ks[5], (cd2, cd2, 3))
        w_t1 = rnd(ks[6], (cd2, cd, 4))
        w_t2 = rnd(ks[7], (cd, 1, 4))
        # conv1 / conv2 / tcnv1 biases are exactly cancelled by the following
        # InstanceNorm mean subtraction -> not materialized.  tcnv2 keeps bias.
        self.bias = 0.1 * jax.random.normal(ks[8], (1, 1), jnp.float32)

        def pack_conv(w):                 # [Cout, Cin, K] -> [Cout, K*rnd8(Cin)]
            cout, ci, k = w.shape
            cp = _rnd8(ci)
            buf = jnp.zeros((cout, k, cp), jnp.float32)
            buf = buf.at[:, :, :ci].set(jnp.transpose(w, (0, 2, 1)))
            return buf.reshape(cout, k * cp)

        def pack_tconv(w):                # [Cin, Cout, K] -> [Cout, K*rnd8(Cin)]
            ci, cout, k = w.shape
            cp = _rnd8(ci)
            buf = jnp.zeros((cout, k, cp), jnp.float32)
            buf = buf.at[:, :, :ci].set(jnp.transpose(w, (1, 2, 0)))
            return buf.reshape(cout, k * cp)

        flats = [pack_conv(w_conv1), pack_conv(w_conv2),
                 pack_conv(w_r1a), pack_conv(w_r1b),
                 pack_conv(w_r2a), pack_conv(w_r2b),
                 pack_tconv(w_t1), pack_tconv(w_t2)]
        cout_max = max(f.shape[0] for f in flats)
        self.kcin_max = max(f.shape[1] for f in flats)
        w_all = jnp.zeros((len(flats), cout_max, self.kcin_max), jnp.float32)
        for i, f in enumerate(flats):
            w_all = w_all.at[i, :f.shape[0], :f.shape[1]].set(f)
        self.w_all = w_all

        # Packed InstanceNorm affine params (gamma=1, beta=0 at init), order:
        # in1(cd), in2(cd2), res1a(cd2), res1b(cd2), res2a(cd2), res2b(cd2), in3(cd)
        c_total = 2 * cd + 5 * cd2
        self.gb_all = jnp.concatenate(
            [jnp.ones((c_total, 1), jnp.float32),
             jnp.zeros((c_total, 1), jnp.float32)], axis=1)

    def __call__(self, x):
        return generator_forward(x, self)


if __name__ == "__main__":
    key = jax.random.PRNGKey(0)
    num_dim, conv_dim = 4, 8
    B, L = 2, 16

    k_in, k_par = jax.random.split(key)
    x = jax.random.normal(k_in, (B, 2 + num_dim, L), jnp.float32)

    gen = GeneratorPallas(num_dim, conv_dim, k_par)
    y = gen(x)
    jax.block_until_ready(y)

    assert y.shape == (B, 1, L), y.shape
    assert bool(jnp.all(jnp.isfinite(y)))
    assert bool(jnp.all(jnp.abs(y) <= 1.0))   # tanh output range
    print("KERNEL_OK")
</pallas_src>

<mosaic_0001>
module attributes {stable_mosaic.version = 11 : i64} {
  func.func @_generator_kernel(%arg0: i32, %arg1: memref<6x32xf32, #tpu.memory_space<vmem>>, %arg2: memref<8x16x64xf32, #tpu.memory_space<vmem>>, %arg3: memref<96x2xf32, #tpu.memory_space<vmem>>, %arg4: memref<1x1xf32, #tpu.memory_space<vmem>>, %arg5: memref<1x32xf32, #tpu.memory_space<vmem>>, %arg6: memref<64x32xf32, #tpu.memory_space<vmem>>, %arg7: memref<16x40xf32, #tpu.memory_space<vmem>>) attributes {dimension_semantics = [#tpu.dimension_semantics<parallel>], iteration_bounds = array<i64: 1>, scalar_prefetch = 0 : i64, scratch_operands = 2 : i64, tpu.core_type = #tpu.core_type<tc>, window_params = [{transform_indices = @transform_0, window_bounds = array<i64: 6, 32>}, {pipeline_mode = #tpu.pipeline_mode<synchronous>, transform_indices = @transform_1, window_bounds = array<i64: 8, 16, 64>}, {pipeline_mode = #tpu.pipeline_mode<synchronous>, transform_indices = @transform_2, window_bounds = array<i64: 96, 2>}, {pipeline_mode = #tpu.pipeline_mode<synchronous>, transform_indices = @transform_3, window_bounds = array<i64: 1, 1>}, {transform_indices = @transform_4, window_bounds = array<i64: 1, 32>}]} {
    %0 = tpu.iota {dimensions = array<i32: 1>} : vector<1x32xi32>
    %c0_i32 = arith.constant 0 : i32
    %1 = vector.broadcast %c0_i32 : i32 to vector<1x32xi32>
    %c16_i32 = arith.constant 16 : i32
    %2 = vector.broadcast %c16_i32 : i32 to vector<1x32xi32>
    %3 = arith.cmpi sge, %0, %2 : vector<1x32xi32>
    %4 = arith.extui %3 : vector<1x32xi1> to vector<1x32xi32>
    %5 = arith.addi %1, %4 : vector<1x32xi32>
    %c16_i32_0 = arith.constant 16 : i32
    %6 = vector.broadcast %c16_i32_0 : i32 to vector<1x32xi32>
    %7 = arith.muli %5, %6 : vector<1x32xi32>
    %8 = arith.subi %0, %7 : vector<1x32xi32>
    %9 = tpu.iota {dimensions = array<i32: 0>} : vector<32x2xi32>
    %10 = tpu.iota {dimensions = array<i32: 1>} : vector<32x2xi32>
    %c16_i32_1 = arith.constant 16 : i32
    %11 = vector.broadcast %c16_i32_1 : i32 to vector<32x2xi32>
    %12 = arith.muli %10, %11 : vector<32x2xi32>
    %13 = arith.cmpi sge, %9, %12 : vector<32x2xi32>
    %c1_i32 = arith.constant 1 : i32
    %14 = vector.broadcast %c1_i32 : i32 to vector<32x2xi32>
    %15 = arith.addi %10, %14 : vector<32x2xi32>
    %c16_i32_2 = arith.constant 16 : i32
    %16 = vector.broadcast %c16_i32_2 : i32 to vector<32x2xi32>
    %17 = arith.muli %15, %16 : vector<32x2xi32>
    %18 = arith.cmpi slt, %9, %17 : vector<32x2xi32>
    %19 = arith.andi %13, %18 : vector<32x2xi1>
    %cst = arith.constant 1.000000e+00 : f32
    %cst_3 = arith.constant 0.000000e+00 : f32
    %20 = vector.broadcast %cst : f32 to vector<32x2xf32>
    %21 = vector.broadcast %cst_3 : f32 to vector<32x2xf32>
    %22 = arith.select %19, %20, %21 : vector<32x2xi1>, vector<32x2xf32>
    %23 = tpu.iota {dimensions = array<i32: 0>} : vector<2x32xi32>
    %24 = tpu.iota {dimensions = array<i32: 1>} : vector<2x32xi32>
    %c16_i32_4 = arith.constant 16 : i32
    %25 = vector.broadcast %c16_i32_4 : i32 to vector<2x32xi32>
    %26 = arith.muli %23, %25 : vector<2x32xi32>
    %27 = arith.cmpi sge, %24, %26 : vector<2x32xi32>
    %c1_i32_5 = arith.constant 1 : i32
    %28 = vector.broadcast %c1_i32_5 : i32 to vector<2x32xi32>
    %29 = arith.addi %23, %28 : vector<2x32xi32>
    %c16_i32_6 = arith.constant 16 : i32
    %30 = vector.broadcast %c16_i32_6 : i32 to vector<2x32xi32>
    %31 = arith.muli %29, %30 : vector<2x32xi32>
    %32 = arith.cmpi slt, %24, %31 : vector<2x32xi32>
    %33 = arith.andi %27, %32 : vector<2x32xi1>
    %cst_7 = arith.constant 1.000000e+00 : f32
    %cst_8 = arith.constant 0.000000e+00 : f32
    %34 = vector.broadcast %cst_7 : f32 to vector<2x32xf32>
    %35 = vector.broadcast %cst_8 : f32 to vector<2x32xf32>
    %36 = arith.select %33, %34, %35 : vector<2x32xi1>, vector<2x32xf32>
    %cst_9 = arith.constant 0.000000e+00 : f32
    %37 = vector.broadcast %cst_9 : f32 to vector<64x32xf32>
    %c0 = arith.constant 0 : index
    %c0_10 = arith.constant 0 : index
    %38 = vector.load %arg6[%c0, %c0_10] : memref<64x32xf32, #tpu.memory_space<vmem>>, vector<64x32xf32>
    tpu.vector_store %arg6[%c0, %c0_10], %37 {strides = array<i32>} : memref<64x32xf32, #tpu.memory_space<vmem>>, vector<64x32xf32>,
    %cst_11 = arith.constant 0.000000e+00 : f32
    %39 = vector.broadcast %cst_11 : f32 to vector<16x40xf32>
    %c0_12 = arith.constant 0 : index
    %c0_13 = arith.constant 0 : index
    %40 = vector.load %arg7[%c0_12, %c0_13] : memref<16x40xf32, #tpu.memory_space<vmem>>, vector<16x40xf32>
    tpu.vector_store %arg7[%c0_12, %c0_13], %39 {strides = array<i32>} : memref<16x40xf32, #tpu.memory_space<vmem>>, vector<16x40xf32>,
    %c0_14 = arith.constant 0 : index
    %c0_15 = arith.constant 0 : index
    %41 = vector.load %arg1[%c0_14, %c0_15] : memref<6x32xf32, #tpu.memory_space<vmem>>, vector<6x32xf32>
    %c0_16 = arith.constant 0 : index
    %c4 = arith.constant 4 : index
    %42 = vector.load %arg7[%c0_16, %c4] : memref<16x40xf32, #tpu.memory_space<vmem>>, vector<6x32xf32>
    tpu.vector_store %arg7[%c0_16, %c4], %41 {strides = array<i32>} : memref<16x40xf32, #tpu.memory_space<vmem>>, vector<6x32xf32>,
    %c0_17 = arith.constant 0 : index
    %c3 = arith.constant 3 : index
    %43 = vector.load %arg7[%c0_17, %c3] : memref<16x40xf32, #tpu.memory_space<vmem>>, vector<6x32xf32>
    %c-1_i32 = arith.constant -1 : i32
    %44 = vector.broadcast %c-1_i32 : i32 to vector<1x32xi32>
    %45 = arith.addi %8, %44 : vector<1x32xi32>
    %c0_i32_18 = arith.constant 0 : i32
    %46 = vector.broadcast %c0_i32_18 : i32 to vector<1x32xi32>
    %47 = arith.cmpi sge, %45, %46 : vector<1x32xi32>
    %c-1_i32_19 = arith.constant -1 : i32
    %48 = vector.broadcast %c-1_i32_19 : i32 to vector<1x32xi32>
    %49 = arith.addi %8, %48 : vector<1x32xi32>
    %c16_i32_20 = arith.constant 16 : i32
    %50 = vector.broadcast %c16_i32_20 : i32 to vector<1x32xi32>
    %51 = arith.cmpi slt, %49, %50 : vector<1x32xi32>
    %52 = arith.andi %47, %51 : vector<1x32xi1>
    %cst_21 = arith.constant 0.000000e+00 : f32
    %53 = vector.shape_cast %52 : vector<1x32xi1> to vector<1x32xi1>
    %54 = vector.broadcast %53 : vector<1x32xi1> to vector<6x32xi1>
    %55 = vector.broadcast %cst_21 : f32 to vector<6x32xf32>
    %56 = arith.select %54, %43, %55 : vector<6x32xi1>, vector<6x32xf32>
    %c0_22 = arith.constant 0 : index
    %c0_23 = arith.constant 0 : index
    %57 = vector.load %arg6[%c0_22, %c0_23] : memref<64x32xf32, #tpu.memory_space<vmem>>, vector<6x32xf32>
    tpu.vector_store %arg6[%c0_22, %c0_23], %56 {strides = array<i32>} : memref<64x32xf32, #tpu.memory_space<vmem>>, vector<6x32xf32>,
    %c0_24 = arith.constant 0 : index
    %c4_25 = arith.constant 4 : index
    %58 = vector.load %arg7[%c0_24, %c4_25] : memref<16x40xf32, #tpu.memory_space<vmem>>, vector<6x32xf32>
    %c0_i32_26 = arith.constant 0 : i32
    %59 = vector.broadcast %c0_i32_26 : i32 to vector<1x32xi32>
    %60 = arith.addi %8, %59 : vector<1x32xi32>
    %c0_i32_27 = arith.constant 0 : i32
    %61 = vector.broadcast %c0_i32_27 : i32 to vector<1x32xi32>
    %62 = arith.cmpi sge, %60, %61 : vector<1x32xi32>
    %c0_i32_28 = arith.constant 0 : i32
    %63 = vector.broadcast %c0_i32_28 : i32 to vector<1x32xi32>
    %64 = arith.addi %8, %63 : vector<1x32xi32>
    %c16_i32_29 = arith.constant 16 : i32
    %65 = vector.broadcast %c16_i32_29 : i32 to vector<1x32xi32>
    %66 = arith.cmpi slt, %64, %65 : vector<1x32xi32>
    %67 = arith.andi %62, %66 : vector<1x32xi1>
    %cst_30 = arith.constant 0.000000e+00 : f32
    %68 = vector.shape_cast %67 : vector<1x32xi1> to vector<1x32xi1>
    %69 = vector.broadcast %68 : vector<1x32xi1> to vector<6x32xi1>
    %70 = vector.broadcast %cst_30 : f32 to vector<6x32xf32>
    %71 = arith.select %69, %58, %70 : vector<6x32xi1>, vector<6x32xf32>
    %c8 = arith.constant 8 : index
    %c0_31 = arith.constant 0 : index
    %72 = vector.load %arg6[%c8, %c0_31] : memref<64x32xf32, #tpu.memory_space<vmem>>, vector<6x32xf32>
    tpu.vector_store %arg6[%c8, %c0_31], %71 {strides = array<i32>} : memref<64x32xf32, #tpu.memory_space<vmem>>, vector<6x32xf32>,
    %c0_32 = arith.constant 0 : index
    %c5 = arith.constant 5 : index
    %73 = vector.load %arg7[%c0_32, %c5] : memref<16x40xf32, #tpu.memory_space<vmem>>, vector<6x32xf32>
    %c1_i32_33 = arith.constant 1 : i32
    %74 = vector.broadcast %c1_i32_33 : i32 to vector<1x32xi32>
    %75 = arith.addi %8, %74 : vector<1x32xi32>
    %c0_i32_34 = arith.constant 0 : i32
    %76 = vector.broadcast %c0_i32_34 : i32 to vector<1x32xi32>
    %77 = arith.cmpi sge, %75, %76 : vector<1x32xi32>
    %c1_i32_35 = arith.constant 1 : i32
    %78 = vector.broadcast %c1_i32_35 : i32 to vector<1x32xi32>
    %79 = arith.addi %8, %78 : vector<1x32xi32>
    %c16_i32_36 = arith.constant 16 : i32
    %80 = vector.broadcast %c16_i32_36 : i32 to vector<1x32xi32>
    %81 = arith.cmpi slt, %79, %80 : vector<1x32xi32>
    %82 = arith.andi %77, %81 : vector<1x32xi1>
    %cst_37 = arith.constant 0.000000e+00 : f32
    %83 = vector.shape_cast %82 : vector<1x32xi1> to vector<1x32xi1>
    %84 = vector.broadcast %83 : vector<1x32xi1> to vector<6x32xi1>
    %85 = vector.broadcast %cst_37 : f32 to vector<6x32xf32>
    %86 = arith.select %84, %73, %85 : vector<6x32xi1>, vector<6x32xf32>
    %c16 = arith.constant 16 : index
    %c0_38 = arith.constant 0 : index
    %87 = vector.load %arg6[%c16, %c0_38] : memref<64x32xf32, #tpu.memory_space<vmem>>, vector<6x32xf32>
    tpu.vector_store %arg6[%c16, %c0_38], %86 {strides = array<i32>} : memref<64x32xf32, #tpu.memory_space<vmem>>, vector<6x32xf32>,
    %c0_39 = arith.constant 0 : index
    %c6 = arith.constant 6 : index
    %88 = vector.load %arg7[%c0_39, %c6] : memref<16x40xf32, #tpu.memory_space<vmem>>, vector<6x32xf32>
    %c2_i32 = arith.constant 2 : i32
    %89 = vector.broadcast %c2_i32 : i32 to vector<1x32xi32>
    %90 = arith.addi %8, %89 : vector<1x32xi32>
    %c0_i32_40 = arith.constant 0 : i32
    %91 = vector.broadcast %c0_i32_40 : i32 to vector<1x32xi32>
    %92 = arith.cmpi sge, %90, %91 : vector<1x32xi32>
    %c2_i32_41 = arith.constant 2 : i32
    %93 = vector.broadcast %c2_i32_41 : i32 to vector<1x32xi32>
    %94 = arith.addi %8, %93 : vector<1x32xi32>
    %c16_i32_42 = arith.constant 16 : i32
    %95 = vector.broadcast %c16_i32_42 : i32 to vector<1x32xi32>
    %96 = arith.cmpi slt, %94, %95 : vector<1x32xi32>
    %97 = arith.andi %92, %96 : vector<1x32xi1>
    %cst_43 = arith.constant 0.000000e+00 : f32
    %98 = vector.shape_cast %97 : vector<1x32xi1> to vector<1x32xi1>
    %99 = vector.broadcast %98 : vector<1x32xi1> to vector<6x32xi1>
    %100 = vector.broadcast %cst_43 : f32 to vector<6x32xf32>
    %101 = arith.select %99, %88, %100 : vector<6x32xi1>, vector<6x32xf32>
    %c24 = arith.constant 24 : index
    %c0_44 = arith.constant 0 : index
    %102 = vector.load %arg6[%c24, %c0_44] : memref<64x32xf32, #tpu.memory_space<vmem>>, vector<6x32xf32>
    tpu.vector_store %arg6[%c24, %c0_44], %101 {strides = array<i32>} : memref<64x32xf32, #tpu.memory_space<vmem>>, vector<6x32xf32>,
    %c0_45 = arith.constant 0 : index
    %c0_46 = arith.constant 0 : index
    %c0_47 = arith.constant 0 : index
    %103 = vector.load %arg2[%c0_45, %c0_46, %c0_47] : memref<8x16x64xf32, #tpu.memory_space<vmem>>, vector<1x16x64xf32>
    %104 = vector.shape_cast %103 : vector<1x16x64xf32> to vector<16x64xf32>
    %105 = vector.extract_strided_slice %104 {offsets = [0, 0], sizes = [8, 32], strides = [1, 1]} : vector<16x64xf32> to vector<8x32xf32>
    %c0_48 = arith.constant 0 : index
    %c0_49 = arith.constant 0 : index
    %106 = vector.load %arg6[%c0_48, %c0_49] : memref<64x32xf32, #tpu.memory_space<vmem>>, vector<32x32xf32>
    %cst_50 = arith.constant dense<0.000000e+00> : vector<8x32xf32>
    %107 = tpu.matmul %105, %106, %cst_50 {dimension_numbers = #tpu.dot_dimension_numbers<[1], [0], [0], [1], [0, 0, 1, 1], [], []>} : vector<8x32xf32>, vector<32x32xf32>, vector<8x32xf32> -> vector<8x32xf32>
    %c1_i32_51 = arith.constant 1 : i32
    %108 = vector.broadcast %c1_i32_51 : i32 to vector<1x32xi32>
    %109 = arith.andi %8, %108 : vector<1x32xi32>
    %c0_i32_52 = arith.constant 0 : i32
    %110 = vector.broadcast %c0_i32_52 : i32 to vector<1x32xi32>
    %111 = arith.cmpi eq, %109, %110 : vector<1x32xi32>
    %cst_53 = arith.constant 0.000000e+00 : f32
    %112 = vector.shape_cast %111 : vector<1x32xi1> to vector<1x32xi1>
    %113 = vector.broadcast %112 : vector<1x32xi1> to vector<8x32xi1>
    %114 = vector.broadcast %cst_53 : f32 to vector<8x32xf32>
    %115 = arith.select %113, %107, %114 : vector<8x32xi1>, vector<8x32xf32>
    %cst_54 = arith.constant dense<0.000000e+00> : vector<8x2xf32>
    %116 = tpu.matmul %115, %22, %cst_54 {dimension_numbers = #tpu.dot_dimension_numbers<[1], [0], [0], [1], [0, 0, 1, 1], [], []>} : vector<8x32xf32>, vector<32x2xf32>, vector<8x2xf32> -> vector<8x2xf32>
    %cst_55 = arith.constant 1.250000e-01 : f32
    %117 = vector.broadcast %cst_55 : f32 to vector<8x2xf32>
    %118 = arith.mulf %116, %117 : vector<8x2xf32>
    %119 = arith.mulf %115, %115 : vector<8x32xf32>
    %cst_56 = arith.constant dense<0.000000e+00> : vector<8x2xf32>
    %120 = tpu.matmul %119, %22, %cst_56 {dimension_numbers = #tpu.dot_dimension_numbers<[1], [0], [0], [1], [0, 0, 1, 1], [], []>} : vector<8x32xf32>, vector<32x2xf32>, vector<8x2xf32> -> vector<8x2xf32>
    %cst_57 = arith.constant 1.250000e-01 : f32
    %121 = vector.broadcast %cst_57 : f32 to vector<8x2xf32>
    %122 = arith.mulf %120, %121 : vector<8x2xf32>
    %123 = arith.mulf %118, %118 : vector<8x2xf32>
    %124 = arith.subf %122, %123 : vector<8x2xf32>
    %c0_58 = arith.constant 0 : index
    %c0_59 = arith.constant 0 : index
    %125 = vector.load %arg3[%c0_58, %c0_59] : memref<96x2xf32, #tpu.memory_space<vmem>>, vector<8x1xf32>
    %c0_60 = arith.constant 0 : index
    %c1 = arith.constant 1 : index
    %126 = vector.load %arg3[%c0_60, %c1] : memref<96x2xf32, #tpu.memory_space<vmem>>, vector<8x1xf32>
    %cst_61 = arith.constant 9.99999974E-6 : f32
    %127 = vector.broadcast %cst_61 : f32 to vector<8x2xf32>
    %128 = arith.addf %124, %127 : vector<8x2xf32>
    %129 = math.rsqrt %128 : vector<8x2xf32>
    %130 = vector.broadcast %125 : vector<8x1xf32> to vector<8x2xf32>
    %131 = arith.mulf %129, %130 : vector<8x2xf32>
    %132 = arith.mulf %118, %131 : vector<8x2xf32>
    %133 = vector.broadcast %126 : vector<8x1xf32> to vector<8x2xf32>
    %134 = arith.subf %133, %132 : vector<8x2xf32>
    %cst_62 = arith.constant dense<0.000000e+00> : vector<8x32xf32>
    %135 = tpu.matmul %131, %36, %cst_62 {dimension_numbers = #tpu.dot_dimension_numbers<[1], [0], [0], [1], [0, 0, 1, 1], [], []>} : vector<8x2xf32>, vector<2x32xf32>, vector<8x32xf32> -> vector<8x32xf32>
    %cst_63 = arith.constant dense<0.000000e+00> : vector<8x32xf32>
    %136 = tpu.matmul %134, %36, %cst_63 {dimension_numbers = #tpu.dot_dimension_numbers<[1], [0], [0], [1], [0, 0, 1, 1], [], []>} : vector<8x2xf32>, vector<2x32xf32>, vector<8x32xf32> -> vector<8x32xf32>
    %137 = arith.mulf %115, %135 : vector<8x32xf32>
    %138 = arith.addf %137, %136 : vector<8x32xf32>
    %cst_64 = arith.constant 0.000000e+00 : f32
    %139 = vector.shape_cast %111 : vector<1x32xi1> to vector<1x32xi1>
    %140 = vector.broadcast %139 : vector<1x32xi1> to vector<8x32xi1>
    %141 = vector.broadcast %cst_64 : f32 to vector<8x32xf32>
    %142 = arith.select %140, %138, %141 : vector<8x32xi1>, vector<8x32xf32>
    %cst_65 = arith.constant 0.000000e+00 : f32
    %143 = vector.broadcast %cst_65 : f32 to vector<8x32xf32>
    %144 = arith.cmpf oge, %142, %143 : vector<8x32xf32>
    %cst_66 = arith.constant 0.00999999977 : f32
    %145 = vector.broadcast %cst_66 : f32 to vector<8x32xf32>
    %146 = arith.mulf %145, %142 : vector<8x32xf32>
    %147 = arith.select %144, %142, %146 : vector<8x32xi1>, vector<8x32xf32>
    %c0_67 = arith.constant 0 : index
    %c4_68 = arith.constant 4 : index
    %148 = vector.load %arg7[%c0_67, %c4_68] : memref<16x40xf32, #tpu.memory_space<vmem>>, vector<8x32xf32>
    tpu.vector_store %arg7[%c0_67, %c4_68], %147 {strides = array<i32>} : memref<16x40xf32, #tpu.memory_space<vmem>>, vector<8x32xf32>,
    %c0_69 = arith.constant 0 : index
    %c2 = arith.constant 2 : index
    %149 = vector.load %arg7[%c0_69, %c2] : memref<16x40xf32, #tpu.memory_space<vmem>>, vector<8x32xf32>
    %c-2_i32 = arith.constant -2 : i32
    %150 = vector.broadcast %c-2_i32 : i32 to vector<1x32xi32>
    %151 = arith.addi %8, %150 : vector<1x32xi32>
    %c0_i32_70 = arith.constant 0 : i32
    %152 = vector.broadcast %c0_i32_70 : i32 to vector<1x32xi32>
    %153 = arith.cmpi sge, %151, %152 : vector<1x32xi32>
    %c-2_i32_71 = arith.constant -2 : i32
    %154 = vector.broadcast %c-2_i32_71 : i32 to vector<1x32xi32>
    %155 = arith.addi %8, %154 : vector<1x32xi32>
    %c16_i32_72 = arith.constant 16 : i32
    %156 = vector.broadcast %c16_i32_72 : i32 to vector<1x32xi32>
    %157 = arith.cmpi slt, %155, %156 : vector<1x32xi32>
    %158 = arith.andi %153, %157 : vector<1x32xi1>
    %cst_73 = arith.constant 0.000000e+00 : f32
    %159 = vector.shape_cast %158 : vector<1x32xi1> to vector<1x32xi1>
    %160 = vector.broadcast %159 : vector<1x32xi1> to vector<8x32xi1>
    %161 = vector.broadcast %cst_73 : f32 to vector<8x32xf32>
    %162 = arith.select %160, %149, %161 : vector<8x32xi1>, vector<8x32xf32>
    %c0_74 = arith.constant 0 : index
    %c0_75 = arith.constant 0 : index
    %163 = vector.load %arg6[%c0_74, %c0_75] : memref<64x32xf32, #tpu.memory_space<vmem>>, vector<8x32xf32>
    tpu.vector_store %arg6[%c0_74, %c0_75], %162 {strides = array<i32>} : memref<64x32xf32, #tpu.memory_space<vmem>>, vector<8x32xf32>,
    %c0_76 = arith.constant 0 : index
    %c4_77 = arith.constant 4 : index
    %164 = vector.load %arg7[%c0_76, %c4_77] : memref<16x40xf32, #tpu.memory_space<vmem>>, vector<8x32xf32>
    %cst_78 = arith.constant 0.000000e+00 : f32
    %165 = vector.shape_cast %67 : vector<1x32xi1> to vector<1x32xi1>
    %166 = vector.broadcast %165 : vector<1x32xi1> to vector<8x32xi1>
    %167 = vector.broadcast %cst_78 : f32 to vector<8x32xf32>
    %168 = arith.select %166, %164, %167 : vector<8x32xi1>, vector<8x32xf32>
    %c8_79 = arith.constant 8 : index
    %c0_80 = arith.constant 0 : index
    %169 = vector.load %arg6[%c8_79, %c0_80] : memref<64x32xf32, #tpu.memory_space<vmem>>, vector<8x32xf32>
    tpu.vector_store %arg6[%c8_79, %c0_80], %168 {strides = array<i32>} : memref<64x32xf32, #tpu.memory_space<vmem>>, vector<8x32xf32>,
    %c0_81 = arith.constant 0 : index
    %c6_82 = arith.constant 6 : index
    %170 = vector.load %arg7[%c0_81, %c6_82] : memref<16x40xf32, #tpu.memory_space<vmem>>, vector<8x32xf32>
    %cst_83 = arith.constant 0.000000e+00 : f32
    %171 = vector.shape_cast %97 : vector<1x32xi1> to vector<1x32xi1>
    %172 = vector.broadcast %171 : vector<1x32xi1> to vector<8x32xi1>
    %173 = vector.broadcast %cst_83 : f32 to vector<8x32xf32>
    %174 = arith.select %172, %170, %173 : vector<8x32xi1>, vector<8x32xf32>
    %c16_84 = arith.constant 16 : index
    %c0_85 = arith.constant 0 : index
    %175 = vector.load %arg6[%c16_84, %c0_85] : memref<64x32xf32, #tpu.memory_space<vmem>>, vector<8x32xf32>
    tpu.vector_store %arg6[%c16_84, %c0_85], %174 {strides = array<i32>} : memref<64x32xf32, #tpu.memory_space<vmem>>, vector<8x32xf32>,
    %c0_86 = arith.constant 0 : index
    %c8_87 = arith.constant 8 : index
    %176 = vector.load %arg7[%c0_86, %c8_87] : memref<16x40xf32, #tpu.memory_space<vmem>>, vector<8x32xf32>
    %c4_i32 = arith.constant 4 : i32
    %177 = vector.broadcast %c4_i32 : i32 to vector<1x32xi32>
    %178 = arith.addi %8, %177 : vector<1x32xi32>
    %c0_i32_88 = arith.constant 0 : i32
    %179 = vector.broadcast %c0_i32_88 : i32 to vector<1x32xi32>
    %180 = arith.cmpi sge, %178, %179 : vector<1x32xi32>
    %c4_i32_89 = arith.constant 4 : i32
    %181 = vector.broadcast %c4_i32_89 : i32 to vector<1x32xi32>
    %182 = arith.addi %8, %181 : vector<1x32xi32>
    %c16_i32_90 = arith.constant 16 : i32
    %183 = vector.broadcast %c16_i32_90 : i32 to vector<1x32xi32>
    %184 = arith.cmpi slt, %182, %183 : vector<1x32xi32>
    %185 = arith.andi %180, %184 : vector<1x32xi1>
    %cst_91 = arith.constant 0.000000e+00 : f32
    %186 = vector.shape_cast %185 : vector<1x32xi1> to vector<1x32xi1>
    %187 = vector.broadcast %186 : vector<1x32xi1> to vector<8x32xi1>
    %188 = vector.broadcast %cst_91 : f32 to vector<8x32xf32>
    %189 = arith.select %187, %176, %188 : vector<8x32xi1>, vector<8x32xf32>
    %c24_92 = arith.constant 24 : index
    %c0_93 = arith.constant 0 : index
    %190 = vector.load %arg6[%c24_92, %c0_93] : memref<64x32xf32, #tpu.memory_space<vmem>>, vector<8x32xf32>
    tpu.vector_store %arg6[%c24_92, %c0_93], %189 {strides = array<i32>} : memref<64x32xf32, #tpu.memory_space<vmem>>, vector<8x32xf32>,
    %c1_94 = arith.constant 1 : index
    %c0_95 = arith.constant 0 : index
    %c0_96 = arith.constant 0 : index
    %191 = vector.load %arg2[%c1_94, %c0_95, %c0_96] : memref<8x16x64xf32, #tpu.memory_space<vmem>>, vector<1x16x64xf32>
    %192 = vector.shape_cast %191 : vector<1x16x64xf32> to vector<16x64xf32>
    %193 = vector.extract_strided_slice %192 {offsets = [0, 0], sizes = [16, 32], strides = [1, 1]} : vector<16x64xf32> to vector<16x32xf32>
    %c0_97 = arith.constant 0 : index
    %c0_98 = arith.constant 0 : index
    %194 = vector.load %arg6[%c0_97, %c0_98] : memref<64x32xf32, #tpu.memory_space<vmem>>, vector<32x32xf32>
    %cst_99 = arith.constant dense<0.000000e+00> : vector<16x32xf32>
    %195 = tpu.matmul %193, %194, %cst_99 {dimension_numbers = #tpu.dot_dimension_numbers<[1], [0], [0], [1], [0, 0, 1, 1], [], []>} : vector<16x32xf32>, vector<32x32xf32>, vector<16x32xf32> -> vector<16x32xf32>
    %c3_i32 = arith.constant 3 : i32
    %196 = vector.broadcast %c3_i32 : i32 to vector<1x32xi32>
    %197 = arith.andi %8, %196 : vector<1x32xi32>
    %c0_i32_100 = arith.constant 0 : i32
    %198 = vector.broadcast %c0_i32_100 : i32 to vector<1x32xi32>
    %199 = arith.cmpi eq, %197, %198 : vector<1x32xi32>
    %cst_101 = arith.constant 0.000000e+00 : f32
    %200 = vector.shape_cast %199 : vector<1x32xi1> to vector<1x32xi1>
    %201 = vector.broadcast %200 : vector<1x32xi1> to vector<16x32xi1>
    %202 = vector.broadcast %cst_101 : f32 to vector<16x32xf32>
    %203 = arith.select %201, %195, %202 : vector<16x32xi1>, vector<16x32xf32>
    %cst_102 = arith.constant dense<0.000000e+00> : vector<16x2xf32>
    %204 = tpu.matmul %203, %22, %cst_102 {dimension_numbers = #tpu.dot_dimension_numbers<[1], [0], [0], [1], [0, 0, 1, 1], [], []>} : vector<16x32xf32>, vector<32x2xf32>, vector<16x2xf32> -> vector<16x2xf32>
    %cst_103 = arith.constant 2.500000e-01 : f32
    %205 = vector.broadcast %cst_103 : f32 to vector<16x2xf32>
    %206 = arith.mulf %204, %205 : vector<16x2xf32>
    %207 = arith.mulf %203, %203 : vector<16x32xf32>
    %cst_104 = arith.constant dense<0.000000e+00> : vector<16x2xf32>
    %208 = tpu.matmul %207, %22, %cst_104 {dimension_numbers = #tpu.dot_dimension_numbers<[1], [0], [0], [1], [0, 0, 1, 1], [], []>} : vector<16x32xf32>, vector<32x2xf32>, vector<16x2xf32> -> vector<16x2xf32>
    %cst_105 = arith.constant 2.500000e-01 : f32
    %209 = vector.broadcast %cst_105 : f32 to vector<16x2xf32>
    %210 = arith.mulf %208, %209 : vector<16x2xf32>
    %211 = arith.mulf %206, %206 : vector<16x2xf32>
    %212 = arith.subf %210, %211 : vector<16x2xf32>
    %c8_106 = arith.constant 8 : index
    %c0_107 = arith.constant 0 : index
    %213 = vector.load %arg3[%c8_106, %c0_107] : memref<96x2xf32, #tpu.memory_space<vmem>>, vector<16x1xf32>
    %c8_108 = arith.constant 8 : index
    %c1_109 = arith.constant 1 : index
    %214 = vector.load %arg3[%c8_108, %c1_109] : memref<96x2xf32, #tpu.memory_space<vmem>>, vector<16x1xf32>
    %cst_110 = arith.constant 9.99999974E-6 : f32
    %215 = vector.broadcast %cst_110 : f32 to vector<16x2xf32>
    %216 = arith.addf %212, %215 : vector<16x2xf32>
    %217 = math.rsqrt %216 : vector<16x2xf32>
    %218 = vector.broadcast %213 : vector<16x1xf32> to vector<16x2xf32>
    %219 = arith.mulf %217, %218 : vector<16x2xf32>
    %220 = arith.mulf %206, %219 : vector<16x2xf32>
    %221 = vector.broadcast %214 : vector<16x1xf32> to vector<16x2xf32>
    %222 = arith.subf %221, %220 : vector<16x2xf32>
    %cst_111 = arith.constant dense<0.000000e+00> : vector<16x32xf32>
    %223 = tpu.matmul %219, %36, %cst_111 {dimension_numbers = #tpu.dot_dimension_numbers<[1], [0], [0], [1], [0, 0, 1, 1], [], []>} : vector<16x2xf32>, vector<2x32xf32>, vector<16x32xf32> -> vector<16x32xf32>
    %cst_112 = arith.constant dense<0.000000e+00> : vector<16x32xf32>
    %224 = tpu.matmul %222, %36, %cst_112 {dimension_numbers = #tpu.dot_dimension_numbers<[1], [0], [0], [1], [0, 0, 1, 1], [], []>} : vector<16x2xf32>, vector<2x32xf32>, vector<16x32xf32> -> vector<16x32xf32>
    %225 = arith.mulf %203, %223 : vector<16x32xf32>
    %226 = arith.addf %225, %224 : vector<16x32xf32>
    %cst_113 = arith.constant 0.000000e+00 : f32
    %227 = vector.shape_cast %199 : vector<1x32xi1> to vector<1x32xi1>
    %228 = vector.broadcast %227 : vector<1x32xi1> to vector<16x32xi1>
    %229 = vector.broadcast %cst_113 : f32 to vector<16x32xf32>
    %230 = arith.select %228, %226, %229 : vector<16x32xi1>, vector<16x32xf32>
    %cst_114 = arith.constant 0.000000e+00 : f32
    %231 = vector.broadcast %cst_114 : f32 to vector<16x32xf32>
    %232 = arith.cmpf oge, %230, %231 : vector<16x32xf32>
    %cst_115 = arith.constant 0.00999999977 : f32
    %233 = vector.broadcast %cst_115 : f32 to vector<16x32xf32>
    %234 = arith.mulf %233, %230 : vector<16x32xf32>
    %235 = arith.select %232, %230, %234 : vector<16x32xi1>, vector<16x32xf32>
    %c0_116 = arith.constant 0 : index
    %c4_117 = arith.constant 4 : index
    %236 = vector.load %arg7[%c0_116, %c4_117] : memref<16x40xf32, #tpu.memory_space<vmem>>, vector<16x32xf32>
    tpu.vector_store %arg7[%c0_116, %c4_117], %235 {strides = array<i32>} : memref<16x40xf32, #tpu.memory_space<vmem>>, vector<16x32xf32>,
    %c0_118 = arith.constant 0 : index
    %c0_119 = arith.constant 0 : index
    %237 = vector.load %arg7[%c0_118, %c0_119] : memref<16x40xf32, #tpu.memory_space<vmem>>, vector<16x32xf32>
    %c-4_i32 = arith.constant -4 : i32
    %238 = vector.broadcast %c-4_i32 : i32 to vector<1x32xi32>
    %239 = arith.addi %8, %238 : vector<1x32xi32>
    %c0_i32_120 = arith.constant 0 : i32
    %240 = vector.broadcast %c0_i32_120 : i32 to vector<1x32xi32>
    %241 = arith.cmpi sge, %239, %240 : vector<1x32xi32>
    %c-4_i32_121 = arith.constant -4 : i32
    %242 = vector.broadcast %c-4_i32_121 : i32 to vector<1x32xi32>
    %243 = arith.addi %8, %242 : vector<1x32xi32>
    %c16_i32_122 = arith.constant 16 : i32
    %244 = vector.broadcast %c16_i32_122 : i32 to vector<1x32xi32>
    %245 = arith.cmpi slt, %243, %244 : vector<1x32xi32>
    %246 = arith.andi %241, %245 : vector<1x32xi1>
    %cst_123 = arith.constant 0.000000e+00 : f32
    %247 = vector.shape_cast %246 : vector<1x32xi1> to vector<1x32xi1>
    %248 = vector.broadcast %247 : vector<1x32xi1> to vector<16x32xi1>
    %249 = vector.broadcast %cst_123 : f32 to vector<16x32xf32>
    %250 = arith.select %248, %237, %249 : vector<16x32xi1>, vector<16x32xf32>
    %c0_124 = arith.constant 0 : index
    %c0_125 = arith.constant 0 : index
    %251 = vector.load %arg6[%c0_124, %c0_125] : memref<64x32xf32, #tpu.memory_space<vmem>>, vector<16x32xf32>
    tpu.vector_store %arg6[%c0_124, %c0_125], %250 {strides = array<i32>} : memref<64x32xf32, #tpu.memory_space<vmem>>, vector<16x32xf32>,
    %c0_126 = arith.constant 0 : index
    %c4_127 = arith.constant 4 : index
    %252 = vector.load %arg7[%c0_126, %c4_127] : memref<16x40xf32, #tpu.memory_space<vmem>>, vector<16x32xf32>
    %cst_128 = arith.constant 0.000000e+00 : f32
    %253 = vector.shape_cast %67 : vector<1x32xi1> to vector<1x32xi1>
    %254 = vector.broadcast %253 : vector<1x32xi1> to vector<16x32xi1>
    %255 = vector.broadcast %cst_128 : f32 to vector<16x32xf32>
    %256 = arith.select %254, %252, %255 : vector<16x32xi1>, vector<16x32xf32>
    %c16_129 = arith.constant 16 : index
    %c0_130 = arith.constant 0 : index
    %257 = vector.load %arg6[%c16_129, %c0_130] : memref<64x32xf32, #tpu.memory_space<vmem>>, vector<16x32xf32>
    tpu.vector_store %arg6[%c16_129, %c0_130], %256 {strides = array<i32>} : memref<64x32xf32, #tpu.memory_space<vmem>>, vector<16x32xf32>,
    %c0_131 = arith.constant 0 : index
    %c8_132 = arith.constant 8 : index
    %258 = vector.load %arg7[%c0_131, %c8_132] : memref<16x40xf32, #tpu.memory_space<vmem>>, vector<16x32xf32>
    %cst_133 = arith.constant 0.000000e+00 : f32
    %259 = vector.shape_cast %185 : vector<1x32xi1> to vector<1x32xi1>
    %260 = vector.broadcast %259 : vector<1x32xi1> to vector<16x32xi1>
    %261 = vector.broadcast %cst_133 : f32 to vector<16x32xf32>
    %262 = arith.select %260, %258, %261 : vector<16x32xi1>, vector<16x32xf32>
    %c32 = arith.constant 32 : index
    %c0_134 = arith.constant 0 : index
    %263 = vector.load %arg6[%c32, %c0_134] : memref<64x32xf32, #tpu.memory_space<vmem>>, vector<16x32xf32>
    tpu.vector_store %arg6[%c32, %c0_134], %262 {strides = array<i32>} : memref<64x32xf32, #tpu.memory_space<vmem>>, vector<16x32xf32>,
    %c2_135 = arith.constant 2 : index
    %c0_136 = arith.constant 0 : index
    %c0_137 = arith.constant 0 : index
    %264 = vector.load %arg2[%c2_135, %c0_136, %c0_137] : memref<8x16x64xf32, #tpu.memory_space<vmem>>, vector<1x16x64xf32>
    %265 = vector.shape_cast %264 : vector<1x16x64xf32> to vector<16x64xf32>
    %266 = vector.extract_strided_slice %265 {offsets = [0, 0], sizes = [16, 48], strides = [1, 1]} : vector<16x64xf32> to vector<16x48xf32>
    %c0_138 = arith.constant 0 : index
    %c0_139 = arith.constant 0 : index
    %267 = vector.load %arg6[%c0_138, %c0_139] : memref<64x32xf32, #tpu.memory_space<vmem>>, vector<48x32xf32>
    %cst_140 = arith.constant dense<0.000000e+00> : vector<16x32xf32>
    %268 = tpu.matmul %266, %267, %cst_140 {dimension_numbers = #tpu.dot_dimension_numbers<[1], [0], [0], [1], [0, 0, 1, 1], [], []>} : vector<16x48xf32>, vector<48x32xf32>, vector<16x32xf32> -> vector<16x32xf32>
    %cst_141 = arith.constant 0.000000e+00 : f32
    %269 = vector.shape_cast %199 : vector<1x32xi1> to vector<1x32xi1>
    %270 = vector.broadcast %269 : vector<1x32xi1> to vector<16x32xi1>
    %271 = vector.broadcast %cst_141 : f32 to vector<16x32xf32>
    %272 = arith.select %270, %268, %271 : vector<16x32xi1>, vector<16x32xf32>
    %cst_142 = arith.constant dense<0.000000e+00> : vector<16x2xf32>
    %273 = tpu.matmul %272, %22, %cst_142 {dimension_numbers = #tpu.dot_dimension_numbers<[1], [0], [0], [1], [0, 0, 1, 1], [], []>} : vector<16x32xf32>, vector<32x2xf32>, vector<16x2xf32> -> vector<16x2xf32>
    %cst_143 = arith.constant 2.500000e-01 : f32
    %274 = vector.broadcast %cst_143 : f32 to vector<16x2xf32>
    %275 = arith.mulf %273, %274 : vector<16x2xf32>
    %276 = arith.mulf %272, %272 : vector<16x32xf32>
    %cst_144 = arith.constant dense<0.000000e+00> : vector<16x2xf32>
    %277 = tpu.matmul %276, %22, %cst_144 {dimension_numbers = #tpu.dot_dimension_numbers<[1], [0], [0], [1], [0, 0, 1, 1], [], []>} : vector<16x32xf32>, vector<32x2xf32>, vector<16x2xf32> -> vector<16x2xf32>
    %cst_145 = arith.constant 2.500000e-01 : f32
    %278 = vector.broadcast %cst_145 : f32 to vector<16x2xf32>
    %279 = arith.mulf %277, %278 : vector<16x2xf32>
    %280 = arith.mulf %275, %275 : vector<16x2xf32>
    %281 = arith.subf %279, %280 : vector<16x2xf32>
    %c24_146 = arith.constant 24 : index
    %c0_147 = arith.constant 0 : index
    %282 = vector.load %arg3[%c24_146, %c0_147] : memref<96x2xf32, #tpu.memory_space<vmem>>, vector<16x1xf32>
    %c24_148 = arith.constant 24 : index
    %c1_149 = arith.constant 1 : index
    %283 = vector.load %arg3[%c24_148, %c1_149] : memref<96x2xf32, #tpu.memory_space<vmem>>, vector<16x1xf32>
    %cst_150 = arith.constant 9.99999974E-6 : f32
    %284 = vector.broadcast %cst_150 : f32 to vector<16x2xf32>
    %285 = arith.addf %281, %284 : vector<16x2xf32>
    %286 = math.rsqrt %285 : vector<16x2xf32>
    %287 = vector.broadcast %282 : vector<16x1xf32> to vector<16x2xf32>
    %288 = arith.mulf %286, %287 : vector<16x2xf32>
    %289 = arith.mulf %275, %288 : vector<16x2xf32>
    %290 = vector.broadcast %283 : vector<16x1xf32> to vector<16x2xf32>
    %291 = arith.subf %290, %289 : vector<16x2xf32>
    %cst_151 = arith.constant dense<0.000000e+00> : vector<16x32xf32>
    %292 = tpu.matmul %288, %36, %cst_151 {dimension_numbers = #tpu.dot_dimension_numbers<[1], [0], [0], [1], [0, 0, 1, 1], [], []>} : vector<16x2xf32>, vector<2x32xf32>, vector<16x32xf32> -> vector<16x32xf32>
    %cst_152 = arith.constant dense<0.000000e+00> : vector<16x32xf32>
    %293 = tpu.matmul %291, %36, %cst_152 {dimension_numbers = #tpu.dot_dimension_numbers<[1], [0], [0], [1], [0, 0, 1, 1], [], []>} : vector<16x2xf32>, vector<2x32xf32>, vector<16x32xf32> -> vector<16x32xf32>
    %294 = arith.mulf %272, %292 : vector<16x32xf32>
    %295 = arith.addf %294, %293 : vector<16x32xf32>
    %cst_153 = arith.constant 0.000000e+00 : f32
    %296 = vector.shape_cast %199 : vector<1x32xi1> to vector<1x32xi1>
    %297 = vector.broadcast %296 : vector<1x32xi1> to vector<16x32xi1>
    %298 = vector.broadcast %cst_153 : f32 to vector<16x32xf32>
    %299 = arith.select %297, %295, %298 : vector<16x32xi1>, vector<16x32xf32>
    %cst_154 = arith.constant 0.000000e+00 : f32
    %300 = vector.broadcast %cst_154 : f32 to vector<16x32xf32>
    %301 = arith.maximumf %299, %300 : vector<16x32xf32>
    %c0_155 = arith.constant 0 : index
    %c4_156 = arith.constant 4 : index
    %302 = vector.load %arg7[%c0_155, %c4_156] : memref<16x40xf32, #tpu.memory_space<vmem>>, vector<16x32xf32>
    tpu.vector_store %arg7[%c0_155, %c4_156], %301 {strides = array<i32>} : memref<16x40xf32, #tpu.memory_space<vmem>>, vector<16x32xf32>,
    %c0_157 = arith.constant 0 : index
    %c0_158 = arith.constant 0 : index
    %303 = vector.load %arg7[%c0_157, %c0_158] : memref<16x40xf32, #tpu.memory_space<vmem>>, vector<16x32xf32>
    %cst_159 = arith.constant 0.000000e+00 : f32
    %304 = vector.shape_cast %246 : vector<1x32xi1> to vector<1x32xi1>
    %305 = vector.broadcast %304 : vector<1x32xi1> to vector<16x32xi1>
    %306 = vector.broadcast %cst_159 : f32 to vector<16x32xf32>
    %307 = arith.select %305, %303, %306 : vector<16x32xi1>, vector<16x32xf32>
    %c0_160 = arith.constant 0 : index
    %c0_161 = arith.constant 0 : index
    %308 = vector.load %arg6[%c0_160, %c0_161] : memref<64x32xf32, #tpu.memory_space<vmem>>, vector<16x32xf32>
    tpu.vector_store %arg6[%c0_160, %c0_161], %307 {strides = array<i32>} : memref<64x32xf32, #tpu.memory_space<vmem>>, vector<16x32xf32>,
    %c0_162 = arith.constant 0 : index
    %c4_163 = arith.constant 4 : index
    %309 = vector.load %arg7[%c0_162, %c4_163] : memref<16x40xf32, #tpu.memory_space<vmem>>, vector<16x32xf32>
    %cst_164 = arith.constant 0.000000e+00 : f32
    %310 = vector.shape_cast %67 : vector<1x32xi1> to vector<1x32xi1>
    %311 = vector.broadcast %310 : vector<1x32xi1> to vector<16x32xi1>
    %312 = vector.broadcast %cst_164 : f32 to vector<16x32xf32>
    %313 = arith.select %311, %309, %312 : vector<16x32xi1>, vector<16x32xf32>
    %c16_165 = arith.constant 16 : index
    %c0_166 = arith.constant 0 : index
    %314 = vector.load %arg6[%c16_165, %c0_166] : memref<64x32xf32, #tpu.memory_space<vmem>>, vector<16x32xf32>
    tpu.vector_store %arg6[%c16_165, %c0_166], %313 {strides = array<i32>} : memref<64x32xf32, #tpu.memory_space<vmem>>, vector<16x32xf32>,
    %c0_167 = arith.constant 0 : index
    %c8_168 = arith.constant 8 : index
    %315 = vector.load %arg7[%c0_167, %c8_168] : memref<16x40xf32, #tpu.memory_space<vmem>>, vector<16x32xf32>
    %cst_169 = arith.constant 0.000000e+00 : f32
    %316 = vector.shape_cast %185 : vector<1x32xi1> to vector<1x32xi1>
    %317 = vector.broadcast %316 : vector<1x32xi1> to vector<16x32xi1>
    %318 = vector.broadcast %cst_169 : f32 to vector<16x32xf32>
    %319 = arith.select %317, %315, %318 : vector<16x32xi1>, vector<16x32xf32>
    %c32_170 = arith.constant 32 : index
    %c0_171 = arith.constant 0 : index
    %320 = vector.load %arg6[%c32_170, %c0_171] : memref<64x32xf32, #tpu.memory_space<vmem>>, vector<16x32xf32>
    tpu.vector_store %arg6[%c32_170, %c0_171], %319 {strides = array<i32>} : memref<64x32xf32, #tpu.memory_space<vmem>>, vector<16x32xf32>,
    %c3_172 = arith.constant 3 : index
    %c0_173 = arith.constant 0 : index
    %c0_174 = arith.constant 0 : index
    %321 = vector.load %arg2[%c3_172, %c0_173, %c0_174] : memref<8x16x64xf32, #tpu.memory_space<vmem>>, vector<1x16x64xf32>
    %322 = vector.shape_cast %321 : vector<1x16x64xf32> to vector<16x64xf32>
    %323 = vector.extract_strided_slice %322 {offsets = [0, 0], sizes = [16, 48], strides = [1, 1]} : vector<16x64xf32> to vector<16x48xf32>
    %c0_175 = arith.constant 0 : index
    %c0_176 = arith.constant 0 : index
    %324 = vector.load %arg6[%c0_175, %c0_176] : memref<64x32xf32, #tpu.memory_space<vmem>>, vector<48x32xf32>
    %cst_177 = arith.constant dense<0.000000e+00> : vector<16x32xf32>
    %325 = tpu.matmul %323, %324, %cst_177 {dimension_numbers = #tpu.dot_dimension_numbers<[1], [0], [0], [1], [0, 0, 1, 1], [], []>} : vector<16x48xf32>, vector<48x32xf32>, vector<16x32xf32> -> vector<16x32xf32>
    %cst_178 = arith.constant 0.000000e+00 : f32
    %326 = vector.shape_cast %199 : vector<1x32xi1> to vector<1x32xi1>
    %327 = vector.broadcast %326 : vector<1x32xi1> to vector<16x32xi1>
    %328 = vector.broadcast %cst_178 : f32 to vector<16x32xf32>
    %329 = arith.select %327, %325, %328 : vector<16x32xi1>, vector<16x32xf32>
    %cst_179 = arith.constant dense<0.000000e+00> : vector<16x2xf32>
    %330 = tpu.matmul %329, %22, %cst_179 {dimension_numbers = #tpu.dot_dimension_numbers<[1], [0], [0], [1], [0, 0, 1, 1], [], []>} : vector<16x32xf32>, vector<32x2xf32>, vector<16x2xf32> -> vector<16x2xf32>
    %cst_180 = arith.constant 2.500000e-01 : f32
    %331 = vector.broadcast %cst_180 : f32 to vector<16x2xf32>
    %332 = arith.mulf %330, %331 : vector<16x2xf32>
    %333 = arith.mulf %329, %329 : vector<16x32xf32>
    %cst_181 = arith.constant dense<0.000000e+00> : vector<16x2xf32>
    %334 = tpu.matmul %333, %22, %cst_181 {dimension_numbers = #tpu.dot_dimension_numbers<[1], [0], [0], [1], [0, 0, 1, 1], [], []>} : vector<16x32xf32>, vector<32x2xf32>, vector<16x2xf32> -> vector<16x2xf32>
    %cst_182 = arith.constant 2.500000e-01 : f32
    %335 = vector.broadcast %cst_182 : f32 to vector<16x2xf32>
    %336 = arith.mulf %334, %335 : vector<16x2xf32>
    %337 = arith.mulf %332, %332 : vector<16x2xf32>
    %338 = arith.subf %336, %337 : vector<16x2xf32>
    %c40 = arith.constant 40 : index
    %c0_183 = arith.constant 0 : index
    %339 = vector.load %arg3[%c40, %c0_183] : memref<96x2xf32, #tpu.memory_space<vmem>>, vector<16x1xf32>
    %c40_184 = arith.constant 40 : index
    %c1_185 = arith.constant 1 : index
    %340 = vector.load %arg3[%c40_184, %c1_185] : memref<96x2xf32, #tpu.memory_space<vmem>>, vector<16x1xf32>
    %cst_186 = arith.constant 9.99999974E-6 : f32
    %341 = vector.broadcast %cst_186 : f32 to vector<16x2xf32>
    %342 = arith.addf %338, %341 : vector<16x2xf32>
    %343 = math.rsqrt %342 : vector<16x2xf32>
    %344 = vector.broadcast %339 : vector<16x1xf32> to vector<16x2xf32>
    %345 = arith.mulf %343, %344 : vector<16x2xf32>
    %346 = arith.mulf %332, %345 : vector<16x2xf32>
    %347 = vector.broadcast %340 : vector<16x1xf32> to vector<16x2xf32>
    %348 = arith.subf %347, %346 : vector<16x2xf32>
    %cst_187 = arith.constant dense<0.000000e+00> : vector<16x32xf32>
    %349 = tpu.matmul %345, %36, %cst_187 {dimension_numbers = #tpu.dot_dimension_numbers<[1], [0], [0], [1], [0, 0, 1, 1], [], []>} : vector<16x2xf32>, vector<2x32xf32>, vector<16x32xf32> -> vector<16x32xf32>
    %cst_188 = arith.constant dense<0.000000e+00> : vector<16x32xf32>
    %350 = tpu.matmul %348, %36, %cst_188 {dimension_numbers = #tpu.dot_dimension_numbers<[1], [0], [0], [1], [0, 0, 1, 1], [], []>} : vector<16x2xf32>, vector<2x32xf32>, vector<16x32xf32> -> vector<16x32xf32>
    %351 = arith.mulf %329, %349 : vector<16x32xf32>
    %352 = arith.addf %351, %350 : vector<16x32xf32>
    %cst_189 = arith.constant 0.000000e+00 : f32
    %353 = vector.shape_cast %199 : vector<1x32xi1> to vector<1x32xi1>
    %354 = vector.broadcast %353 : vector<1x32xi1> to vector<16x32xi1>
    %355 = vector.broadcast %cst_189 : f32 to vector<16x32xf32>
    %356 = arith.select %354, %352, %355 : vector<16x32xi1>, vector<16x32xf32>
    %c0_190 = arith.constant 0 : index
    %c4_191 = arith.constant 4 : index
    %357 = vector.load %arg7[%c0_190, %c4_191] : memref<16x40xf32, #tpu.memory_space<vmem>>, vector<16x32xf32>
    tpu.vector_store %arg7[%c0_190, %c4_191], %356 {strides = array<i32>} : memref<16x40xf32, #tpu.memory_space<vmem>>, vector<16x32xf32>,
    %c0_192 = arith.constant 0 : index
    %c0_193 = arith.constant 0 : index
    %358 = vector.load %arg7[%c0_192, %c0_193] : memref<16x40xf32, #tpu.memory_space<vmem>>, vector<16x32xf32>
    %cst_194 = arith.constant 0.000000e+00 : f32
    %359 = vector.shape_cast %246 : vector<1x32xi1> to vector<1x32xi1>
    %360 = vector.broadcast %359 : vector<1x32xi1> to vector<16x32xi1>
    %361 = vector.broadcast %cst_194 : f32 to vector<16x32xf32>
    %362 = arith.select %360, %358, %361 : vector<16x32xi1>, vector<16x32xf32>
    %c0_195 = arith.constant 0 : index
    %c0_196 = arith.constant 0 : index
    %363 = vector.load %arg6[%c0_195, %c0_196] : memref<64x32xf32, #tpu.memory_space<vmem>>, vector<16x32xf32>
    tpu.vector_store %arg6[%c0_195, %c0_196], %362 {strides = array<i32>} : memref<64x32xf32, #tpu.memory_space<vmem>>, vector<16x32xf32>,
    %c0_197 = arith.constant 0 : index
    %c4_198 = arith.constant 4 : index
    %364 = vector.load %arg7[%c0_197, %c4_198] : memref<16x40xf32, #tpu.memory_space<vmem>>, vector<16x32xf32>
    %cst_199 = arith.constant 0.000000e+00 : f32
    %365 = vector.shape_cast %67 : vector<1x32xi1> to vector<1x32xi1>
    %366 = vector.broadcast %365 : vector<1x32xi1> to vector<16x32xi1>
    %367 = vector.broadcast %cst_199 : f32 to vector<16x32xf32>
    %368 = arith.select %366, %364, %367 : vector<16x32xi1>, vector<16x32xf32>
    %c16_200 = arith.constant 16 : index
    %c0_201 = arith.constant 0 : index
    %369 = vector.load %arg6[%c16_200, %c0_201] : memref<64x32xf32, #tpu.memory_space<vmem>>, vector<16x32xf32>
    tpu.vector_store %arg6[%c16_200, %c0_201], %368 {strides = array<i32>} : memref<64x32xf32, #tpu.memory_space<vmem>>, vector<16x32xf32>,
    %c0_202 = arith.constant 0 : index
    %c8_203 = arith.constant 8 : index
    %370 = vector.load %arg7[%c0_202, %c8_203] : memref<16x40xf32, #tpu.memory_space<vmem>>, vector<16x32xf32>
    %cst_204 = arith.constant 0.000000e+00 : f32
    %371 = vector.shape_cast %185 : vector<1x32xi1> to vector<1x32xi1>
    %372 = vector.broadcast %371 : vector<1x32xi1> to vector<16x32xi1>
    %373 = vector.broadcast %cst_204 : f32 to vector<16x32xf32>
    %374 = arith.select %372, %370, %373 : vector<16x32xi1>, vector<16x32xf32>
    %c32_205 = arith.constant 32 : index
    %c0_206 = arith.constant 0 : index
    %375 = vector.load %arg6[%c32_205, %c0_206] : memref<64x32xf32, #tpu.memory_space<vmem>>, vector<16x32xf32>
    tpu.vector_store %arg6[%c32_205, %c0_206], %374 {strides = array<i32>} : memref<64x32xf32, #tpu.memory_space<vmem>>, vector<16x32xf32>,
    %c4_207 = arith.constant 4 : index
    %c0_208 = arith.constant 0 : index
    %c0_209 = arith.constant 0 : index
    %376 = vector.load %arg2[%c4_207, %c0_208, %c0_209] : memref<8x16x64xf32, #tpu.memory_space<vmem>>, vector<1x16x64xf32>
    %377 = vector.shape_cast %376 : vector<1x16x64xf32> to vector<16x64xf32>
    %378 = vector.extract_strided_slice %377 {offsets = [0, 0], sizes = [16, 48], strides = [1, 1]} : vector<16x64xf32> to vector<16x48xf32>
    %c0_210 = arith.constant 0 : index
    %c0_211 = arith.constant 0 : index
    %379 = vector.load %arg6[%c0_210, %c0_211] : memref<64x32xf32, #tpu.memory_space<vmem>>, vector<48x32xf32>
    %cst_212 = arith.constant dense<0.000000e+00> : vector<16x32xf32>
    %380 = tpu.matmul %378, %379, %cst_212 {dimension_numbers = #tpu.dot_dimension_numbers<[1], [0], [0], [1], [0, 0, 1, 1], [], []>} : vector<16x48xf32>, vector<48x32xf32>, vector<16x32xf32> -> vector<16x32xf32>
    %cst_213 = arith.constant 0.000000e+00 : f32
    %381 = vector.shape_cast %199 : vector<1x32xi1> to vector<1x32xi1>
    %382 = vector.broadcast %381 : vector<1x32xi1> to vector<16x32xi1>
    %383 = vector.broadcast %cst_213 : f32 to vector<16x32xf32>
    %384 = arith.select %382, %380, %383 : vector<16x32xi1>, vector<16x32xf32>
    %cst_214 = arith.constant dense<0.000000e+00> : vector<16x2xf32>
    %385 = tpu.matmul %384, %22, %cst_214 {dimension_numbers = #tpu.dot_dimension_numbers<[1], [0], [0], [1], [0, 0, 1, 1], [], []>} : vector<16x32xf32>, vector<32x2xf32>, vector<16x2xf32> -> vector<16x2xf32>
    %cst_215 = arith.constant 2.500000e-01 : f32
    %386 = vector.broadcast %cst_215 : f32 to vector<16x2xf32>
    %387 = arith.mulf %385, %386 : vector<16x2xf32>
    %388 = arith.mulf %384, %384 : vector<16x32xf32>
    %cst_216 = arith.constant dense<0.000000e+00> : vector<16x2xf32>
    %389 = tpu.matmul %388, %22, %cst_216 {dimension_numbers = #tpu.dot_dimension_numbers<[1], [0], [0], [1], [0, 0, 1, 1], [], []>} : vector<16x32xf32>, vector<32x2xf32>, vector<16x2xf32> -> vector<16x2xf32>
    %cst_217 = arith.constant 2.500000e-01 : f32
    %390 = vector.broadcast %cst_217 : f32 to vector<16x2xf32>
    %391 = arith.mulf %389, %390 : vector<16x2xf32>
    %392 = arith.mulf %387, %387 : vector<16x2xf32>
    %393 = arith.subf %391, %392 : vector<16x2xf32>
    %c56 = arith.constant 56 : index
    %c0_218 = arith.constant 0 : index
    %394 = vector.load %arg3[%c56, %c0_218] : memref<96x2xf32, #tpu.memory_space<vmem>>, vector<16x1xf32>
    %c56_219 = arith.constant 56 : index
    %c1_220 = arith.constant 1 : index
    %395 = vector.load %arg3[%c56_219, %c1_220] : memref<96x2xf32, #tpu.memory_space<vmem>>, vector<16x1xf32>
    %cst_221 = arith.constant 9.99999974E-6 : f32
    %396 = vector.broadcast %cst_221 : f32 to vector<16x2xf32>
    %397 = arith.addf %393, %396 : vector<16x2xf32>
    %398 = math.rsqrt %397 : vector<16x2xf32>
    %399 = vector.broadcast %394 : vector<16x1xf32> to vector<16x2xf32>
    %400 = arith.mulf %398, %399 : vector<16x2xf32>
    %401 = arith.mulf %387, %400 : vector<16x2xf32>
    %402 = vector.broadcast %395 : vector<16x1xf32> to vector<16x2xf32>
    %403 = arith.subf %402, %401 : vector<16x2xf32>
    %cst_222 = arith.constant dense<0.000000e+00> : vector<16x32xf32>
    %404 = tpu.matmul %400, %36, %cst_222 {dimension_numbers = #tpu.dot_dimension_numbers<[1], [0], [0], [1], [0, 0, 1, 1], [], []>} : vector<16x2xf32>, vector<2x32xf32>, vector<16x32xf32> -> vector<16x32xf32>
    %cst_223 = arith.constant dense<0.000000e+00> : vector<16x32xf32>
    %405 = tpu.matmul %403, %36, %cst_223 {dimension_numbers = #tpu.dot_dimension_numbers<[1], [0], [0], [1], [0, 0, 1, 1], [], []>} : vector<16x2xf32>, vector<2x32xf32>, vector<16x32xf32> -> vector<16x32xf32>
    %406 = arith.mulf %384, %404 : vector<16x32xf32>
    %407 = arith.addf %406, %405 : vector<16x32xf32>
    %cst_224 = arith.constant 0.000000e+00 : f32
    %408 = vector.shape_cast %199 : vector<1x32xi1> to vector<1x32xi1>
    %409 = vector.broadcast %408 : vector<1x32xi1> to vector<16x32xi1>
    %410 = vector.broadcast %cst_224 : f32 to vector<16x32xf32>
    %411 = arith.select %409, %407, %410 : vector<16x32xi1>, vector<16x32xf32>
    %cst_225 = arith.constant 0.000000e+00 : f32
    %412 = vector.broadcast %cst_225 : f32 to vector<16x32xf32>
    %413 = arith.maximumf %411, %412 : vector<16x32xf32>
    %c0_226 = arith.constant 0 : index
    %c4_227 = arith.constant 4 : index
    %414 = vector.load %arg7[%c0_226, %c4_227] : memref<16x40xf32, #tpu.memory_space<vmem>>, vector<16x32xf32>
    tpu.vector_store %arg7[%c0_226, %c4_227], %413 {strides = array<i32>} : memref<16x40xf32, #tpu.memory_space<vmem>>, vector<16x32xf32>,
    %c0_228 = arith.constant 0 : index
    %c0_229 = arith.constant 0 : index
    %415 = vector.load %arg7[%c0_228, %c0_229] : memref<16x40xf32, #tpu.memory_space<vmem>>, vector<16x32xf32>
    %cst_230 = arith.constant 0.000000e+00 : f32
    %416 = vector.shape_cast %246 : vector<1x32xi1> to vector<1x32xi1>
    %417 = vector.broadcast %416 : vector<1x32xi1> to vector<16x32xi1>
    %418 = vector.broadcast %cst_230 : f32 to vector<16x32xf32>
    %419 = arith.select %417, %415, %418 : vector<16x32xi1>, vector<16x32xf32>
    %c0_231 = arith.constant 0 : index
    %c0_232 = arith.constant 0 : index
    %420 = vector.load %arg6[%c0_231, %c0_232] : memref<64x32xf32, #tpu.memory_space<vmem>>, vector<16x32xf32>
    tpu.vector_store %arg6[%c0_231, %c0_232], %419 {strides = array<i32>} : memref<64x32xf32, #tpu.memory_space<vmem>>, vector<16x32xf32>,
    %c0_233 = arith.constant 0 : index
    %c4_234 = arith.constant 4 : index
    %421 = vector.load %arg7[%c0_233, %c4_234] : memref<16x40xf32, #tpu.memory_space<vmem>>, vector<16x32xf32>
    %cst_235 = arith.constant 0.000000e+00 : f32
    %422 = vector.shape_cast %67 : vector<1x32xi1> to vector<1x32xi1>
    %423 = vector.broadcast %422 : vector<1x32xi1> to vector<16x32xi1>
    %424 = vector.broadcast %cst_235 : f32 to vector<16x32xf32>
    %425 = arith.select %423, %421, %424 : vector<16x32xi1>, vector<16x32xf32>
    %c16_236 = arith.constant 16 : index
    %c0_237 = arith.constant 0 : index
    %426 = vector.load %arg6[%c16_236, %c0_237] : memref<64x32xf32, #tpu.memory_space<vmem>>, vector<16x32xf32>
    tpu.vector_store %arg6[%c16_236, %c0_237], %425 {strides = array<i32>} : memref<64x32xf32, #tpu.memory_space<vmem>>, vector<16x32xf32>,
    %c0_238 = arith.constant 0 : index
    %c8_239 = arith.constant 8 : index
    %427 = vector.load %arg7[%c0_238, %c8_239] : memref<16x40xf32, #tpu.memory_space<vmem>>, vector<16x32xf32>
    %cst_240 = arith.constant 0.000000e+00 : f32
    %428 = vector.shape_cast %185 : vector<1x32xi1> to vector<1x32xi1>
    %429 = vector.broadcast %428 : vector<1x32xi1> to vector<16x32xi1>
    %430 = vector.broadcast %cst_240 : f32 to vector<16x32xf32>
    %431 = arith.select %429, %427, %430 : vector<16x32xi1>, vector<16x32xf32>
    %c32_241 = arith.constant 32 : index
    %c0_242 = arith.constant 0 : index
    %432 = vector.load %arg6[%c32_241, %c0_242] : memref<64x32xf32, #tpu.memory_space<vmem>>, vector<16x32xf32>
    tpu.vector_store %arg6[%c32_241, %c0_242], %431 {strides = array<i32>} : memref<64x32xf32, #tpu.memory_space<vmem>>, vector<16x32xf32>,
    %c5_243 = arith.constant 5 : index
    %c0_244 = arith.constant 0 : index
    %c0_245 = arith.constant 0 : index
    %433 = vector.load %arg2[%c5_243, %c0_244, %c0_245] : memref<8x16x64xf32, #tpu.memory_space<vmem>>, vector<1x16x64xf32>
    %434 = vector.shape_cast %433 : vector<1x16x64xf32> to vector<16x64xf32>
    %435 = vector.extract_strided_slice %434 {offsets = [0, 0], sizes = [16, 48], strides = [1, 1]} : vector<16x64xf32> to vector<16x48xf32>
    %c0_246 = arith.constant 0 : index
    %c0_247 = arith.constant 0 : index
    %436 = vector.load %arg6[%c0_246, %c0_247] : memref<64x32xf32, #tpu.memory_space<vmem>>, vector<48x32xf32>
    %cst_248 = arith.constant dense<0.000000e+00> : vector<16x32xf32>
    %437 = tpu.matmul %435, %436, %cst_248 {dimension_numbers = #tpu.dot_dimension_numbers<[1], [0], [0], [1], [0, 0, 1, 1], [], []>} : vector<16x48xf32>, vector<48x32xf32>, vector<16x32xf32> -> vector<16x32xf32>
    %cst_249 = arith.constant 0.000000e+00 : f32
    %438 = vector.shape_cast %199 : vector<1x32xi1> to vector<1x32xi1>
    %439 = vector.broadcast %438 : vector<1x32xi1> to vector<16x32xi1>
    %440 = vector.broadcast %cst_249 : f32 to vector<16x32xf32>
    %441 = arith.select %439, %437, %440 : vector<16x32xi1>, vector<16x32xf32>
    %cst_250 = arith.constant dense<0.000000e+00> : vector<16x2xf32>
    %442 = tpu.matmul %441, %22, %cst_250 {dimension_numbers = #tpu.dot_dimension_numbers<[1], [0], [0], [1], [0, 0, 1, 1], [], []>} : vector<16x32xf32>, vector<32x2xf32>, vector<16x2xf32> -> vector<16x2xf32>
    %cst_251 = arith.constant 2.500000e-01 : f32
    %443 = vector.broadcast %cst_251 : f32 to vector<16x2xf32>
    %444 = arith.mulf %442, %443 : vector<16x2xf32>
    %445 = arith.mulf %441, %441 : vector<16x32xf32>
    %cst_252 = arith.constant dense<0.000000e+00> : vector<16x2xf32>
    %446 = tpu.matmul %445, %22, %cst_252 {dimension_numbers = #tpu.dot_dimension_numbers<[1], [0], [0], [1], [0, 0, 1, 1], [], []>} : vector<16x32xf32>, vector<32x2xf32>, vector<16x2xf32> -> vector<16x2xf32>
    %cst_253 = arith.constant 2.500000e-01 : f32
    %447 = vector.broadcast %cst_253 : f32 to vector<16x2xf32>
    %448 = arith.mulf %446, %447 : vector<16x2xf32>
    %449 = arith.mulf %444, %444 : vector<16x2xf32>
    %450 = arith.subf %448, %449 : vector<16x2xf32>
    %c72 = arith.constant 72 : index
    %c0_254 = arith.constant 0 : index
    %451 = vector.load %arg3[%c72, %c0_254] : memref<96x2xf32, #tpu.memory_space<vmem>>, vector<16x1xf32>
    %c72_255 = arith.constant 72 : index
    %c1_256 = arith.constant 1 : index
    %452 = vector.load %arg3[%c72_255, %c1_256] : memref<96x2xf32, #tpu.memory_space<vmem>>, vector<16x1xf32>
    %cst_257 = arith.constant 9.99999974E-6 : f32
    %453 = vector.broadcast %cst_257 : f32 to vector<16x2xf32>
    %454 = arith.addf %450, %453 : vector<16x2xf32>
    %455 = math.rsqrt %454 : vector<16x2xf32>
    %456 = vector.broadcast %451 : vector<16x1xf32> to vector<16x2xf32>
    %457 = arith.mulf %455, %456 : vector<16x2xf32>
    %458 = arith.mulf %444, %457 : vector<16x2xf32>
    %459 = vector.broadcast %452 : vector<16x1xf32> to vector<16x2xf32>
    %460 = arith.subf %459, %458 : vector<16x2xf32>
    %cst_258 = arith.constant dense<0.000000e+00> : vector<16x32xf32>
    %461 = tpu.matmul %457, %36, %cst_258 {dimension_numbers = #tpu.dot_dimension_numbers<[1], [0], [0], [1], [0, 0, 1, 1], [], []>} : vector<16x2xf32>, vector<2x32xf32>, vector<16x32xf32> -> vector<16x32xf32>
    %cst_259 = arith.constant dense<0.000000e+00> : vector<16x32xf32>
    %462 = tpu.matmul %460, %36, %cst_259 {dimension_numbers = #tpu.dot_dimension_numbers<[1], [0], [0], [1], [0, 0, 1, 1], [], []>} : vector<16x2xf32>, vector<2x32xf32>, vector<16x32xf32> -> vector<16x32xf32>
    %463 = arith.mulf %441, %461 : vector<16x32xf32>
    %464 = arith.addf %463, %462 : vector<16x32xf32>
    %cst_260 = arith.constant 0.000000e+00 : f32
    %465 = vector.shape_cast %199 : vector<1x32xi1> to vector<1x32xi1>
    %466 = vector.broadcast %465 : vector<1x32xi1> to vector<16x32xi1>
    %467 = vector.broadcast %cst_260 : f32 to vector<16x32xf32>
    %468 = arith.select %466, %464, %467 : vector<16x32xi1>, vector<16x32xf32>
    %c0_261 = arith.constant 0 : index
    %c4_262 = arith.constant 4 : index
    %469 = vector.load %arg7[%c0_261, %c4_262] : memref<16x40xf32, #tpu.memory_space<vmem>>, vector<16x32xf32>
    tpu.vector_store %arg7[%c0_261, %c4_262], %468 {strides = array<i32>} : memref<16x40xf32, #tpu.memory_space<vmem>>, vector<16x32xf32>,
    %c0_263 = arith.constant 0 : index
    %c6_264 = arith.constant 6 : index
    %470 = vector.load %arg7[%c0_263, %c6_264] : memref<16x40xf32, #tpu.memory_space<vmem>>, vector<16x32xf32>
    %cst_265 = arith.constant 0.000000e+00 : f32
    %471 = vector.shape_cast %97 : vector<1x32xi1> to vector<1x32xi1>
    %472 = vector.broadcast %471 : vector<1x32xi1> to vector<16x32xi1>
    %473 = vector.broadcast %cst_265 : f32 to vector<16x32xf32>
    %474 = arith.select %472, %470, %473 : vector<16x32xi1>, vector<16x32xf32>
    %c0_266 = arith.constant 0 : index
    %c0_267 = arith.constant 0 : index
    %475 = vector.load %arg6[%c0_266, %c0_267] : memref<64x32xf32, #tpu.memory_space<vmem>>, vector<16x32xf32>
    tpu.vector_store %arg6[%c0_266, %c0_267], %474 {strides = array<i32>} : memref<64x32xf32, #tpu.memory_space<vmem>>, vector<16x32xf32>,
    %c0_268 = arith.constant 0 : index
    %c4_269 = arith.constant 4 : index
    %476 = vector.load %arg7[%c0_268, %c4_269] : memref<16x40xf32, #tpu.memory_space<vmem>>, vector<16x32xf32>
    %cst_270 = arith.constant 0.000000e+00 : f32
    %477 = vector.shape_cast %67 : vector<1x32xi1> to vector<1x32xi1>
    %478 = vector.broadcast %477 : vector<1x32xi1> to vector<16x32xi1>
    %479 = vector.broadcast %cst_270 : f32 to vector<16x32xf32>
    %480 = arith.select %478, %476, %479 : vector<16x32xi1>, vector<16x32xf32>
    %c16_271 = arith.constant 16 : index
    %c0_272 = arith.constant 0 : index
    %481 = vector.load %arg6[%c16_271, %c0_272] : memref<64x32xf32, #tpu.memory_space<vmem>>, vector<16x32xf32>
    tpu.vector_store %arg6[%c16_271, %c0_272], %480 {strides = array<i32>} : memref<64x32xf32, #tpu.memory_space<vmem>>, vector<16x32xf32>,
    %c0_273 = arith.constant 0 : index
    %c2_274 = arith.constant 2 : index
    %482 = vector.load %arg7[%c0_273, %c2_274] : memref<16x40xf32, #tpu.memory_space<vmem>>, vector<16x32xf32>
    %cst_275 = arith.constant 0.000000e+00 : f32
    %483 = vector.shape_cast %158 : vector<1x32xi1> to vector<1x32xi1>
    %484 = vector.broadcast %483 : vector<1x32xi1> to vector<16x32xi1>
    %485 = vector.broadcast %cst_275 : f32 to vector<16x32xf32>
    %486 = arith.select %484, %482, %485 : vector<16x32xi1>, vector<16x32xf32>
    %c32_276 = arith.constant 32 : index
    %c0_277 = arith.constant 0 : index
    %487 = vector.load %arg6[%c32_276, %c0_277] : memref<64x32xf32, #tpu.memory_space<vmem>>, vector<16x32xf32>
    tpu.vector_store %arg6[%c32_276, %c0_277], %486 {strides = array<i32>} : memref<64x32xf32, #tpu.memory_space<vmem>>, vector<16x32xf32>,
    %c0_278 = arith.constant 0 : index
    %c0_279 = arith.constant 0 : index
    %488 = vector.load %arg7[%c0_278, %c0_279] : memref<16x40xf32, #tpu.memory_space<vmem>>, vector<16x32xf32>
    %cst_280 = arith.constant 0.000000e+00 : f32
    %489 = vector.shape_cast %246 : vector<1x32xi1> to vector<1x32xi1>
    %490 = vector.broadcast %489 : vector<1x32xi1> to vector<16x32xi1>
    %491 = vector.broadcast %cst_280 : f32 to vector<16x32xf32>
    %492 = arith.select %490, %488, %491 : vector<16x32xi1>, vector<16x32xf32>
    %c48 = arith.constant 48 : index
    %c0_281 = arith.constant 0 : index
    %493 = vector.load %arg6[%c48, %c0_281] : memref<64x32xf32, #tpu.memory_space<vmem>>, vector<16x32xf32>
    tpu.vector_store %arg6[%c48, %c0_281], %492 {strides = array<i32>} : memref<64x32xf32, #tpu.memory_space<vmem>>, vector<16x32xf32>,
    %c6_282 = arith.constant 6 : index
    %c0_283 = arith.constant 0 : index
    %c0_284 = arith.constant 0 : index
    %494 = vector.load %arg2[%c6_282, %c0_283, %c0_284] : memref<8x16x64xf32, #tpu.memory_space<vmem>>, vector<1x16x64xf32>
    %495 = vector.shape_cast %494 : vector<1x16x64xf32> to vector<16x64xf32>
    %496 = vector.extract_strided_slice %495 {offsets = [0, 0], sizes = [8, 64], strides = [1, 1]} : vector<16x64xf32> to vector<8x64xf32>
    %c0_285 = arith.constant 0 : index
    %c0_286 = arith.constant 0 : index
    %497 = vector.load %arg6[%c0_285, %c0_286] : memref<64x32xf32, #tpu.memory_space<vmem>>, vector<64x32xf32>
    %cst_287 = arith.constant dense<0.000000e+00> : vector<8x32xf32>
    %498 = tpu.matmul %496, %497, %cst_287 {dimension_numbers = #tpu.dot_dimension_numbers<[1], [0], [0], [1], [0, 0, 1, 1], [], []>} : vector<8x64xf32>, vector<64x32xf32>, vector<8x32xf32> -> vector<8x32xf32>
    %cst_288 = arith.constant 0.000000e+00 : f32
    %499 = vector.shape_cast %111 : vector<1x32xi1> to vector<1x32xi1>
    %500 = vector.broadcast %499 : vector<1x32xi1> to vector<8x32xi1>
    %501 = vector.broadcast %cst_288 : f32 to vector<8x32xf32>
    %502 = arith.select %500, %498, %501 : vector<8x32xi1>, vector<8x32xf32>
    %cst_289 = arith.constant dense<0.000000e+00> : vector<8x2xf32>
    %503 = tpu.matmul %502, %22, %cst_289 {dimension_numbers = #tpu.dot_dimension_numbers<[1], [0], [0], [1], [0, 0, 1, 1], [], []>} : vector<8x32xf32>, vector<32x2xf32>, vector<8x2xf32> -> vector<8x2xf32>
    %cst_290 = arith.constant 1.250000e-01 : f32
    %504 = vector.broadcast %cst_290 : f32 to vector<8x2xf32>
    %505 = arith.mulf %503, %504 : vector<8x2xf32>
    %506 = arith.mulf %502, %502 : vector<8x32xf32>
    %cst_291 = arith.constant dense<0.000000e+00> : vector<8x2xf32>
    %507 = tpu.matmul %506, %22, %cst_291 {dimension_numbers = #tpu.dot_dimension_numbers<[1], [0], [0], [1], [0, 0, 1, 1], [], []>} : vector<8x32xf32>, vector<32x2xf32>, vector<8x2xf32> -> vector<8x2xf32>
    %cst_292 = arith.constant 1.250000e-01 : f32
    %508 = vector.broadcast %cst_292 : f32 to vector<8x2xf32>
    %509 = arith.mulf %507, %508 : vector<8x2xf32>
    %510 = arith.mulf %505, %505 : vector<8x2xf32>
    %511 = arith.subf %509, %510 : vector<8x2xf32>
    %c88 = arith.constant 88 : index
    %c0_293 = arith.constant 0 : index
    %512 = vector.load %arg3[%c88, %c0_293] : memref<96x2xf32, #tpu.memory_space<vmem>>, vector<8x1xf32>
    %c88_294 = arith.constant 88 : index
    %c1_295 = arith.constant 1 : index
    %513 = vector.load %arg3[%c88_294, %c1_295] : memref<96x2xf32, #tpu.memory_space<vmem>>, vector<8x1xf32>
    %cst_296 = arith.constant 9.99999974E-6 : f32
    %514 = vector.broadcast %cst_296 : f32 to vector<8x2xf32>
    %515 = arith.addf %511, %514 : vector<8x2xf32>
    %516 = math.rsqrt %515 : vector<8x2xf32>
    %517 = vector.broadcast %512 : vector<8x1xf32> to vector<8x2xf32>
    %518 = arith.mulf %516, %517 : vector<8x2xf32>
    %519 = arith.mulf %505, %518 : vector<8x2xf32>
    %520 = vector.broadcast %513 : vector<8x1xf32> to vector<8x2xf32>
    %521 = arith.subf %520, %519 : vector<8x2xf32>
    %cst_297 = arith.constant dense<0.000000e+00> : vector<8x32xf32>
    %522 = tpu.matmul %518, %36, %cst_297 {dimension_numbers = #tpu.dot_dimension_numbers<[1], [0], [0], [1], [0, 0, 1, 1], [], []>} : vector<8x2xf32>, vector<2x32xf32>, vector<8x32xf32> -> vector<8x32xf32>
    %cst_298 = arith.constant dense<0.000000e+00> : vector<8x32xf32>
    %523 = tpu.matmul %521, %36, %cst_298 {dimension_numbers = #tpu.dot_dimension_numbers<[1], [0], [0], [1], [0, 0, 1, 1], [], []>} : vector<8x2xf32>, vector<2x32xf32>, vector<8x32xf32> -> vector<8x32xf32>
    %524 = arith.mulf %502, %522 : vector<8x32xf32>
    %525 = arith.addf %524, %523 : vector<8x32xf32>
    %cst_299 = arith.constant 0.000000e+00 : f32
    %526 = vector.shape_cast %111 : vector<1x32xi1> to vector<1x32xi1>
    %527 = vector.broadcast %526 : vector<1x32xi1> to vector<8x32xi1>
    %528 = vector.broadcast %cst_299 : f32 to vector<8x32xf32>
    %529 = arith.select %527, %525, %528 : vector<8x32xi1>, vector<8x32xf32>
    %cst_300 = arith.constant 0.000000e+00 : f32
    %530 = vector.broadcast %cst_300 : f32 to vector<8x32xf32>
    %531 = arith.cmpf oge, %529, %530 : vector<8x32xf32>
    %cst_301 = arith.constant 0.00999999977 : f32
    %532 = vector.broadcast %cst_301 : f32 to vector<8x32xf32>
    %533 = arith.mulf %532, %529 : vector<8x32xf32>
    %534 = arith.select %531, %529, %533 : vector<8x32xi1>, vector<8x32xf32>
    %c0_302 = arith.constant 0 : index
    %c4_303 = arith.constant 4 : index
    %535 = vector.load %arg7[%c0_302, %c4_303] : memref<16x40xf32, #tpu.memory_space<vmem>>, vector<8x32xf32>
    tpu.vector_store %arg7[%c0_302, %c4_303], %534 {strides = array<i32>} : memref<16x40xf32, #tpu.memory_space<vmem>>, vector<8x32xf32>,
    %c0_304 = arith.constant 0 : index
    %c5_305 = arith.constant 5 : index
    %536 = vector.load %arg7[%c0_304, %c5_305] : memref<16x40xf32, #tpu.memory_space<vmem>>, vector<8x32xf32>
    %cst_306 = arith.constant 0.000000e+00 : f32
    %537 = vector.shape_cast %82 : vector<1x32xi1> to vector<1x32xi1>
    %538 = vector.broadcast %537 : vector<1x32xi1> to vector<8x32xi1>
    %539 = vector.broadcast %cst_306 : f32 to vector<8x32xf32>
    %540 = arith.select %538, %536, %539 : vector<8x32xi1>, vector<8x32xf32>
    %c0_307 = arith.constant 0 : index
    %c0_308 = arith.constant 0 : index
    %541 = vector.load %arg6[%c0_307, %c0_308] : memref<64x32xf32, #tpu.memory_space<vmem>>, vector<8x32xf32>
    tpu.vector_store %arg6[%c0_307, %c0_308], %540 {strides = array<i32>} : memref<64x32xf32, #tpu.memory_space<vmem>>, vector<8x32xf32>,
    %c0_309 = arith.constant 0 : index
    %c4_310 = arith.constant 4 : index
    %542 = vector.load %arg7[%c0_309, %c4_310] : memref<16x40xf32, #tpu.memory_space<vmem>>, vector<8x32xf32>
    %cst_311 = arith.constant 0.000000e+00 : f32
    %543 = vector.shape_cast %67 : vector<1x32xi1> to vector<1x32xi1>
    %544 = vector.broadcast %543 : vector<1x32xi1> to vector<8x32xi1>
    %545 = vector.broadcast %cst_311 : f32 to vector<8x32xf32>
    %546 = arith.select %544, %542, %545 : vector<8x32xi1>, vector<8x32xf32>
    %c8_312 = arith.constant 8 : index
    %c0_313 = arith.constant 0 : index
    %547 = vector.load %arg6[%c8_312, %c0_313] : memref<64x32xf32, #tpu.memory_space<vmem>>, vector<8x32xf32>
    tpu.vector_store %arg6[%c8_312, %c0_313], %546 {strides = array<i32>} : memref<64x32xf32, #tpu.memory_space<vmem>>, vector<8x32xf32>,
    %c0_314 = arith.constant 0 : index
    %c3_315 = arith.constant 3 : index
    %548 = vector.load %arg7[%c0_314, %c3_315] : memref<16x40xf32, #tpu.memory_space<vmem>>, vector<8x32xf32>
    %cst_316 = arith.constant 0.000000e+00 : f32
    %549 = vector.shape_cast %52 : vector<1x32xi1> to vector<1x32xi1>
    %550 = vector.broadcast %549 : vector<1x32xi1> to vector<8x32xi1>
    %551 = vector.broadcast %cst_316 : f32 to vector<8x32xf32>
    %552 = arith.select %550, %548, %551 : vector<8x32xi1>, vector<8x32xf32>
    %c16_317 = arith.constant 16 : index
    %c0_318 = arith.constant 0 : index
    %553 = vector.load %arg6[%c16_317, %c0_318] : memref<64x32xf32, #tpu.memory_space<vmem>>, vector<8x32xf32>
    tpu.vector_store %arg6[%c16_317, %c0_318], %552 {strides = array<i32>} : memref<64x32xf32, #tpu.memory_space<vmem>>, vector<8x32xf32>,
    %c0_319 = arith.constant 0 : index
    %c2_320 = arith.constant 2 : index
    %554 = vector.load %arg7[%c0_319, %c2_320] : memref<16x40xf32, #tpu.memory_space<vmem>>, vector<8x32xf32>
    %cst_321 = arith.constant 0.000000e+00 : f32
    %555 = vector.shape_cast %158 : vector<1x32xi1> to vector<1x32xi1>
    %556 = vector.broadcast %555 : vector<1x32xi1> to vector<8x32xi1>
    %557 = vector.broadcast %cst_321 : f32 to vector<8x32xf32>
    %558 = arith.select %556, %554, %557 : vector<8x32xi1>, vector<8x32xf32>
    %c24_322 = arith.constant 24 : index
    %c0_323 = arith.constant 0 : index
    %559 = vector.load %arg6[%c24_322, %c0_323] : memref<64x32xf32, #tpu.memory_space<vmem>>, vector<8x32xf32>
    tpu.vector_store %arg6[%c24_322, %c0_323], %558 {strides = array<i32>} : memref<64x32xf32, #tpu.memory_space<vmem>>, vector<8x32xf32>,
    %c7 = arith.constant 7 : index
    %c0_324 = arith.constant 0 : index
    %c0_325 = arith.constant 0 : index
    %560 = vector.load %arg2[%c7, %c0_324, %c0_325] : memref<8x16x64xf32, #tpu.memory_space<vmem>>, vector<1x16x64xf32>
    %561 = vector.shape_cast %560 : vector<1x16x64xf32> to vector<16x64xf32>
    %562 = vector.extract_strided_slice %561 {offsets = [0, 0], sizes = [1, 32], strides = [1, 1]} : vector<16x64xf32> to vector<1x32xf32>
    %c0_326 = arith.constant 0 : index
    %c0_327 = arith.constant 0 : index
    %563 = vector.load %arg6[%c0_326, %c0_327] : memref<64x32xf32, #tpu.memory_space<vmem>>, vector<32x32xf32>
    %cst_328 = arith.constant dense<0.000000e+00> : vector<1x32xf32>
    %564 = tpu.matmul %562, %563, %cst_328 {dimension_numbers = #tpu.dot_dimension_numbers<[1], [0], [0], [1], [0, 0, 1, 1], [], []>} : vector<1x32xf32>, vector<32x32xf32>, vector<1x32xf32> -> vector<1x32xf32>
    %c0_329 = arith.constant 0 : index
    %c0_330 = arith.constant 0 : index
    %565 = vector.load %arg4[%c0_329, %c0_330] : memref<1x1xf32, #tpu.memory_space<vmem>>, vector<1x1xf32>
    %566 = vector.broadcast %565 : vector<1x1xf32> to vector<1x32xf32>
    %567 = arith.addf %564, %566 : vector<1x32xf32>
    %568 = math.tanh %567 : vector<1x32xf32>
    %c0_331 = arith.constant 0 : index
    %c0_332 = arith.constant 0 : index
    %569 = vector.load %arg5[%c0_331, %c0_332] : memref<1x32xf32, #tpu.memory_space<vmem>>, vector<1x32xf32>
    tpu.vector_store %arg5[%c0_331, %c0_332], %568 {strides = array<i32>} : memref<1x32xf32, #tpu.memory_space<vmem>>, vector<1x32xf32>,
    return
  }
  func.func @transform_0(%arg0: i32) -> (i32, i32) {
    %c0_i32 = arith.constant 0 : i32
    %c0_i32_0 = arith.constant 0 : i32
    return %c0_i32, %arg0 : i32, i32
  }
  func.func @transform_1(%arg0: i32) -> (i32, i32, i32) {
    %c0_i32 = arith.constant 0 : i32
    %c0_i32_0 = arith.constant 0 : i32
    %c0_i32_1 = arith.constant 0 : i32
    %c0_i32_2 = arith.constant 0 : i32
    return %c0_i32, %c0_i32_0, %c0_i32_1 : i32, i32, i32
  }
  func.func @transform_2(%arg0: i32) -> (i32, i32) {
    %c0_i32 = arith.constant 0 : i32
    %c0_i32_0 = arith.constant 0 : i32
    %c0_i32_1 = arith.constant 0 : i32
    return %c0_i32, %c0_i32_0 : i32, i32
  }
  func.func @transform_3(%arg0: i32) -> (i32, i32) {
    %c0_i32 = arith.constant 0 : i32
    %c0_i32_0 = arith.constant 0 : i32
    %c0_i32_1 = arith.constant 0 : i32
    return %c0_i32, %c0_i32_0 : i32, i32
  }
  func.func @transform_4(%arg0: i32) -> (i32, i32) {
    %c0_i32 = arith.constant 0 : i32
    %c0_i32_0 = arith.constant 0 : i32
    return %c0_i32, %arg0 : i32, i32
  }
}

</mosaic_0001>

<bundles_post_ra>
// kernel: tpu_custom_call.1
= control target key start
LH: loop header
LB: loop body
LE: loop exit
PB: predicated region body
PF: predicated region fallthrough
CT: control target
= control target key end

     0   :  { %s5388_s0 = inlined_call_operand.vmem [shape: f32[6,32], index: 0, kind: input, shape index: {}]   ;;  %s5389_s1 = inlined_call_operand.hbm [shape: f32[8,16,64], index: 1, kind: input, shape index: {}]   ;;  %s5390_s2 = inlined_call_operand.vmem [shape: f32[96,2], index: 2, kind: input, shape index: {}]   ;;  %s5391_s3 = inlined_call_operand.<no memory space> [shape: f32[1,1], index: 3, kind: input, shape index: {}]   ;;  %s5392_s4 = inlined_call_operand.hbm [shape: f32[1,32], index: 4, kind: output, shape index: {}]  }
   0x1   :  { %v9_v0 = vstv %s5391_s3 }
   0x2   :  { %10 = vst [vmem:[#allocation4] sm:$0x1] %v9_v0 }
   0x3   :  { %11 = vsyncpa [#allocation6], 0 }
   0x4   :  { %12 = vsyncpa [#allocation7], 0  ;;  %s4634_s17 = smov [#allocation5]   ;;  %s4586_s21 = scalar_lea.hbm %s5389_s1, 2048 }
   0x5   :  { %s20_s18 = sshll.u32 %s4634_s17, 4  ;;  %p4587_p0 = scmp.ne.s32.totalorder %s5389_s1, %s4586_s21  ;;  %s21_s18 = int_to_ptr.vmem [resolvable:$true] %s20_s18 }
   0x6   :  { %p4590_p1 = scmp.lt.u32.totalorder %s4586_s21, %s5389_s1 }
   0x8   :  { %p4592_p2 = pnand %p4590_p1, %p4587_p0 }
   0xa   :  { %4595 = shalt.err (!%p4592_p2)
}
   0xb   :  { %s4596_s3 = scalar_lea.vmem %s21_s18, 2048  ;;  %p4601_p4 = scmp.lt.s32.totalorder %s21_s18, %s21_s18 }
   0xc   :  { %p4597_p3 = scmp.ne.s32.totalorder %s21_s18, %s4596_s3  ;;  %p4602_p5 = scmp.lt.s32.totalorder %s4596_s3, %s4596_s3 }
   0xe   :  { %p4603_p6 = por %p4602_p5, %p4601_p4 }
  0x10   :  { %p4604_p7 = pnand %p4603_p6, %p4597_p3 }
  0x12   :  { %4607 = shalt.err (!%p4604_p7)
}
  0x13   :  { %s4635_s26 = smov 128   ;;  %s4636_s27 = smov 8  }
  0x14   :  { %26 = dma.hbm_to_vmem [thread:$0]  %s5389_s1, 2048, %s21_s18, [#allocation6], %s4635_s26, %s4635_s26, %s4636_s27  }
  0x15   :  { %4630 = dma.done.wait [#allocation6], 2048  }
  0x16   :  { %4631 = vsyncadd [#allocation6], 4294965248  ;;  %vm80_vm0 = vcmask 326656   ;;  %v4637_v1 = vmov 0.0   ;;  %v83_v2 = vld [vmem:[%s5388_s0] sm:$0x3f]  ;;  %v34_v4 = vlaneseq }
  0x17   :  { %81 = vst.msk [vmem:[#allocation3] sm:$0xff] %vm80_vm0, %v4637_v1  ;;  %82 = vst.msk [vmem:[#allocation3 + $0x8] sm:$0xff] %vm80_vm0, %v4637_v1  ;;  %vm5398_vm1 = vcmask 261120   ;;  %s4638_s6 = smov 4   ;;  %v4639_v3 = vmov 0   ;;  %vm88_vm2 = vcmask 291872  }
  0x18   :  { %85 = vrot.lane.b32.xlu0 %v83_v2, %s4638_s6  ;;  %73 = vst.msk [vmem:[#allocation2 + $0x8] sm:$0xff] %vm5398_vm1, %v4637_v1  ;;  %72 = vst.msk [vmem:[#allocation2] sm:$0xff] %vm5398_vm1, %v4637_v1  ;;  %4543 = vset.pattern.permute.xlu1 %v4639_v3  ;;  %v4714_v5 = vand.u32 127, %v34_v4  ;;  %v4717_v7 = vshrl.u32 %v34_v4, 7  ;;  %v4640_v12 = vmov 0.0|0.0   ;;  %s4641_s0 = smov 124  }
  0x19   :  { %74 = vst.msk [vmem:[#allocation2 + $0x10] sm:$0xff] %vm5398_vm1, %v4637_v1  ;;  %75 = vst.msk [vmem:[#allocation2 + $0x18] sm:$0xff] %vm5398_vm1, %v4637_v1  ;;  %4342 = vmatprep.subr.bf16.mxu0 %v4640_v12  ;;  %4348 = vmatprep.subr.bf16.mxu1 %v4640_v12  ;;  %s4642_s1 = smov 125   ;;  %vm5393_vm15 = vmmov 0   ;;  %s4644_s7 = smov 123   ;;  %v5406_v29 = vmov 0 }
  0x1a   :  { %76 = vst.msk [vmem:[#allocation2 + $0x20] sm:$0xff] %vm5398_vm1, %v4637_v1  ;;  %77 = vst.msk [vmem:[#allocation2 + $0x28] sm:$0xff] %vm5398_vm1, %v4637_v1  ;;  %v50_v6 = vadd.s32 1, %v4714_v5  ;;  %v45_v9 = vmul.u32 16, %v4714_v5  ;;  %v42_v11 = vadd.s32 8, %v4717_v7  ;;  %v43_v13 = vadd.s32 16, %v4717_v7  ;;  %4014 = vmatprep.mubr.msk.f32.mxu0 %vm5393_vm15, %v4637_v1  ;;  %4025 = vmatprep.mubr.msk.f32.mxu1 %vm5393_vm15, %v4637_v1 }
  0x1b   :  { %78 = vst.msk [vmem:[#allocation2 + $0x30] sm:$0xff] %vm5398_vm1, %v4637_v1  ;;  %79 = vst.msk [vmem:[#allocation2 + $0x38] sm:$0xff] %vm5398_vm1, %v4637_v1  ;;  %v44_v14 = vadd.s32 24, %v4717_v7  ;;  %s4645_s8 = smov 122   ;;  %v4646_v20 = vmov 1.0|1.0  }
  0x1c   :  { %v51_v10 = vmul.u32 16, %v50_v6  ;;  %vm46_vm3 = vcmp.ge.s32.totalorder %v4717_v7, %v45_v9  ;;  %vm47_vm5 = vcmp.ge.s32.totalorder %v42_v11, %v45_v9  ;;  %vm48_vm7 = vcmp.ge.s32.totalorder %v43_v13, %v45_v9  ;;  %v142_v46 = vld [vmem:[#allocation5] sm:$0xff]  ;;  %v376_v47 = vld [vmem:[%s5390_s2] sm:$0xff]  ;;  %s4648_s11 = smov 126   ;;  %s4649_s12 = smov 120  }
  0x1d   :  { %vm49_vm11 = vcmp.ge.s32.totalorder %v44_v14, %v45_v9  ;;  %v4647_v48 = vmov 1   ;;  %v66_v55 = vadd.s32 1, %v4717_v7  ;;  %v64_v56 = vmul.u32 16, %v4717_v7 }
  0x1e   :  { %vm52_vm4 = vcmp.lt.s32.totalorder %v4717_v7, %v51_v10  ;;  %vm53_vm6 = vcmp.lt.s32.totalorder %v42_v11, %v51_v10  ;;  %vm54_vm8 = vcmp.lt.s32.totalorder %v43_v13, %v51_v10  ;;  %vm55_vm12 = vcmp.lt.s32.totalorder %v44_v14, %v51_v10  ;;  %4544 = vset.pattern.permute.xlu0 %v4647_v48 }
  0x1f   :  { %vm56_vm9 = vmand %vm46_vm3, %vm52_vm4  ;;  %vm36_vm3 = vcmp.ge.s32.totalorder %v4714_v5, 16  ;;  %v67_v57 = vmul.u32 16, %v66_v55  ;;  %v596_v55 = vld [vmem:[#allocation5 + $0x18] sm:$0xff] }
  0x20   :  { %vm57_vm10 = vmand %vm47_vm5, %vm53_vm6  ;;  %v37_v22 = vsel %vm36_vm3, 1, %v4639_v3 }
  0x21   :  { %vm58_vm13 = vmand %vm48_vm7, %vm54_vm8  ;;  %v38_v23 = vmul.u32 16, %v37_v22 }
  0x22   :  { %vm4729_vm14 = vmpackc.low %vm57_vm10, %vm56_vm9 }
  0x23   :  { %vm59_vm0 = vmand %vm49_vm11, %vm55_vm12  ;;  %4350 = vmatpush3.bf16.msk.msra.mxu1 %vm4729_vm14, %v4646_v20  ;;  %v4754_v24 = vsub.s32 %v4714_v5, %v38_v23  ;;  %vm102_vm12 = vcmask 259072  }
  0x24   :  { %4351 = vmatprep.subr.bf16.mxu1 %v4640_v12 }
  0x25   :  { %v91_v25 = vadd.s32 4294967295, %v4754_v24  ;;  %vm105_vm4 = vcmp.ge.s32.totalorder %v4754_v24, 0  ;;  %vm106_vm5 = vcmp.lt.s32.totalorder %v4754_v24, 16  ;;  %v117_v26 = vadd.s32 1, %v4754_v24 }
  0x26   :  { %v130_v27 = vadd.s32 2, %v4754_v24  ;;  %vm4761_vm8 = vmand %vm105_vm4, %vm106_vm5  ;;  %v220_v49 = vand.u32 1, %v4754_v24 }
  0x27   :  { %vm92_vm6 = vcmp.ge.s32.totalorder %v91_v25, 0  ;;  %vm93_vm7 = vcmp.lt.s32.totalorder %v91_v25, 16  ;;  %vm118_vm10 = vcmp.ge.s32.totalorder %v117_v26, 0  ;;  %vm119_vm11 = vcmp.lt.s32.totalorder %v117_v26, 16 }
  0x28   :  { %vm4765_vm9 = vmand %vm92_vm6, %vm93_vm7  ;;  %vm4807_vm5 = vcmp.eq.s32.totalorder %v220_v49, 0  ;;  %vm65_vm6 = vcmp.ge.s32.totalorder %v4714_v5, %v64_v56  ;;  %vm68_vm7 = vcmp.lt.s32.totalorder %v4714_v5, %v67_v57  ;;  %v861_v56 = vld [vmem:[%s5390_s2 + $0x10] sm:$0xff]  ;;  %v682_v57 = vand.u32 3, %v4754_v24 }
  0x29   :  { %v5407_v29 = vsel %vm4765_vm9, 4294967295, %v5406_v29  ;;  %vm4773_vm3 = vmand %vm118_vm10, %vm119_vm11  ;;  %vm5397_vm11 = vcmask 1041408  }
  0x2a   :  { %vm69_vm10 = vmand %vm65_vm6, %vm68_vm7 }
  0x2b   :  { %v4822_v58 = vsel %vm69_vm10, 1.0, %v4637_v1 }
  0x8a   :  { %v86_v8 = vpop.permute.xlu0 %85 }
  0x8b   :  { %89 = vst.msk [vmem:[#allocation3] sm:$0x3f] %vm88_vm2, %v86_v8  ;;  %vm4742_vm2 = vmpackc.low %vm59_vm0, %vm58_vm13  ;;  %vm131_vm13 = vcmp.ge.s32.totalorder %v130_v27, 0  ;;  %vm132_vm0 = vcmp.lt.s32.totalorder %v130_v27, 16 }
  0x8c   :  { %4353 = vmatpush3.bf16.msk.msra.mxu1 %vm4742_vm2, %v4646_v20  ;;  %vm4779_vm4 = vmand %vm131_vm13, %vm132_vm0  ;;  %vm5395_vm0 = vcmask 293920  }
  0x8d   :  { %4039 = vmatprep.subr.mxu1 %v4637_v1 }
  0x92   :  { %v104_v15 = vld [vmem:[#allocation3] sm:$0x3f] }
  0x93   :  { %v90_v16 = vld [vmem:[#allocation3] sm:$0x3f]  ;;  %111 = vrot.lane.b32.xlu1 %v104_v15, %s4641_s0 }
  0x94   :  { %98 = vrot.lane.b32.xlu0 %v90_v16, %s4642_s1  ;;  %v116_v17 = vld [vmem:[#allocation3] sm:$0x3f] }
  0x95   :  { %v129_v18 = vld [vmem:[#allocation3] sm:$0x3f] }
  0x97   :  { %124 = vrot.lane.b32.xlu1 %v116_v17, %s4644_s7 }
  0x98   :  { %137 = vrot.lane.b32.xlu0 %v129_v18, %s4645_s8 }
  0x9b   :  { %381 = vperm.xlu1 %4543, %v376_v47  }
  0x9c   :  { %387 = vperm.xlu0 %4544, %v376_v47  }
  0xa0   :  { %4545 = vset.pattern.permute.xlu0 %v4639_v3 }
 0x105   :  { %v112_v30 = vpop.permute.xlu1 %111 }
 0x106   :  { %v99_v31 = vpop.permute.xlu0 %98  ;;  %v114_v32 = vsel %vm4761_vm8, %v112_v30, 0.0 }
 0x107   :  { %v101_v33 = vsel %vm4765_vm9, %v99_v31, 0.0  ;;  %115 = vst.msk [vmem:[#allocation2 + $0x8] sm:$0x3f] %vm102_vm12, %v114_v32  ;;  %v595_v31 = vld [vmem:[#allocation5 + $0x10] sm:$0xff] }
 0x108   :  { %103 = vst.msk [vmem:[#allocation2] sm:$0x3f] %vm102_vm12, %v101_v33  ;;  %v860_v32 = vld [vmem:[%s5390_s2 + $0x8] sm:$0xff]  ;;  %v555_v33 = vadd.s32 4294967294, %v4754_v24 }
 0x109   :  { %v125_v36 = vpop.permute.xlu1 %124 }
 0x10a   :  { %v138_v37 = vpop.permute.xlu0 %137  ;;  %v127_v38 = vsel %vm4773_vm3, %v125_v36, 0.0  ;;  %vm556_vm6 = vcmp.ge.s32.totalorder %v555_v33, 0  ;;  %vm557_vm7 = vcmp.lt.s32.totalorder %v555_v33, 16  ;;  %v582_v36 = vadd.s32 4, %v4754_v24 }
 0x10b   :  { %v140_v39 = vsel %vm4779_vm4, %v138_v37, 0.0  ;;  %128 = vst.msk [vmem:[#allocation2 + $0x10] sm:$0x3f] %vm102_vm12, %v127_v38  ;;  %vm4862_vm10 = vmand %vm556_vm6, %vm557_vm7 }
 0x10c   :  { %141 = vst.msk [vmem:[#allocation2 + $0x18] sm:$0x3f] %vm102_vm12, %v140_v39  ;;  %vm5396_vm12 = vcmask 15360  }
 0x10e   :  { %v144_v41 = vld [vmem:[#allocation2 + $0x8] sm:$0xff] }
 0x10f   :  { %v143_v40 = vld [vmem:[#allocation2] sm:$0xff] }
 0x110   :  { %v4343_v42 = vpack.c.bf16 %v144_v41, %v143_v40 }
 0x112   :  { %4344 = vmatpush3.bf16.msra.mxu0 %v4343_v42  ;;  %v145_v43 = vld [vmem:[#allocation2 + $0x10] sm:$0xff]  ;;  %v2901_v42 = vld [vmem:[%s5390_s2 + $0x48] sm:$0xff] }
 0x113   :  { %4345 = vmatprep.subr.bf16.mxu0 %v4640_v12  ;;  %v146_v44 = vld [vmem:[#allocation2 + $0x18] sm:$0xff] }
 0x114   :  { %v4346_v45 = vpack.c.bf16 %v146_v44, %v145_v43 }
 0x116   :  { %4347 = vmatpush3.bf16.msra.mxu0 %v4346_v45 }
 0x117   :  { %4354 = vmatprep.subr.bf16.mxu0 %v4640_v12 }
 0x119   :  { %4015 = vmatmul.mubr.msk.f32.vlgmr.msra.gmra.mrb[0].mxu0 %vm5398_vm1, %v142_v46 }
 0x11a   :  { %4356 = vmatpush3.bf16.msk.msra.mxu0 %vm4729_vm14, %v4646_v20  ;;  %4036 = vmatprep.mubr.msk.f32.mxu0 %vm5393_vm15, %v4637_v1  ;;  %v382_v5 = vpop.permute.xlu1 %381 }
 0x11b   :  { %4357 = vmatprep.subr.bf16.mxu0 %v4640_v12  ;;  %v388_v10 = vpop.permute.xlu0 %387 }
 0x11e   :  { %4359 = vmatpush3.bf16.msk.msra.mxu0 %vm4742_vm2, %v4646_v20 }
 0x1ec   :  { %v216_v51 = vpop.f32.mrb[0].mxu0 }
 0x1ed   :  { %v224_v52 = vsel %vm4807_vm5, %v216_v51, 0.0  ;;  %v4016_v53 = vpop.f32.mrb[1].mxu0 }
 0x1ee   :  { %v299_v54 = vmul.f32 %v224_v52, %v224_v52  ;;  %4026 = vmatmul.mubr.msk.f32.vlgmr.msra.gmra.mrb[0].mxu1 %vm5398_vm1, %v224_v52 }
 0x1ef   :  { %4041 = vmatprep.mubr.msk.f32.mxu1 %vm5393_vm15, %v4637_v1  ;;  %4040 = vmatpush3.msk.msra.mxu1 %vm5397_vm11, %v4822_v58 }
 0x1f0   :  { %4037 = vmatmul.mubr.msk.f32.vlgmr.msra.gmra.mrb[2].mxu0 %vm5398_vm1, %v299_v54  ;;  %4044 = vmatprep.subr.mxu1 %v4637_v1 }
 0x1f1   :  { %4057 = vmatprep.mubr.msk.f32.mxu0 %vm5398_vm1, %v595_v31 }
 0x2c1   :  { %v294_v59 = vpop.f32.mrb[0].mxu1 }
 0x2c2   :  { %v298_v60 = vmul.f32 0.125, %v294_v59  ;;  %v4027_v61 = vpop.f32.mrb[1].mxu1 }
 0x2c3   :  { %v369_v62 = vpop.f32.mrb[2].mxu0 }
 0x2c4   :  { %v374_v63 = vmul.f32 %v298_v60, %v298_v60  ;;  %v373_v0 = vmul.f32 0.125, %v369_v62  ;;  %v4038_v2 = vpop.f32.mrb[3].mxu0 }
 0x2c6   :  { %v375_v4 = vsub.f32 %v373_v0, %v374_v63 }
 0x2c8   :  { %v377_v6 = vadd.f32 1e-05, %v375_v4 }
 0x2ca   :  { %4560 = vrsqrt.f32 %v377_v6 }
 0x2d4   :  { %v4561_v8 = vpop.eup %4560 }
 0x2d5   :  { %v384_v9 = vmul.f32 %v4561_v8, %v382_v5 }
 0x2d7   :  { %4042 = vmatmul.mubr.msk.f32.vlgmr.msra.gmra.mrb[2].mxu1 %vm5396_vm12, %v384_v9  ;;  %v385_v11 = vmul.f32 %v384_v9, %v298_v60 }
 0x2d8   :  { %4045 = vmatpush3.msk.msra.mxu1 %vm5397_vm11, %v4822_v58  ;;  %4046 = vmatprep.mubr.msk.f32.mxu1 %vm5393_vm15, %v4637_v1  ;;  %vm584_vm15 = vcmp.lt.s32.totalorder %v582_v36, 16 }
 0x2d9   :  { %v390_v13 = vsub.f32 %v388_v10, %v385_v11  ;;  %4369 = vmatprep.subr.msk.bf16.mxu1 %vm4729_vm14, %v4646_v20 }
 0x2db   :  { %4047 = vmatmul.mubr.msk.f32.vlgmr.msra.gmra.mrb[4].mxu1 %vm5396_vm12, %v390_v13 }
 0x2dc   :  { %4371 = vmatpush3.bf16.msk.msra.mxu1 %vm4729_vm14, %v4646_v20 }
 0x2dd   :  { %4373 = vmatprep.subr.msk.bf16.mxu1 %vm4742_vm2, %v4646_v20 }
 0x2e0   :  { %4375 = vmatpush3.bf16.msk.msra.mxu1 %vm4742_vm2, %v4646_v20 }
 0x2e1   :  { %4082 = vmatprep.subr.msk.mxu1 %vm5397_vm11, %v4822_v58 }
 0x3aa   :  { %v465_v14 = vpop.f32.mrb[2].mxu1 }
 0x3ab   :  { %v4043_v15 = vpop.f32.mrb[3].mxu1  ;;  %v542_v16 = vmul.f32 %v465_v14, %v224_v52 }
 0x3ae   :  { %v538_v17 = vpop.f32.mrb[4].mxu1 }
 0x3af   :  { %v543_v18 = vadd.f32 %v542_v16, %v538_v17  ;;  %v4048_v22 = vpop.f32.mrb[5].mxu1 }
 0x3b1   :  { %v544_v23 = vsel %vm4807_vm5, %v543_v18, 0.0 }
 0x3b2   :  { %v546_v25 = vmul.f32 0.01, %v544_v23  ;;  %vm545_vm13 = vcmp.ge.f32.partialorder %v544_v23, 0.0 }
 0x3b4   :  { %v547_v26 = vsel %vm545_vm13, %v544_v23, %v546_v25  ;;  %vm583_vm13 = vcmp.ge.s32.totalorder %v582_v36, 0 }
 0x3b5   :  { %549 = vrot.lane.b32.xlu1 %v547_v26, %s4638_s6 }
 0x427   :  { %v550_v27 = vpop.permute.xlu1 %549 }
 0x428   :  { %553 = vst.msk [vmem:[#allocation3] sm:$0xff] %vm5395_vm0, %v550_v27  ;;  %vm4872_vm0 = vmand %vm583_vm13, %vm584_vm15  ;;  %vm4900_vm15 = vcmp.eq.s32.totalorder %v682_v57, 0  ;;  %vm5420_vm13 = vcmask 293920  }
 0x42f   :  { %v567_v30 = vld [vmem:[#allocation3] sm:$0xff] }
 0x430   :  { %569 = vrot.lane.b32.xlu0 %v567_v30, %s4641_s0  ;;  %562 = vrot.lane.b32.xlu1 %v567_v30, %s4648_s11 }
 0x434   :  { %589 = vrot.lane.b32.xlu0 %v567_v30, %s4649_s12  ;;  %576 = vrot.lane.b32.xlu1 %v567_v30, %s4645_s8 }
 0x438   :  { %868 = vperm.xlu1 %4543, %v860_v32   ;;  %873 = vperm.xlu0 %4545, %v861_v56  }
 0x43c   :  { %4546 = vset.pattern.permute.xlu1 %v4647_v48 }
 0x43d   :  { %881 = vperm.xlu1 %4546, %v860_v32  }
 0x441   :  { %885 = vperm.xlu1 %4546, %v861_v56  }
 0x445   :  { %4547 = vset.pattern.permute.xlu1 %v4639_v3 }
 0x4a2   :  { %v570_v38 = vpop.permute.xlu0 %569  ;;  %v563_v39 = vpop.permute.xlu1 %562 }
 0x4a3   :  { %v572_v40 = vsel %vm4761_vm8, %v570_v38, 0.0  ;;  %v565_v41 = vsel %vm4862_vm10, %v563_v39, 0.0 }
 0x4a4   :  { %573 = vst.msk [vmem:[#allocation2 + $0x8] sm:$0xff] %vm5398_vm1, %v572_v40  ;;  %566 = vst.msk [vmem:[#allocation2] sm:$0xff] %vm5398_vm1, %v565_v41 }
 0x4a6   :  { %v590_v43 = vpop.permute.xlu0 %589  ;;  %v577_v44 = vpop.permute.xlu1 %576 }
 0x4a7   :  { %v592_v45 = vsel %vm4872_vm0, %v590_v43, 0.0  ;;  %v579_v46 = vsel %vm4779_vm4, %v577_v44, 0.0 }
 0x4a8   :  { %593 = vst.msk [vmem:[#allocation2 + $0x18] sm:$0xff] %vm5398_vm1, %v592_v45  ;;  %580 = vst.msk [vmem:[#allocation2 + $0x10] sm:$0xff] %vm5398_vm1, %v579_v46 }
 0x4ab   :  { %v597_v47 = vld [vmem:[#allocation2] sm:$0xff]  ;;  %v598_v49 = vld [vmem:[#allocation2 + $0x8] sm:$0xff] }
 0x4ac   :  { %v4360_v51 = vpack.c.bf16 %v598_v49, %v597_v47 }
 0x4ae   :  { %4361 = vmatprep.subr.bf16.mxu0 %v4360_v51 }
 0x4af   :  { %4363 = vmatpush3.bf16.msra.mxu0 %v4360_v51  ;;  %v599_v52 = vld [vmem:[#allocation2 + $0x10] sm:$0xff]  ;;  %v600_v53 = vld [vmem:[#allocation2 + $0x18] sm:$0xff] }
 0x4b0   :  { %v4364_v54 = vpack.c.bf16 %v600_v53, %v599_v52 }
 0x4b2   :  { %4365 = vmatprep.subr.bf16.mxu0 %v4364_v54 }
 0x4b3   :  { %4367 = vmatpush3.bf16.msra.mxu0 %v4364_v54 }
 0x4b4   :  { %4377 = vmatprep.subr.msk.bf16.mxu0 %vm4729_vm14, %v4646_v20 }
 0x4b6   :  { %4058 = vmatmul.mubr.msk.f32.vlgmr.msra.gmra.mrb[4].mxu0 %vm5398_vm1, %v596_v55 }
 0x4b7   :  { %4379 = vmatpush3.bf16.msk.msra.mxu0 %vm4729_vm14, %v4646_v20  ;;  %v869_v23 = vpop.permute.xlu1 %868  ;;  %v874_v25 = vpop.permute.xlu0 %873 }
 0x4b8   :  { %4381 = vmatprep.subr.msk.bf16.mxu0 %vm4742_vm2, %v4646_v20 }
 0x4bb   :  { %4383 = vmatpush3.bf16.msk.msra.mxu0 %vm4742_vm2, %v4646_v20 }
 0x4bc   :  { %v882_v27 = vpop.permute.xlu1 %881 }
 0x4c0   :  { %v886_v39 = vpop.permute.xlu1 %885 }
 0x589   :  { %v4059_v60 = vpop.f32.mrb[4].mxu0 }
 0x58a   :  { %v687_v61 = vsel %vm4900_vm15, %v4059_v60, 0.0  ;;  %v673_v62 = vpop.f32.mrb[5].mxu0  ;;  %v1076_v60 = vadd.s32 4294967292, %v4754_v24 }
 0x58b   :  { %v686_v63 = vsel %vm4900_vm15, %v673_v62, 0.0  ;;  %v772_v2 = vmul.f32 %v687_v61, %v687_v61 }
 0x58c   :  { %v771_v0 = vmul.f32 %v686_v63, %v686_v63  ;;  %4068 = vmatprep.mubr.msk.f32.mxu1 %vm5398_vm1, %v686_v63 }
 0x58d   :  { %4069 = vmatmul.mubr.msk.f32.vlgmr.msra.gmra.mrb[6].mxu1 %vm5398_vm1, %v687_v61 }
 0x58e   :  { %4079 = vmatprep.mubr.msk.f32.mxu0 %vm5398_vm1, %v771_v0  ;;  %4083 = vmatpush3.msk.msra.mxu1 %vm5397_vm11, %v4822_v58 }
 0x58f   :  { %4080 = vmatmul.mubr.msk.f32.vlgmr.msra.gmra.mrb[6].mxu0 %vm5398_vm1, %v772_v2  ;;  %4087 = vmatprep.subr.msk.mxu1 %vm5397_vm11, %v4822_v58  ;;  %vm1078_vm1 = vcmp.lt.s32.totalorder %v1076_v60, 16 }
 0x660   :  { %v4070_v4 = vpop.f32.mrb[6].mxu1 }
 0x661   :  { %v770_v6 = vmul.f32 0.25, %v4070_v4  ;;  %v760_v5 = vpop.f32.mrb[7].mxu1 }
 0x662   :  { %v769_v8 = vmul.f32 0.25, %v760_v5  ;;  %v4081_v9 = vpop.f32.mrb[6].mxu0  ;;  %v1379_v5 = vld [vmem:[%s5390_s2 + $0x18] sm:$0xff] }
 0x663   :  { %v857_v10 = vmul.f32 %v770_v6, %v770_v6  ;;  %v855_v11 = vmul.f32 0.25, %v4081_v9  ;;  %v845_v13 = vpop.f32.mrb[7].mxu0 }
 0x664   :  { %v856_v14 = vmul.f32 %v769_v8, %v769_v8  ;;  %v854_v15 = vmul.f32 0.25, %v845_v13 }
 0x665   :  { %v859_v16 = vsub.f32 %v855_v11, %v857_v10 }
 0x666   :  { %v858_v17 = vsub.f32 %v854_v15, %v856_v14 }
 0x667   :  { %v863_v18 = vadd.f32 1e-05, %v859_v16 }
 0x668   :  { %v862_v22 = vadd.f32 1e-05, %v858_v17 }
 0x669   :  { %4562 = vrsqrt.f32 %v863_v18 }
 0x66a   :  { %4564 = vrsqrt.f32 %v862_v22 }
 0x673   :  { %v4563_v26 = vpop.eup %4562 }
 0x674   :  { %v4565_v30 = vpop.eup %4564  ;;  %v877_v31 = vmul.f32 %v4563_v26, %v874_v25 }
 0x675   :  { %v876_v32 = vmul.f32 %v4565_v30, %v869_v23 }
 0x676   :  { %v879_v33 = vmul.f32 %v877_v31, %v770_v6  ;;  %v1115_v6 = vld [vmem:[#allocation5 + $0x20] sm:$0xff] }
 0x677   :  { %v878_v36 = vmul.f32 %v876_v32, %v769_v8  ;;  %4084 = vmatprep.mubr.msk.f32.mxu1 %vm5396_vm12, %v876_v32  ;;  %v1116_v32 = vld [vmem:[#allocation5 + $0x28] sm:$0xff] }
 0x678   :  { %4085 = vmatmul.mubr.msk.f32.vlgmr.msra.gmra.mrb[8].mxu1 %vm5396_vm12, %v877_v31  ;;  %v889_v40 = vsub.f32 %v886_v39, %v879_v33  ;;  %v1380_v33 = vld [vmem:[%s5390_s2 + $0x20] sm:$0xff] }
 0x679   :  { %v888_v38 = vsub.f32 %v882_v27, %v878_v36  ;;  %4088 = vmatpush3.msk.msra.mxu1 %vm5397_vm11, %v4822_v58  ;;  %vm1077_vm11 = vcmp.ge.s32.totalorder %v1076_v60, 0 }
 0x67a   :  { %4397 = vmatprep.subr.msk.bf16.mxu1 %vm4729_vm14, %v4646_v20  ;;  %vm4946_vm9 = vmand %vm1077_vm11, %vm1078_vm1  ;;  %vm1123_vm1 = vcmask 392192  }
 0x67b   :  { %4089 = vmatprep.mubr.msk.f32.mxu1 %vm5396_vm12, %v888_v38  ;;  %4104 = vmatprep.mubr.msk.f32.mxu0 %vm1123_vm1, %v1115_v6 }
 0x67c   :  { %4090 = vmatmul.mubr.msk.f32.vlgmr.msra.gmra.mrb[10].mxu1 %vm5396_vm12, %v889_v40  ;;  %vm5421_vm12 = vmmov %vm5420_vm13 }
 0x67d   :  { %4399 = vmatpush3.bf16.msk.msra.mxu1 %vm4729_vm14, %v4646_v20 }
 0x67e   :  { %4401 = vmatprep.subr.msk.bf16.mxu1 %vm4742_vm2, %v4646_v20 }
 0x681   :  { %4403 = vmatpush3.bf16.msk.msra.mxu1 %vm4742_vm2, %v4646_v20 }
 0x682   :  { %4405 = vmatprep.subr.msk.bf16.mxu1 %vm4729_vm14, %v4646_v20 }
 0x74b   :  { %v4086_v41 = vpop.f32.mrb[8].mxu1 }
 0x74c   :  { %v962_v43 = vpop.f32.mrb[9].mxu1  ;;  %v1053_v44 = vmul.f32 %v4086_v41, %v687_v61 }
 0x74d   :  { %v1052_v45 = vmul.f32 %v962_v43, %v686_v63 }
 0x74f   :  { %v4091_v46 = vpop.f32.mrb[10].mxu1 }
 0x750   :  { %v1055_v47 = vadd.f32 %v4091_v46, %v1053_v44  ;;  %v1043_v49 = vpop.f32.mrb[11].mxu1 }
 0x751   :  { %v1054_v51 = vadd.f32 %v1052_v45, %v1043_v49 }
 0x752   :  { %v1057_v52 = vsel %vm4900_vm15, %v1055_v47, 0.0 }
 0x753   :  { %v1061_v53 = vmul.f32 0.01, %v1057_v52  ;;  %v1056_v54 = vsel %vm4900_vm15, %v1054_v51, 0.0  ;;  %vm1059_vm6 = vcmp.ge.f32.partialorder %v1057_v52, 0.0 }
 0x754   :  { %v1060_v55 = vmul.f32 0.01, %v1056_v54  ;;  %vm1058_vm7 = vcmp.ge.f32.partialorder %v1056_v54, 0.0 }
 0x755   :  { %v1063_v56 = vsel %vm1059_vm6, %v1057_v52, %v1061_v53  ;;  %vm5424_vm6 = vcmask 261120  }
 0x756   :  { %1068 = vrot.lane.b32.xlu1 %v1063_v56, %s4638_s6  ;;  %v1062_v57 = vsel %vm1058_vm7, %v1056_v54, %v1060_v55  ;;  %vm5426_vm11 = vmmov %vm5424_vm6 }
 0x757   :  { %1066 = vrot.lane.b32.xlu0 %v1062_v57, %s4638_s6  ;;  %vm5427_vm7 = vmmov %vm5424_vm6 }
 0x7c8   :  { %v1069_v61 = vpop.permute.xlu1 %1068 }
 0x7c9   :  { %1073 = vst.msk [vmem:[#allocation3 + $0x8] sm:$0xff] %vm5420_vm13, %v1069_v61  ;;  %v1067_v62 = vpop.permute.xlu0 %1066  ;;  %vm5428_vm13 = vmmov %vm5424_vm6 }
 0x7ca   :  { %1072 = vst.msk [vmem:[#allocation3] sm:$0xff] %vm5421_vm12, %v1067_v62  ;;  %vm5425_vm12 = vmmov %vm5424_vm6 }
 0x7d0   :  { %v1075_v0 = vld [vmem:[#allocation3 + $0x8] sm:$0xff] }
 0x7d1   :  { %v1083_v2 = vsel %vm4946_vm9, %v1075_v0, 0.0  ;;  %1092 = vrot.lane.b32.xlu1 %v1075_v0, %s4641_s0  ;;  %v1086_v4 = vld [vmem:[#allocation3] sm:$0xff] }
 0x7d2   :  { %1085 = vst.msk [vmem:[#allocation2 + $0x8] sm:$0xff] %vm5424_vm6, %v1083_v2  ;;  %1090 = vrot.lane.b32.xlu0 %v1086_v4, %s4641_s0  ;;  %v1082_v24 = vsel %vm4946_vm9, %v1086_v4, 0.0 }
 0x7d3   :  { %1084 = vst.msk [vmem:[#allocation2] sm:$0xff] %vm5425_vm12, %v1082_v24  ;;  %vm5429_vm12 = vcmask 1041408  }
 0x7d5   :  { %1106 = vrot.lane.b32.xlu1 %v1075_v0, %s4649_s12 }
 0x7d6   :  { %1104 = vrot.lane.b32.xlu0 %v1086_v4, %s4649_s12 }
 0x7d9   :  { %v1118_v8 = vld [vmem:[#allocation2 + $0x8] sm:$0xff]  ;;  %1392 = vperm.xlu1 %4547, %v1380_v33  }
 0x7da   :  { %1387 = vperm.xlu0 %4545, %v1379_v5   ;;  %v1117_v9 = vld [vmem:[#allocation2] sm:$0xff] }
 0x7db   :  { %v4384_v10 = vpack.c.bf16 %v1118_v8, %v1117_v9 }
 0x7dd   :  { %4385 = vmatprep.subr.bf16.mxu0 %v4384_v10  ;;  %4549 = vset.pattern.permute.xlu1 %v4647_v48 }
 0x7de   :  { %4387 = vmatpush3.bf16.msra.mxu0 %v4384_v10  ;;  %4548 = vset.pattern.permute.xlu0 %v4647_v48 }
 0x7df   :  { %1400 = vperm.xlu0 %4548, %v1379_v5   ;;  %1404 = vperm.xlu1 %4549, %v1380_v33  }
 0x7e3   :  { %4551 = vset.pattern.permute.xlu0 %v4639_v3  ;;  %4550 = vset.pattern.permute.xlu1 %v4639_v3 }
 0x843   :  { %v1093_v11 = vpop.permute.xlu1 %1092 }
 0x844   :  { %v1097_v13 = vsel %vm4761_vm8, %v1093_v11, 0.0  ;;  %v1091_v14 = vpop.permute.xlu0 %1090 }
 0x845   :  { %1099 = vst.msk [vmem:[#allocation2 + $0x18] sm:$0xff] %vm5426_vm11, %v1097_v13  ;;  %v1096_v15 = vsel %vm4761_vm8, %v1091_v14, 0.0  ;;  %vm5430_vm11 = vmmov %vm5429_vm12 }
 0x846   :  { %1098 = vst.msk [vmem:[#allocation2 + $0x10] sm:$0xff] %vm5427_vm7, %v1096_v15  ;;  %vm5431_vm7 = vmmov %vm5424_vm6 }
 0x847   :  { %v1107_v16 = vpop.permute.xlu1 %1106 }
 0x848   :  { %v1111_v17 = vsel %vm4872_vm0, %v1107_v16, 0.0  ;;  %v1105_v18 = vpop.permute.xlu0 %1104 }
 0x849   :  { %1113 = vst.msk [vmem:[#allocation2 + $0x28] sm:$0xff] %vm5428_vm13, %v1111_v17  ;;  %v1110_v22 = vsel %vm4872_vm0, %v1105_v18, 0.0  ;;  %vm5432_vm13 = vmmov %vm5424_vm6 }
 0x84a   :  { %1112 = vst.msk [vmem:[#allocation2 + $0x20] sm:$0xff] %vm5424_vm6, %v1110_v22 }
 0x84c   :  { %v1120_v23 = vld [vmem:[#allocation2 + $0x18] sm:$0xff] }
 0x84d   :  { %v1119_v25 = vld [vmem:[#allocation2 + $0x10] sm:$0xff] }
 0x84e   :  { %v4388_v26 = vpack.c.bf16 %v1120_v23, %v1119_v25 }
 0x850   :  { %4389 = vmatprep.subr.bf16.mxu0 %v4388_v26  ;;  %v1122_v27 = vld [vmem:[#allocation2 + $0x28] sm:$0xff] }
 0x851   :  { %4391 = vmatpush3.bf16.msra.mxu0 %v4388_v26  ;;  %v1121_v30 = vld [vmem:[#allocation2 + $0x20] sm:$0xff] }
 0x852   :  { %v4392_v31 = vpack.c.bf16 %v1122_v27, %v1121_v30 }
 0x854   :  { %4393 = vmatprep.subr.bf16.mxu0 %v4392_v31 }
 0x855   :  { %4395 = vmatpush3.bf16.msra.mxu0 %v4392_v31 }
 0x856   :  { %4134 = vmatprep.subr.msk.mxu0 %vm5429_vm12, %v4822_v58  ;;  %vm5433_vm12 = vmmov %vm5430_vm11 }
 0x858   :  { %4105 = vmatmul.mubr.msk.f32.vlgmr.msra.gmra.mrb[8].mxu0 %vm1123_vm1, %v1116_v32  ;;  %v1393_v62 = vpop.permute.xlu1 %1392 }
 0x859   :  { %4135 = vmatpush3.msk.msra.mxu0 %vm5430_vm11, %v4822_v58  ;;  %vm5434_vm11 = vmmov %vm5424_vm6  ;;  %v1388_v0 = vpop.permute.xlu0 %1387 }
 0x85a   :  { %4425 = vmatprep.subr.msk.bf16.mxu0 %vm4729_vm14, %v4646_v20 }
 0x85e   :  { %v1401_v8 = vpop.permute.xlu0 %1400  ;;  %v1405_v9 = vpop.permute.xlu1 %1404 }
 0x92b   :  { %v4106_v36 = vpop.f32.mrb[8].mxu0 }
 0x92c   :  { %v1196_v38 = vpop.f32.mrb[9].mxu0  ;;  %v1206_v40 = vsel %vm4900_vm15, %v4106_v36, 0.0 }
 0x92d   :  { %v1205_v39 = vsel %vm4900_vm15, %v1196_v38, 0.0  ;;  %v1291_v43 = vmul.f32 %v1206_v40, %v1206_v40 }
 0x92e   :  { %v1290_v41 = vmul.f32 %v1205_v39, %v1205_v39  ;;  %4115 = vmatprep.mubr.msk.f32.mxu1 %vm5431_vm7, %v1205_v39  ;;  %vm5435_vm7 = vmmov %vm5433_vm12 }
 0x92f   :  { %4116 = vmatmul.mubr.msk.f32.vlgmr.msra.gmra.mrb[12].mxu1 %vm5432_vm13, %v1206_v40  ;;  %vm5436_vm13 = vcmask 15360  }
 0x930   :  { %4407 = vmatpush3.bf16.msk.msra.mxu1 %vm4729_vm14, %v4646_v20  ;;  %4126 = vmatprep.mubr.msk.f32.mxu1 %vm5424_vm6, %v1290_v41  ;;  %vm5437_vm6 = vmmov %vm5436_vm13  ;;  %v1624_v41 = vld [vmem:[#allocation5 + $0x30] sm:$0xff] }
 0x931   :  { %4409 = vmatprep.subr.msk.bf16.mxu1 %vm4742_vm2, %v4646_v20 }
 0x934   :  { %4411 = vmatpush3.bf16.msk.msra.mxu1 %vm4742_vm2, %v4646_v20 }
 0x935   :  { %4129 = vmatprep.subr.msk.mxu1 %vm5433_vm12, %v4822_v58  ;;  %vm5438_vm12 = vmmov %vm5437_vm6 }
 0x937   :  { %4127 = vmatmul.mubr.msk.f32.vlgmr.msra.gmra.mrb[14].mxu1 %vm5434_vm11, %v1291_v43  ;;  %vm5439_vm11 = vmmov %vm5437_vm6 }
 0x938   :  { %4130 = vmatpush3.msk.msra.mxu1 %vm5435_vm7, %v4822_v58  ;;  %vm5440_vm7 = vcmask 293920  }
 0xa02   :  { %v4117_v44 = vpop.f32.mrb[12].mxu1 }
 0xa03   :  { %v1279_v45 = vpop.f32.mrb[13].mxu1  ;;  %v1289_v46 = vmul.f32 0.25, %v4117_v44 }
 0xa04   :  { %v1288_v47 = vmul.f32 0.25, %v1279_v45 }
 0xa05   :  { %v1376_v51 = vmul.f32 %v1289_v46, %v1289_v46 }
 0xa06   :  { %v1375_v54 = vmul.f32 %v1288_v47, %v1288_v47 }
 0xa0a   :  { %v4128_v49 = vpop.f32.mrb[14].mxu1 }
 0xa0b   :  { %v1374_v52 = vmul.f32 0.25, %v4128_v49  ;;  %v1364_v53 = vpop.f32.mrb[15].mxu1 }
 0xa0c   :  { %v1373_v55 = vmul.f32 0.25, %v1364_v53 }
 0xa0d   :  { %v1378_v56 = vsub.f32 %v1374_v52, %v1376_v51 }
 0xa0e   :  { %v1377_v57 = vsub.f32 %v1373_v55, %v1375_v54 }
 0xa0f   :  { %v1382_v60 = vadd.f32 1e-05, %v1378_v56 }
 0xa10   :  { %v1381_v61 = vadd.f32 1e-05, %v1377_v57 }
 0xa11   :  { %4566 = vrsqrt.f32 %v1382_v60 }
 0xa12   :  { %4568 = vrsqrt.f32 %v1381_v61 }
 0xa1b   :  { %v4567_v2 = vpop.eup %4566 }
 0xa1c   :  { %v4569_v4 = vpop.eup %4568  ;;  %v1396_v24 = vmul.f32 %v4567_v2, %v1393_v62  ;;  %v1625_v2 = vld [vmem:[#allocation5 + $0x38] sm:$0xff] }
 0xa1d   :  { %v1395_v6 = vmul.f32 %v4569_v4, %v1388_v0  ;;  %v1887_v4 = vld [vmem:[%s5390_s2 + $0x28] sm:$0xff] }
 0xa1e   :  { %v1398_v5 = vmul.f32 %v1396_v24, %v1289_v46 }
 0xa1f   :  { %4131 = vmatprep.mubr.msk.f32.mxu1 %vm5436_vm13, %v1395_v6  ;;  %v1397_v10 = vmul.f32 %v1395_v6, %v1288_v47  ;;  %vm5441_vm13 = vmmov %vm5440_vm7 }
 0xa20   :  { %4132 = vmatmul.mubr.msk.f32.vlgmr.msra.gmra.mrb[16].mxu1 %vm5437_vm6, %v1396_v24  ;;  %v1408_v13 = vsub.f32 %v1405_v9, %v1398_v5  ;;  %vm5442_vm6 = vcmask 261120   ;;  %v1888_v24 = vld [vmem:[%s5390_s2 + $0x30] sm:$0xff] }
 0xa21   :  { %v1407_v11 = vsub.f32 %v1401_v8, %v1397_v10  ;;  %4151 = vmatprep.mubr.msk.f32.mxu1 %vm1123_vm1, %v1624_v41 }
 0xa23   :  { %4136 = vmatprep.mubr.msk.f32.mxu0 %vm5438_vm12, %v1407_v11  ;;  %vm5443_vm12 = vmmov %vm5442_vm6 }
 0xa24   :  { %4137 = vmatmul.mubr.msk.f32.vlgmr.msra.gmra.mrb[10].mxu0 %vm5439_vm11, %v1408_v13  ;;  %vm5444_vm11 = vmmov %vm5442_vm6 }
 0xa25   :  { %4427 = vmatpush3.bf16.msk.msra.mxu0 %vm4729_vm14, %v4646_v20 }
 0xa26   :  { %4429 = vmatprep.subr.msk.bf16.mxu0 %vm4742_vm2, %v4646_v20 }
 0xa29   :  { %4431 = vmatpush3.bf16.msk.msra.mxu0 %vm4742_vm2, %v4646_v20 }
 0xa2a   :  { %4433 = vmatprep.subr.msk.bf16.mxu0 %vm4729_vm14, %v4646_v20 }
 0xaf3   :  { %v4133_v14 = vpop.f32.mrb[16].mxu1 }
 0xaf4   :  { %v1481_v15 = vpop.f32.mrb[17].mxu1  ;;  %v1572_v16 = vmul.f32 %v4133_v14, %v1206_v40 }
 0xaf5   :  { %v1571_v17 = vmul.f32 %v1481_v15, %v1205_v39 }
 0xaf7   :  { %v4138_v18 = vpop.f32.mrb[10].mxu0 }
 0xaf8   :  { %v1574_v22 = vadd.f32 %v4138_v18, %v1572_v16  ;;  %v1562_v23 = vpop.f32.mrb[11].mxu0 }
 0xaf9   :  { %v1573_v25 = vadd.f32 %v1571_v17, %v1562_v23 }
 0xafa   :  { %v1576_v26 = vsel %vm4900_vm15, %v1574_v22, 0.0 }
 0xafb   :  { %v1578_v27 = vmax.f32 %v1576_v26, 0.0  ;;  %v1575_v30 = vsel %vm4900_vm15, %v1573_v25, 0.0 }
 0xafc   :  { %v1577_v31 = vmax.f32 %v1575_v30, 0.0 }
 0xafd   :  { %1583 = vrot.lane.b32.xlu0 %v1578_v27, %s4638_s6 }
 0xafe   :  { %1581 = vrot.lane.b32.xlu1 %v1577_v31, %s4638_s6 }
 0xb6f   :  { %v1584_v32 = vpop.permute.xlu0 %1583 }
 0xb70   :  { %1588 = vst.msk [vmem:[#allocation3 + $0x8] sm:$0xff] %vm5440_vm7, %v1584_v32  ;;  %v1582_v33 = vpop.permute.xlu1 %1581  ;;  %vm5445_vm7 = vmmov %vm5442_vm6 }
 0xb71   :  { %1587 = vst.msk [vmem:[#allocation3] sm:$0xff] %vm5441_vm13, %v1582_v33  ;;  %vm5446_vm13 = vmmov %vm5442_vm6 }
 0xb77   :  { %v1590_v36 = vld [vmem:[#allocation3 + $0x8] sm:$0xff] }
 0xb78   :  { %v1589_v38 = vld [vmem:[#allocation3] sm:$0xff]  ;;  %1601 = vrot.lane.b32.xlu0 %v1590_v36, %s4641_s0  ;;  %v1592_v39 = vsel %vm4946_vm9, %v1590_v36, 0.0 }
 0xb79   :  { %1599 = vrot.lane.b32.xlu1 %v1589_v38, %s4641_s0  ;;  %v1591_v40 = vsel %vm4946_vm9, %v1589_v38, 0.0  ;;  %1594 = vst.msk [vmem:[#allocation2 + $0x8] sm:$0xff] %vm5442_vm6, %v1592_v39 }
 0xb7a   :  { %1593 = vst.msk [vmem:[#allocation2] sm:$0xff] %vm5443_vm12, %v1591_v40  ;;  %vm5447_vm12 = vcmask 1041408  }
 0xb7c   :  { %1615 = vrot.lane.b32.xlu0 %v1590_v36, %s4649_s12 }
 0xb7d   :  { %1613 = vrot.lane.b32.xlu1 %v1589_v38, %s4649_s12 }
 0xb80   :  { %v1627_v43 = vld [vmem:[#allocation2 + $0x8] sm:$0xff]  ;;  %1900 = vperm.xlu0 %4551, %v1888_v24  }
 0xb81   :  { %v1626_v44 = vld [vmem:[#allocation2] sm:$0xff]  ;;  %1895 = vperm.xlu1 %4550, %v1887_v4  }
 0xb82   :  { %v4412_v45 = vpack.c.bf16 %v1627_v43, %v1626_v44 }
 0xb84   :  { %4413 = vmatprep.subr.bf16.mxu1 %v4412_v45 }
 0xb85   :  { %4415 = vmatpush3.bf16.msra.mxu1 %v4412_v45  ;;  %4552 = vset.pattern.permute.xlu1 %v4647_v48 }
 0xb86   :  { %1908 = vperm.xlu1 %4552, %v1887_v4  }
 0xb8a   :  { %1912 = vperm.xlu1 %4552, %v1888_v24  }
 0xb8e   :  { %4553 = vset.pattern.permute.xlu1 %v4639_v3 }
 0xbea   :  { %v1602_v46 = vpop.permute.xlu0 %1601 }
 0xbeb   :  { %v1606_v47 = vsel %vm4761_vm8, %v1602_v46, 0.0  ;;  %v1600_v49 = vpop.permute.xlu1 %1599 }
 0xbec   :  { %1608 = vst.msk [vmem:[#allocation2 + $0x18] sm:$0xff] %vm5444_vm11, %v1606_v47  ;;  %v1605_v51 = vsel %vm4761_vm8, %v1600_v49, 0.0  ;;  %vm5448_vm11 = vmmov %vm5447_vm12 }
 0xbed   :  { %1607 = vst.msk [vmem:[#allocation2 + $0x10] sm:$0xff] %vm5445_vm7, %v1605_v51  ;;  %vm5449_vm7 = vmmov %vm5448_vm11 }
 0xbee   :  { %v1616_v52 = vpop.permute.xlu0 %1615 }
 0xbef   :  { %v1620_v53 = vsel %vm4872_vm0, %v1616_v52, 0.0  ;;  %v1614_v54 = vpop.permute.xlu1 %1613 }
 0xbf0   :  { %1622 = vst.msk [vmem:[#allocation2 + $0x28] sm:$0xff] %vm5446_vm13, %v1620_v53  ;;  %v1619_v55 = vsel %vm4872_vm0, %v1614_v54, 0.0  ;;  %vm5450_vm13 = vmmov %vm5442_vm6 }
 0xbf1   :  { %1621 = vst.msk [vmem:[#allocation2 + $0x20] sm:$0xff] %vm5442_vm6, %v1619_v55 }
 0xbf3   :  { %v1629_v56 = vld [vmem:[#allocation2 + $0x18] sm:$0xff] }
 0xbf4   :  { %v1628_v57 = vld [vmem:[#allocation2 + $0x10] sm:$0xff] }
 0xbf5   :  { %v4416_v60 = vpack.c.bf16 %v1629_v56, %v1628_v57 }
 0xbf7   :  { %4417 = vmatprep.subr.bf16.mxu1 %v4416_v60  ;;  %v1631_v61 = vld [vmem:[#allocation2 + $0x28] sm:$0xff] }
 0xbf8   :  { %4419 = vmatpush3.bf16.msra.mxu1 %v4416_v60  ;;  %v1630_v62 = vld [vmem:[#allocation2 + $0x20] sm:$0xff] }
 0xbf9   :  { %v4420_v0 = vpack.c.bf16 %v1631_v61, %v1630_v62 }
 0xbfb   :  { %4421 = vmatprep.subr.bf16.mxu1 %v4420_v0 }
 0xbfc   :  { %4423 = vmatpush3.bf16.msra.mxu1 %v4420_v0 }
 0xbfd   :  { %4176 = vmatprep.subr.msk.mxu1 %vm5447_vm12, %v4822_v58  ;;  %vm5451_vm12 = vmmov %vm5442_vm6 }
 0xbff   :  { %4152 = vmatmul.mubr.msk.f32.vlgmr.msra.gmra.mrb[18].mxu1 %vm1123_vm1, %v1625_v2  ;;  %v1901_v36 = vpop.permute.xlu0 %1900 }
 0xc00   :  { %4177 = vmatpush3.msk.msra.mxu1 %vm5448_vm11, %v4822_v58  ;;  %vm5452_vm11 = vmmov %vm5442_vm6  ;;  %v1896_v33 = vpop.permute.xlu1 %1895 }
 0xc01   :  { %4181 = vmatprep.subr.msk.mxu1 %vm5449_vm7, %v4822_v58  ;;  %vm5453_vm7 = vcmask 15360  }
 0xc05   :  { %v1909_v39 = vpop.permute.xlu1 %1908 }
 0xc09   :  { %v1913_v47 = vpop.permute.xlu1 %1912 }
 0xcd2   :  { %v4153_v6 = vpop.f32.mrb[18].mxu1 }
 0xcd3   :  { %v1704_v5 = vpop.f32.mrb[19].mxu1  ;;  %v1714_v9 = vsel %vm4900_vm15, %v4153_v6, 0.0 }
 0xcd4   :  { %v1713_v8 = vsel %vm4900_vm15, %v1704_v5, 0.0  ;;  %v1799_v11 = vmul.f32 %v1714_v9, %v1714_v9 }
 0xcd5   :  { %v1798_v10 = vmul.f32 %v1713_v8, %v1713_v8  ;;  %4162 = vmatprep.mubr.msk.f32.mxu0 %vm5450_vm13, %v1713_v8  ;;  %vm5454_vm13 = vmmov %vm5453_vm7 }
 0xcd6   :  { %4163 = vmatmul.mubr.msk.f32.vlgmr.msra.gmra.mrb[12].mxu0 %vm5442_vm6, %v1714_v9  ;;  %vm5455_vm6 = vcmask 1041408  }
 0xcd7   :  { %4435 = vmatpush3.bf16.msk.msra.mxu0 %vm4729_vm14, %v4646_v20  ;;  %4173 = vmatprep.mubr.msk.f32.mxu0 %vm5451_vm12, %v1798_v10  ;;  %vm5456_vm12 = vmmov %vm5453_vm7 }
 0xcd8   :  { %4437 = vmatprep.subr.msk.bf16.mxu0 %vm4742_vm2, %v4646_v20 }
 0xcdb   :  { %4439 = vmatpush3.bf16.msk.msra.mxu0 %vm4742_vm2, %v4646_v20 }
 0xcde   :  { %4174 = vmatmul.mubr.msk.f32.vlgmr.msra.gmra.mrb[14].mxu0 %vm5452_vm11, %v1799_v11  ;;  %vm5457_vm11 = vmmov %vm5453_vm7 }
 0xda9   :  { %v4164_v13 = vpop.f32.mrb[12].mxu0 }
 0xdaa   :  { %v1787_v14 = vpop.f32.mrb[13].mxu0  ;;  %v1797_v15 = vmul.f32 0.25, %v4164_v13 }
 0xdab   :  { %v1796_v16 = vmul.f32 0.25, %v1787_v14 }
 0xdac   :  { %v1884_v18 = vmul.f32 %v1797_v15, %v1797_v15 }
 0xdad   :  { %v1883_v25 = vmul.f32 %v1796_v16, %v1796_v16 }
 0xdb1   :  { %v4175_v17 = vpop.f32.mrb[14].mxu0 }
 0xdb2   :  { %v1882_v22 = vmul.f32 0.25, %v4175_v17  ;;  %v1872_v23 = vpop.f32.mrb[15].mxu0 }
 0xdb3   :  { %v1881_v26 = vmul.f32 0.25, %v1872_v23 }
 0xdb4   :  { %v1886_v27 = vsub.f32 %v1882_v22, %v1884_v18 }
 0xdb5   :  { %v1885_v30 = vsub.f32 %v1881_v26, %v1883_v25 }
 0xdb6   :  { %v1890_v31 = vadd.f32 1e-05, %v1886_v27 }
 0xdb7   :  { %v1889_v32 = vadd.f32 1e-05, %v1885_v30 }
 0xdb8   :  { %4570 = vrsqrt.f32 %v1890_v31 }
 0xdb9   :  { %4572 = vrsqrt.f32 %v1889_v32 }
 0xdc2   :  { %v4571_v38 = vpop.eup %4570 }
 0xdc3   :  { %v4573_v40 = vpop.eup %4572  ;;  %v1904_v41 = vmul.f32 %v4571_v38, %v1901_v36  ;;  %v2131_v36 = vld [vmem:[#allocation5 + $0x48] sm:$0xff] }
 0xdc4   :  { %v1903_v43 = vmul.f32 %v4573_v40, %v1896_v33  ;;  %v2394_v38 = vld [vmem:[%s5390_s2 + $0x40] sm:$0xff] }
 0xdc5   :  { %v1906_v44 = vmul.f32 %v1904_v41, %v1797_v15 }
 0xdc6   :  { %v1905_v45 = vmul.f32 %v1903_v43, %v1796_v16  ;;  %4178 = vmatprep.mubr.msk.f32.mxu1 %vm5453_vm7, %v1903_v43  ;;  %vm5458_vm7 = vcmask 293920  }
 0xdc7   :  { %4179 = vmatmul.mubr.msk.f32.vlgmr.msra.gmra.mrb[20].mxu1 %vm5454_vm13, %v1904_v41  ;;  %v1916_v49 = vsub.f32 %v1913_v47, %v1906_v44  ;;  %vm5459_vm13 = vmmov %vm5458_vm7 }
 0xdc8   :  { %v1915_v46 = vsub.f32 %v1909_v39, %v1905_v45  ;;  %4182 = vmatpush3.msk.msra.mxu1 %vm5455_vm6, %v4822_v58  ;;  %vm5460_vm6 = vcmask 261120  }
 0xdc9   :  { %4453 = vmatprep.subr.msk.bf16.mxu1 %vm4729_vm14, %v4646_v20 }
 0xdca   :  { %4183 = vmatprep.mubr.msk.f32.mxu1 %vm5456_vm12, %v1915_v46  ;;  %vm5461_vm12 = vmmov %vm5460_vm6 }
 0xdcb   :  { %4184 = vmatmul.mubr.msk.f32.vlgmr.msra.gmra.mrb[22].mxu1 %vm5457_vm11, %v1916_v49  ;;  %vm5462_vm11 = vmmov %vm5460_vm6 }
 0xdcc   :  { %4455 = vmatpush3.bf16.msk.msra.mxu1 %vm4729_vm14, %v4646_v20 }
 0xdcd   :  { %4457 = vmatprep.subr.msk.bf16.mxu1 %vm4742_vm2, %v4646_v20 }
 0xdd0   :  { %4459 = vmatpush3.bf16.msk.msra.mxu1 %vm4742_vm2, %v4646_v20 }
 0xdd1   :  { %4461 = vmatprep.subr.msk.bf16.mxu1 %vm4729_vm14, %v4646_v20 }
 0xe9a   :  { %v4180_v51 = vpop.f32.mrb[20].mxu1 }
 0xe9b   :  { %v1989_v52 = vpop.f32.mrb[21].mxu1  ;;  %v2080_v53 = vmul.f32 %v4180_v51, %v1714_v9  ;;  %v2393_v9 = vld [vmem:[%s5390_s2 + $0x38] sm:$0xff] }
 0xe9c   :  { %v2079_v54 = vmul.f32 %v1989_v52, %v1713_v8  ;;  %v2130_v8 = vld [vmem:[#allocation5 + $0x40] sm:$0xff] }
 0xe9d   :  { %4198 = vmatprep.mubr.msk.f32.mxu0 %vm1123_vm1, %v2130_v8 }
 0xe9e   :  { %v4185_v55 = vpop.f32.mrb[22].mxu1 }
 0xe9f   :  { %v2082_v56 = vadd.f32 %v4185_v55, %v2080_v53  ;;  %v2070_v57 = vpop.f32.mrb[23].mxu1 }
 0xea0   :  { %v2081_v60 = vadd.f32 %v2079_v54, %v2070_v57 }
 0xea1   :  { %v2084_v61 = vsel %vm4900_vm15, %v2082_v56, 0.0 }
 0xea2   :  { %2089 = vrot.lane.b32.xlu1 %v2084_v61, %s4638_s6  ;;  %v2083_v62 = vsel %vm4900_vm15, %v2081_v60, 0.0 }
 0xea3   :  { %2087 = vrot.lane.b32.xlu0 %v2083_v62, %s4638_s6 }
 0xf14   :  { %v2090_v0 = vpop.permute.xlu1 %2089 }
 0xf15   :  { %2094 = vst.msk [vmem:[#allocation3 + $0x8] sm:$0xff] %vm5458_vm7, %v2090_v0  ;;  %v2088_v2 = vpop.permute.xlu0 %2087  ;;  %vm5463_vm7 = vmmov %vm5460_vm6 }
 0xf16   :  { %2093 = vst.msk [vmem:[#allocation3] sm:$0xff] %vm5459_vm13, %v2088_v2  ;;  %vm5464_vm13 = vmmov %vm5460_vm6 }
 0xf1c   :  { %v2096_v4 = vld [vmem:[#allocation3 + $0x8] sm:$0xff] }
 0xf1d   :  { %v2095_v24 = vld [vmem:[#allocation3] sm:$0xff]  ;;  %2107 = vrot.lane.b32.xlu1 %v2096_v4, %s4641_s0  ;;  %v2098_v6 = vsel %vm4946_vm9, %v2096_v4, 0.0 }
 0xf1e   :  { %2105 = vrot.lane.b32.xlu0 %v2095_v24, %s4641_s0  ;;  %v2097_v5 = vsel %vm4946_vm9, %v2095_v24, 0.0  ;;  %2100 = vst.msk [vmem:[#allocation2 + $0x8] sm:$0xff] %vm5460_vm6, %v2098_v6 }
 0xf1f   :  { %2099 = vst.msk [vmem:[#allocation2] sm:$0xff] %vm5461_vm12, %v2097_v5  ;;  %vm5465_vm12 = vcmask 1041408  }
 0xf21   :  { %2121 = vrot.lane.b32.xlu1 %v2096_v4, %s4649_s12 }
 0xf22   :  { %2119 = vrot.lane.b32.xlu0 %v2095_v24, %s4649_s12 }
 0xf25   :  { %v2133_v10 = vld [vmem:[#allocation2 + $0x8] sm:$0xff]  ;;  %2406 = vperm.xlu1 %4553, %v2394_v38  }
 0xf26   :  { %2401 = vperm.xlu0 %4551, %v2393_v9   ;;  %v2132_v11 = vld [vmem:[#allocation2] sm:$0xff] }
 0xf27   :  { %v4440_v13 = vpack.c.bf16 %v2133_v10, %v2132_v11 }
 0xf29   :  { %4441 = vmatprep.subr.bf16.mxu0 %v4440_v13  ;;  %4555 = vset.pattern.permute.xlu1 %v4647_v48 }
 0xf2a   :  { %4443 = vmatpush3.bf16.msra.mxu0 %v4440_v13  ;;  %4554 = vset.pattern.permute.xlu0 %v4647_v48 }
 0xf2b   :  { %2414 = vperm.xlu0 %4554, %v2393_v9   ;;  %2418 = vperm.xlu1 %4555, %v2394_v38  }
 0xf2f   :  { %4557 = vset.pattern.permute.xlu0 %v4639_v3  ;;  %4556 = vset.pattern.permute.xlu1 %v4639_v3 }
 0xf8f   :  { %v2108_v14 = vpop.permute.xlu1 %2107 }
 0xf90   :  { %v2112_v15 = vsel %vm4761_vm8, %v2108_v14, 0.0  ;;  %v2106_v16 = vpop.permute.xlu0 %2105 }
 0xf91   :  { %2114 = vst.msk [vmem:[#allocation2 + $0x18] sm:$0xff] %vm5462_vm11, %v2112_v15  ;;  %v2111_v17 = vsel %vm4761_vm8, %v2106_v16, 0.0  ;;  %vm5466_vm11 = vmmov %vm5465_vm12 }
 0xf92   :  { %2113 = vst.msk [vmem:[#allocation2 + $0x10] sm:$0xff] %vm5463_vm7, %v2111_v17  ;;  %vm5467_vm7 = vmmov %vm5466_vm11 }
 0xf93   :  { %v2122_v18 = vpop.permute.xlu1 %2121 }
 0xf94   :  { %v2126_v22 = vsel %vm4872_vm0, %v2122_v18, 0.0  ;;  %v2120_v23 = vpop.permute.xlu0 %2119 }
 0xf95   :  { %2128 = vst.msk [vmem:[#allocation2 + $0x28] sm:$0xff] %vm5464_vm13, %v2126_v22  ;;  %v2125_v25 = vsel %vm4872_vm0, %v2120_v23, 0.0  ;;  %vm5468_vm13 = vmmov %vm5460_vm6 }
 0xf96   :  { %2127 = vst.msk [vmem:[#allocation2 + $0x20] sm:$0xff] %vm5460_vm6, %v2125_v25 }
 0xf98   :  { %v2135_v26 = vld [vmem:[#allocation2 + $0x18] sm:$0xff] }
 0xf99   :  { %v2134_v27 = vld [vmem:[#allocation2 + $0x10] sm:$0xff] }
 0xf9a   :  { %v4444_v30 = vpack.c.bf16 %v2135_v26, %v2134_v27 }
 0xf9c   :  { %4445 = vmatprep.subr.bf16.mxu0 %v4444_v30  ;;  %v2137_v31 = vld [vmem:[#allocation2 + $0x28] sm:$0xff] }
 0xf9d   :  { %4447 = vmatpush3.bf16.msra.mxu0 %v4444_v30  ;;  %v2136_v32 = vld [vmem:[#allocation2 + $0x20] sm:$0xff] }
 0xf9e   :  { %v4448_v33 = vpack.c.bf16 %v2137_v31, %v2136_v32 }
 0xfa0   :  { %4449 = vmatprep.subr.bf16.mxu0 %v4448_v33 }
 0xfa1   :  { %4451 = vmatpush3.bf16.msra.mxu0 %v4448_v33 }
 0xfa2   :  { %4223 = vmatprep.subr.msk.mxu0 %vm5465_vm12, %v4822_v58  ;;  %vm5469_vm12 = vmmov %vm5460_vm6 }
 0xfa4   :  { %4199 = vmatmul.mubr.msk.f32.vlgmr.msra.gmra.mrb[16].mxu0 %vm1123_vm1, %v2131_v36  ;;  %v2407_v2 = vpop.permute.xlu1 %2406 }
 0xfa5   :  { %4224 = vmatpush3.msk.msra.mxu0 %vm5466_vm11, %v4822_v58  ;;  %vm5470_vm11 = vmmov %vm5460_vm6  ;;  %v2402_v4 = vpop.permute.xlu0 %2401 }
 0xfa6   :  { %4228 = vmatprep.subr.msk.mxu0 %vm5467_vm7, %v4822_v58  ;;  %vm5471_vm7 = vcmask 15360  }
 0xfaa   :  { %v2415_v10 = vpop.permute.xlu0 %2414  ;;  %v2419_v11 = vpop.permute.xlu1 %2418 }
0x1077   :  { %v4200_v39 = vpop.f32.mrb[16].mxu0 }
0x1078   :  { %v2210_v40 = vpop.f32.mrb[17].mxu0  ;;  %v2220_v43 = vsel %vm4900_vm15, %v4200_v39, 0.0 }
0x1079   :  { %v2219_v41 = vsel %vm4900_vm15, %v2210_v40, 0.0  ;;  %v2305_v45 = vmul.f32 %v2220_v43, %v2220_v43 }
0x107a   :  { %v2304_v44 = vmul.f32 %v2219_v41, %v2219_v41  ;;  %4209 = vmatprep.mubr.msk.f32.mxu1 %vm5468_vm13, %v2219_v41  ;;  %vm5472_vm13 = vmmov %vm5471_vm7 }
0x107b   :  { %4210 = vmatmul.mubr.msk.f32.vlgmr.msra.gmra.mrb[24].mxu1 %vm5460_vm6, %v2220_v43  ;;  %vm5473_vm6 = vcmask 1041408  }
0x107c   :  { %4463 = vmatpush3.bf16.msk.msra.mxu1 %vm4729_vm14, %v4646_v20  ;;  %4220 = vmatprep.mubr.msk.f32.mxu1 %vm5469_vm12, %v2304_v44  ;;  %vm5474_vm12 = vmmov %vm5471_vm7  ;;  %v2638_v44 = vld [vmem:[#allocation5 + $0x50] sm:$0xff] }
0x107d   :  { %4465 = vmatprep.subr.msk.bf16.mxu1 %vm4742_vm2, %v4646_v20 }
0x1080   :  { %4467 = vmatpush3.bf16.msk.msra.mxu1 %vm4742_vm2, %v4646_v20 }
0x1083   :  { %4221 = vmatmul.mubr.msk.f32.vlgmr.msra.gmra.mrb[26].mxu1 %vm5470_vm11, %v2305_v45  ;;  %vm5475_vm11 = vmmov %vm5471_vm7 }
0x1084   :  { %4245 = vmatprep.mubr.msk.f32.mxu1 %vm1123_vm1, %v2638_v44 }
0x114e   :  { %v4211_v46 = vpop.f32.mrb[24].mxu1 }
0x114f   :  { %v2293_v47 = vpop.f32.mrb[25].mxu1  ;;  %v2303_v49 = vmul.f32 0.25, %v4211_v46 }
0x1150   :  { %v2302_v51 = vmul.f32 0.25, %v2293_v47 }
0x1151   :  { %v2390_v53 = vmul.f32 %v2303_v49, %v2303_v49 }
0x1152   :  { %v2389_v56 = vmul.f32 %v2302_v51, %v2302_v51 }
0x1156   :  { %v4222_v52 = vpop.f32.mrb[26].mxu1 }
0x1157   :  { %v2388_v54 = vmul.f32 0.25, %v4222_v52  ;;  %v2378_v55 = vpop.f32.mrb[27].mxu1 }
0x1158   :  { %v2387_v57 = vmul.f32 0.25, %v2378_v55 }
0x1159   :  { %v2392_v60 = vsub.f32 %v2388_v54, %v2390_v53 }
0x115a   :  { %v2391_v61 = vsub.f32 %v2387_v57, %v2389_v56 }
0x115b   :  { %v2396_v62 = vadd.f32 1e-05, %v2392_v60 }
0x115c   :  { %v2395_v0 = vadd.f32 1e-05, %v2391_v61 }
0x115d   :  { %4574 = vrsqrt.f32 %v2396_v62 }
0x115e   :  { %4576 = vrsqrt.f32 %v2395_v0 }
0x1167   :  { %v4575_v24 = vpop.eup %4574 }
0x1168   :  { %v4577_v6 = vpop.eup %4576  ;;  %v2410_v5 = vmul.f32 %v4575_v24, %v2407_v2  ;;  %v2639_v24 = vld [vmem:[#allocation5 + $0x58] sm:$0xff] }
0x1169   :  { %v2409_v8 = vmul.f32 %v4577_v6, %v2402_v4  ;;  %v2902_v6 = vld [vmem:[%s5390_s2 + $0x50] sm:$0xff] }
0x116a   :  { %v2412_v9 = vmul.f32 %v2410_v5, %v2303_v49 }
0x116b   :  { %4225 = vmatprep.mubr.msk.f32.mxu0 %vm5471_vm7, %v2409_v8  ;;  %v2411_v13 = vmul.f32 %v2409_v8, %v2302_v51  ;;  %vm5476_vm7 = vcmask 293920  }
0x116c   :  { %4226 = vmatmul.mubr.msk.f32.vlgmr.msra.gmra.mrb[18].mxu0 %vm5472_vm13, %v2410_v5  ;;  %v2422_v15 = vsub.f32 %v2419_v11, %v2412_v9  ;;  %vm5477_vm13 = vmmov %vm5476_vm7 }
0x116d   :  { %v2421_v14 = vsub.f32 %v2415_v10, %v2411_v13  ;;  %4229 = vmatpush3.msk.msra.mxu0 %vm5473_vm6, %v4822_v58  ;;  %vm5478_vm6 = vcmask 261120  }
0x116e   :  { %4481 = vmatprep.subr.msk.bf16.mxu0 %vm4729_vm14, %v4646_v20 }
0x116f   :  { %4230 = vmatprep.mubr.msk.f32.mxu0 %vm5474_vm12, %v2421_v14  ;;  %vm5479_vm12 = vmmov %vm5478_vm6 }
0x1170   :  { %4231 = vmatmul.mubr.msk.f32.vlgmr.msra.gmra.mrb[20].mxu0 %vm5475_vm11, %v2422_v15  ;;  %vm5480_vm11 = vmmov %vm5478_vm6 }
0x1171   :  { %4483 = vmatpush3.bf16.msk.msra.mxu0 %vm4729_vm14, %v4646_v20 }
0x1172   :  { %4485 = vmatprep.subr.msk.bf16.mxu0 %vm4742_vm2, %v4646_v20 }
0x1175   :  { %4487 = vmatpush3.bf16.msk.msra.mxu0 %vm4742_vm2, %v4646_v20 }
0x1176   :  { %4489 = vmatprep.subr.msk.bf16.mxu0 %vm4729_vm14, %v4646_v20 }
0x123f   :  { %v4227_v16 = vpop.f32.mrb[18].mxu0 }
0x1240   :  { %v2495_v17 = vpop.f32.mrb[19].mxu0  ;;  %v2586_v18 = vmul.f32 %v4227_v16, %v2220_v43 }
0x1241   :  { %v2585_v22 = vmul.f32 %v2495_v17, %v2219_v41 }
0x1243   :  { %v4232_v23 = vpop.f32.mrb[20].mxu0 }
0x1244   :  { %v2588_v25 = vadd.f32 %v4232_v23, %v2586_v18  ;;  %v2576_v26 = vpop.f32.mrb[21].mxu0 }
0x1245   :  { %v2587_v27 = vadd.f32 %v2585_v22, %v2576_v26 }
0x1246   :  { %v2590_v30 = vsel %vm4900_vm15, %v2588_v25, 0.0 }
0x1247   :  { %v2592_v31 = vmax.f32 %v2590_v30, 0.0  ;;  %v2589_v32 = vsel %vm4900_vm15, %v2587_v27, 0.0 }
0x1248   :  { %v2591_v33 = vmax.f32 %v2589_v32, 0.0 }
0x1249   :  { %2597 = vrot.lane.b32.xlu0 %v2592_v31, %s4638_s6 }
0x124a   :  { %2595 = vrot.lane.b32.xlu1 %v2591_v33, %s4638_s6 }
0x12bb   :  { %v2598_v36 = vpop.permute.xlu0 %2597 }
0x12bc   :  { %2602 = vst.msk [vmem:[#allocation3 + $0x8] sm:$0xff] %vm5476_vm7, %v2598_v36  ;;  %v2596_v38 = vpop.permute.xlu1 %2595  ;;  %vm5481_vm7 = vmmov %vm5478_vm6 }
0x12bd   :  { %2601 = vst.msk [vmem:[#allocation3] sm:$0xff] %vm5477_vm13, %v2596_v38  ;;  %vm5482_vm13 = vmmov %vm5478_vm6 }
0x12c3   :  { %v2604_v39 = vld [vmem:[#allocation3 + $0x8] sm:$0xff] }
0x12c4   :  { %v2603_v40 = vld [vmem:[#allocation3] sm:$0xff]  ;;  %2615 = vrot.lane.b32.xlu0 %v2604_v39, %s4641_s0  ;;  %v2606_v41 = vsel %vm4946_vm9, %v2604_v39, 0.0 }
0x12c5   :  { %2613 = vrot.lane.b32.xlu1 %v2603_v40, %s4641_s0  ;;  %v2605_v43 = vsel %vm4946_vm9, %v2603_v40, 0.0  ;;  %2608 = vst.msk [vmem:[#allocation2 + $0x8] sm:$0xff] %vm5478_vm6, %v2606_v41 }
0x12c6   :  { %2607 = vst.msk [vmem:[#allocation2] sm:$0xff] %vm5479_vm12, %v2605_v43  ;;  %vm5483_vm12 = vcmask 1041408  }
0x12c8   :  { %2629 = vrot.lane.b32.xlu0 %v2604_v39, %s4649_s12 }
0x12c9   :  { %2627 = vrot.lane.b32.xlu1 %v2603_v40, %s4649_s12 }
0x12cc   :  { %v2641_v45 = vld [vmem:[#allocation2 + $0x8] sm:$0xff]  ;;  %2914 = vperm.xlu0 %4557, %v2902_v6  }
0x12cd   :  { %v2640_v46 = vld [vmem:[#allocation2] sm:$0xff]  ;;  %2909 = vperm.xlu1 %4556, %v2901_v42  }
0x12ce   :  { %v4468_v47 = vpack.c.bf16 %v2641_v45, %v2640_v46 }
0x12d0   :  { %4469 = vmatprep.subr.bf16.mxu1 %v4468_v47 }
0x12d1   :  { %4471 = vmatpush3.bf16.msra.mxu1 %v4468_v47  ;;  %4558 = vset.pattern.permute.xlu1 %v4647_v48 }
0x12d2   :  { %2922 = vperm.xlu1 %4558, %v2901_v42  }
0x12d6   :  { %2926 = vperm.xlu1 %4558, %v2902_v6   ;;  %v3393_v6 = vld [vmem:[%s5390_s2 + $0x58] sm:$0xff]  ;;  %s4650_s2 = smov [#allocation8]  }
0x1336   :  { %v2616_v49 = vpop.permute.xlu0 %2615 }
0x1337   :  { %v2620_v51 = vsel %vm4761_vm8, %v2616_v49, 0.0  ;;  %v2614_v52 = vpop.permute.xlu1 %2613 }
0x1338   :  { %2622 = vst.msk [vmem:[#allocation2 + $0x18] sm:$0xff] %vm5480_vm11, %v2620_v51  ;;  %v2619_v53 = vsel %vm4761_vm8, %v2614_v52, 0.0 }
0x1339   :  { %2621 = vst.msk [vmem:[#allocation2 + $0x10] sm:$0xff] %vm5481_vm7, %v2619_v53 }
0x133a   :  { %v2630_v54 = vpop.permute.xlu0 %2629 }
0x133b   :  { %v2634_v55 = vsel %vm4872_vm0, %v2630_v54, 0.0  ;;  %v2628_v56 = vpop.permute.xlu1 %2627 }
0x133c   :  { %2636 = vst.msk [vmem:[#allocation2 + $0x28] sm:$0xff] %vm5482_vm13, %v2634_v55  ;;  %v2633_v57 = vsel %vm4872_vm0, %v2628_v56, 0.0  ;;  %vm5484_vm0 = vmmov %vm5483_vm12 }
0x133d   :  { %2635 = vst.msk [vmem:[#allocation2 + $0x20] sm:$0xff] %vm5478_vm6, %v2633_v57  ;;  %vm5485_vm11 = vmmov %vm5484_vm0 }
0x133f   :  { %v2643_v60 = vld [vmem:[#allocation2 + $0x18] sm:$0xff] }
0x1340   :  { %v2642_v61 = vld [vmem:[#allocation2 + $0x10] sm:$0xff] }
0x1341   :  { %v4472_v62 = vpack.c.bf16 %v2643_v60, %v2642_v61 }
0x1343   :  { %4473 = vmatprep.subr.bf16.mxu1 %v4472_v62  ;;  %v2645_v0 = vld [vmem:[#allocation2 + $0x28] sm:$0xff] }
0x1344   :  { %4475 = vmatpush3.bf16.msra.mxu1 %v4472_v62  ;;  %v2644_v2 = vld [vmem:[#allocation2 + $0x20] sm:$0xff] }
0x1345   :  { %v4476_v4 = vpack.c.bf16 %v2645_v0, %v2644_v2 }
0x1347   :  { %4477 = vmatprep.subr.bf16.mxu1 %v4476_v4 }
0x1348   :  { %4479 = vmatpush3.bf16.msra.mxu1 %v4476_v4 }
0x1349   :  { %4270 = vmatprep.subr.msk.mxu1 %vm5483_vm12, %v4822_v58  ;;  %vm5490_vm12 = vmmov 0  }
0x134b   :  { %4246 = vmatmul.mubr.msk.f32.vlgmr.msra.gmra.mrb[28].mxu1 %vm1123_vm1, %v2639_v24  ;;  %vm5486_vm1 = vmmov %vm5478_vm6  ;;  %v2915_v36 = vpop.permute.xlu0 %2914 }
0x134c   :  { %4271 = vmatpush3.msk.msra.mxu1 %vm5484_vm0, %v4822_v58  ;;  %vm5487_vm7 = vmmov %vm5486_vm1  ;;  %v2910_v33 = vpop.permute.xlu1 %2909  ;;  %vm5491_vm0 = vcmask 15360  }
0x134d   :  { %4275 = vmatprep.subr.msk.mxu1 %vm5485_vm11, %v4822_v58  ;;  %vm5488_vm13 = vmmov %vm5486_vm1 }
0x134e   :  { %vm5489_vm6 = vmmov %vm5486_vm1 }
0x134f   :  { %vm5492_vm11 = vmmov %vm5491_vm0 }
0x1351   :  { %v2923_v39 = vpop.permute.xlu1 %2922 }
0x1355   :  { %v2927_v47 = vpop.permute.xlu1 %2926 }
0x141e   :  { %v4247_v5 = vpop.f32.mrb[28].mxu1 }
0x141f   :  { %v2718_v8 = vpop.f32.mrb[29].mxu1  ;;  %v2728_v10 = vsel %vm4900_vm15, %v4247_v5, 0.0 }
0x1420   :  { %v2727_v9 = vsel %vm4900_vm15, %v2718_v8, 0.0  ;;  %v2813_v48 = vmul.f32 %v2728_v10, %v2728_v10 }
0x1421   :  { %v2812_v11 = vmul.f32 %v2727_v9, %v2727_v9  ;;  %4256 = vmatprep.mubr.msk.f32.mxu0 %vm5486_vm1, %v2727_v9  ;;  %vm5493_vm1 = vcmask 1041408  }
0x1422   :  { %4257 = vmatmul.mubr.msk.f32.vlgmr.msra.gmra.mrb[22].mxu0 %vm5487_vm7, %v2728_v10  ;;  %vm5494_vm7 = vmmov %vm5491_vm0 }
0x1423   :  { %4491 = vmatpush3.bf16.msk.msra.mxu0 %vm4729_vm14, %v4646_v20  ;;  %4267 = vmatprep.mubr.msk.f32.mxu0 %vm5488_vm13, %v2812_v11  ;;  %vm5495_vm13 = vmmov %vm5491_vm0 }
0x1424   :  { %4493 = vmatprep.subr.msk.bf16.mxu0 %vm4742_vm2, %v4646_v20 }
0x1427   :  { %4495 = vmatpush3.bf16.msk.msra.mxu0 %vm4742_vm2, %v4646_v20 }
0x1428   :  { %4496 = vmatprep.subr.bf16.mxu0 %v4640_v12 }
0x142a   :  { %4268 = vmatmul.mubr.msk.f32.vlgmr.msra.gmra.mrb[24].mxu0 %vm5489_vm6, %v2813_v48  ;;  %vm5496_vm6 = vcmask 293920  }
0x142b   :  { %4296 = vmatprep.mubr.msk.f32.mxu0 %vm5490_vm12, %v4637_v1 }
0x14f5   :  { %v4258_v13 = vpop.f32.mrb[22].mxu0 }
0x14f6   :  { %v2801_v14 = vpop.f32.mrb[23].mxu0  ;;  %v2811_v15 = vmul.f32 0.25, %v4258_v13 }
0x14f7   :  { %v2810_v16 = vmul.f32 0.25, %v2801_v14 }
0x14f8   :  { %v2898_v18 = vmul.f32 %v2811_v15, %v2811_v15 }
0x14f9   :  { %v2897_v25 = vmul.f32 %v2810_v16, %v2810_v16 }
0x14fd   :  { %v4269_v17 = vpop.f32.mrb[24].mxu0 }
0x14fe   :  { %v2896_v22 = vmul.f32 0.25, %v4269_v17  ;;  %v2886_v23 = vpop.f32.mrb[25].mxu0 }
0x14ff   :  { %v2895_v26 = vmul.f32 0.25, %v2886_v23 }
0x1500   :  { %v2900_v27 = vsub.f32 %v2896_v22, %v2898_v18 }
0x1501   :  { %v2899_v30 = vsub.f32 %v2895_v26, %v2897_v25 }
0x1502   :  { %v2904_v31 = vadd.f32 1e-05, %v2900_v27 }
0x1503   :  { %v2903_v32 = vadd.f32 1e-05, %v2899_v30 }
0x1504   :  { %4578 = vrsqrt.f32 %v2904_v31 }
0x1505   :  { %4580 = vrsqrt.f32 %v2903_v32 }
0x150e   :  { %v4579_v38 = vpop.eup %4578 }
0x150f   :  { %v4581_v40 = vpop.eup %4580  ;;  %v2918_v41 = vmul.f32 %v4579_v38, %v2915_v36  ;;  %v3158_v36 = vld [vmem:[#allocation5 + $0x60] sm:$0xff] }
0x1510   :  { %v2917_v43 = vmul.f32 %v4581_v40, %v2910_v33 }
0x1511   :  { %v2920_v44 = vmul.f32 %v2918_v41, %v2811_v15 }
0x1512   :  { %v2919_v45 = vmul.f32 %v2917_v43, %v2810_v16  ;;  %4272 = vmatprep.mubr.msk.f32.mxu1 %vm5491_vm0, %v2917_v43  ;;  %vm5497_vm0 = vmmov %vm5496_vm6 }
0x1513   :  { %4273 = vmatmul.mubr.msk.f32.vlgmr.msra.gmra.mrb[30].mxu1 %vm5492_vm11, %v2918_v41  ;;  %v2930_v49 = vsub.f32 %v2927_v47, %v2920_v44 }
0x1514   :  { %v2929_v46 = vsub.f32 %v2923_v39, %v2919_v45  ;;  %4276 = vmatpush3.msk.msra.mxu1 %vm5493_vm1, %v4822_v58 }
0x1515   :  { %4508 = vmatprep.subr.bf16.mxu1 %v4640_v12 }
0x1516   :  { %4277 = vmatprep.mubr.msk.f32.mxu1 %vm5494_vm7, %v2929_v46 }
0x1517   :  { %4278 = vmatmul.mubr.msk.f32.vlgmr.msra.gmra.mrb[32].mxu1 %vm5495_vm13, %v2930_v49 }
0x1518   :  { %4510 = vmatpush3.bf16.msk.msra.mxu1 %vm4729_vm14, %v4646_v20  ;;  %4307 = vmatprep.mubr.msk.f32.mxu1 %vm5490_vm12, %v4637_v1 }
0x1519   :  { %4511 = vmatprep.subr.bf16.mxu1 %v4640_v12 }
0x151c   :  { %4513 = vmatpush3.bf16.msk.msra.mxu1 %vm4742_vm2, %v4646_v20 }
0x151d   :  { %4514 = vmatprep.subr.bf16.mxu1 %v4640_v12 }
0x15e6   :  { %v4274_v51 = vpop.f32.mrb[30].mxu1 }
0x15e7   :  { %v3003_v52 = vpop.f32.mrb[31].mxu1  ;;  %v3094_v53 = vmul.f32 %v4274_v51, %v2728_v10 }
0x15e8   :  { %v3093_v54 = vmul.f32 %v3003_v52, %v2727_v9 }
0x15ea   :  { %v4279_v55 = vpop.f32.mrb[32].mxu1 }
0x15eb   :  { %v3096_v56 = vadd.f32 %v4279_v55, %v3094_v53  ;;  %v3084_v57 = vpop.f32.mrb[33].mxu1 }
0x15ec   :  { %v3095_v60 = vadd.f32 %v3093_v54, %v3084_v57 }
0x15ed   :  { %v3098_v61 = vsel %vm4900_vm15, %v3096_v56, 0.0 }
0x15ee   :  { %3103 = vrot.lane.b32.xlu1 %v3098_v61, %s4638_s6  ;;  %v3097_v62 = vsel %vm4900_vm15, %v3095_v60, 0.0  ;;  %vm5498_vm15 = vcmask 261120  }
0x15ef   :  { %3101 = vrot.lane.b32.xlu0 %v3097_v62, %s4638_s6  ;;  %vm5499_vm11 = vmmov %vm5498_vm15 }
0x1660   :  { %v3104_v0 = vpop.permute.xlu1 %3103 }
0x1661   :  { %3108 = vst.msk [vmem:[#allocation3 + $0x8] sm:$0xff] %vm5496_vm6, %v3104_v0  ;;  %v3102_v2 = vpop.permute.xlu0 %3101 }
0x1662   :  { %3107 = vst.msk [vmem:[#allocation3] sm:$0xff] %vm5497_vm0, %v3102_v2  ;;  %vm3167_vm0 = vcmask 523264  }
0x1668   :  { %v3152_v4 = vld [vmem:[#allocation3 + $0x8] sm:$0xff] }
0x1669   :  { %v3151_v24 = vld [vmem:[#allocation3] sm:$0xff]  ;;  %3115 = vrot.lane.b32.xlu1 %v3152_v4, %s4645_s8  ;;  %v3154_v42 = vsel %vm4946_vm9, %v3152_v4, 0.0 }
0x166a   :  { %3113 = vrot.lane.b32.xlu0 %v3151_v24, %s4645_s8  ;;  %v3153_v59 = vsel %vm4946_vm9, %v3151_v24, 0.0  ;;  %3156 = vst.msk [vmem:[#allocation2 + $0x38] sm:$0xff] %vm5498_vm15, %v3154_v42  ;;  %vm5500_vm9 = vmmov %vm5499_vm11  ;;  %vm5506_vm15 = vcmask 1041408  }
0x166b   :  { %3155 = vst.msk [vmem:[#allocation2 + $0x30] sm:$0xff] %vm5499_vm11, %v3153_v59  ;;  %vm5501_vm1 = vmmov %vm5500_vm9  ;;  %v3599_v59 = vld [vmem:[#allocation4] sm:$0x1] }
0x166c   :  { %vm5502_vm7 = vmmov %vm5501_vm1 }
0x166d   :  { %3129 = vrot.lane.b32.xlu1 %v3152_v4, %s4641_s0  ;;  %vm5503_vm13 = vmmov %vm5501_vm1 }
0x166e   :  { %3127 = vrot.lane.b32.xlu0 %v3151_v24, %s4641_s0  ;;  %vm5505_vm6 = vmmov %vm5501_vm1 }
0x166f   :  { %vm5507_vm11 = vmmov %vm5501_vm1 }
0x1671   :  { %3143 = vrot.lane.b32.xlu1 %v3152_v4, %s4648_s11  ;;  %v3166_v32 = vld [vmem:[#allocation2 + $0x38] sm:$0xff] }
0x1672   :  { %3141 = vrot.lane.b32.xlu0 %v3151_v24, %s4648_s11  ;;  %v3165_v31 = vld [vmem:[#allocation2 + $0x30] sm:$0xff] }
0x1673   :  { %v4506_v33 = vpack.c.bf16 %v3166_v32, %v3165_v31 }
0x1675   :  { %3404 = vperm.xlu1 %4558, %v3393_v6  }
0x1676   :  { %3398 = vperm.xlu0 %4557, %v3393_v6  }
0x1679   :  { %4559 = vset.pattern.permute.xlu1 %v4639_v3 }
0x16db   :  { %v3116_v63 = vpop.permute.xlu1 %3115 }
0x16dc   :  { %v3120_v5 = vsel %vm4779_vm4, %v3116_v63, 0.0  ;;  %v3114_v8 = vpop.permute.xlu0 %3113 }
0x16dd   :  { %3122 = vst.msk [vmem:[#allocation2 + $0x8] sm:$0xff] %vm5500_vm9, %v3120_v5  ;;  %v3119_v9 = vsel %vm4779_vm4, %v3114_v8, 0.0  ;;  %vm5504_vm4 = vmmov %vm5501_vm1 }
0x16de   :  { %3121 = vst.msk [vmem:[#allocation2] sm:$0xff] %vm5501_vm1, %v3119_v9  ;;  %vm5508_vm9 = vmmov %vm5501_vm1 }
0x16df   :  { %v3130_v10 = vpop.permute.xlu1 %3129  ;;  %vm5509_vm1 = vmmov %vm5506_vm15 }
0x16e0   :  { %v3134_v11 = vsel %vm4761_vm8, %v3130_v10, 0.0  ;;  %v3128_v48 = vpop.permute.xlu0 %3127 }
0x16e1   :  { %3136 = vst.msk [vmem:[#allocation2 + $0x18] sm:$0xff] %vm5502_vm7, %v3134_v11  ;;  %v3133_v3 = vsel %vm4761_vm8, %v3128_v48, 0.0 }
0x16e2   :  { %3135 = vst.msk [vmem:[#allocation2 + $0x10] sm:$0xff] %vm5503_vm13, %v3133_v3  ;;  %vm5512_vm13 = vcmask 293920  }
0x16e3   :  { %v3144_v13 = vpop.permute.xlu1 %3143 }
0x16e4   :  { %v3148_v14 = vsel %vm4862_vm10, %v3144_v13, 0.0  ;;  %v3142_v35 = vpop.permute.xlu0 %3141  ;;  %v3160_v15 = vld [vmem:[#allocation2 + $0x8] sm:$0xff] }
0x16e5   :  { %3150 = vst.msk [vmem:[#allocation2 + $0x28] sm:$0xff] %vm5504_vm4, %v3148_v14  ;;  %v3147_v16 = vsel %vm4862_vm10, %v3142_v35, 0.0  ;;  %v3159_v17 = vld [vmem:[#allocation2] sm:$0xff] }
0x16e6   :  { %3149 = vst.msk [vmem:[#allocation2 + $0x20] sm:$0xff] %vm5505_vm6, %v3147_v16  ;;  %v4497_v18 = vpack.c.bf16 %v3160_v15, %v3159_v17  ;;  %v3594_v35 = vld [vmem:[#allocation5 + $0x70] sm:$0xff] }
0x16e8   :  { %4498 = vmatpush3.bf16.msra.mxu0 %v4497_v18  ;;  %v3162_v22 = vld [vmem:[#allocation2 + $0x18] sm:$0xff] }
0x16e9   :  { %4499 = vmatprep.subr.bf16.mxu0 %v4640_v12  ;;  %v3161_v23 = vld [vmem:[#allocation2 + $0x10] sm:$0xff] }
0x16ea   :  { %v4500_v25 = vpack.c.bf16 %v3162_v22, %v3161_v23 }
0x16ec   :  { %4501 = vmatpush3.bf16.msra.mxu0 %v4500_v25  ;;  %v3164_v26 = vld [vmem:[#allocation2 + $0x28] sm:$0xff] }
0x16ed   :  { %4502 = vmatprep.subr.bf16.mxu0 %v4640_v12  ;;  %v3163_v27 = vld [vmem:[#allocation2 + $0x20] sm:$0xff] }
0x16ee   :  { %v4503_v30 = vpack.c.bf16 %v3164_v26, %v3163_v27 }
0x16f0   :  { %4504 = vmatpush3.bf16.msra.mxu0 %v4503_v30 }
0x16f1   :  { %4505 = vmatprep.subr.bf16.mxu0 %v4640_v12 }
0x16f4   :  { %4507 = vmatpush3.bf16.msra.mxu0 %v4506_v33 }
0x16f5   :  { %4321 = vmatprep.subr.mxu0 %v4637_v1  ;;  %v3399_v52 = vpop.permute.xlu0 %3398 }
0x16f7   :  { %4297 = vmatmul.mubr.msk.f32.vlgmr.msra.gmra.mrb[26].mxu0 %vm3167_vm0, %v3158_v36 }
0x16f8   :  { %4322 = vmatpush3.msk.msra.mxu0 %vm5506_vm15, %v4822_v58  ;;  %4323 = vmatprep.mubr.msk.f32.mxu0 %vm5490_vm12, %v4637_v1 }
0x16f9   :  { %4520 = vmatprep.subr.bf16.mxu0 %v4640_v12 }
0x17ca   :  { %v3237_v38 = vpop.f32.mrb[26].mxu0 }
0x17cb   :  { %v3241_v39 = vsel %vm4807_vm5, %v3237_v38, 0.0  ;;  %v4298_v40 = vpop.f32.mrb[27].mxu0 }
0x17cc   :  { %4308 = vmatmul.mubr.msk.f32.vlgmr.msra.gmra.mrb[34].mxu1 %vm5507_vm11, %v3241_v39  ;;  %v3316_v41 = vmul.f32 %v3241_v39, %v3241_v39 }
0x17cd   :  { %4516 = vmatpush3.bf16.msk.msra.mxu1 %vm4729_vm14, %v4646_v20  ;;  %4318 = vmatprep.mubr.msk.f32.mxu1 %vm5490_vm12, %v4637_v1  ;;  %vm5510_vm14 = vcmask 15360  }
0x17ce   :  { %4517 = vmatprep.subr.bf16.mxu1 %v4640_v12 }
0x17d1   :  { %4519 = vmatpush3.bf16.msk.msra.mxu1 %vm4742_vm2, %v4646_v20  ;;  %vm5511_vm2 = vmmov %vm5510_vm14 }
0x17d2   :  { %4326 = vmatprep.subr.mxu1 %v4637_v1 }
0x17d4   :  { %4319 = vmatmul.mubr.msk.f32.vlgmr.msra.gmra.mrb[36].mxu1 %vm5508_vm9, %v3316_v41 }
0x17d5   :  { %4327 = vmatpush3.msk.msra.mxu1 %vm5509_vm1, %v4822_v58  ;;  %4328 = vmatprep.mubr.msk.f32.mxu1 %vm5490_vm12, %v4637_v1  ;;  %v3405_v58 = vpop.permute.xlu1 %3404 }
0x189f   :  { %v3311_v19 = vpop.f32.mrb[34].mxu1 }
0x18a0   :  { %v4309_v43 = vpop.f32.mrb[35].mxu1  ;;  %v3315_v44 = vmul.f32 0.125, %v3311_v19 }
0x18a2   :  { %v3391_v46 = vmul.f32 %v3315_v44, %v3315_v44 }
0x18a7   :  { %v3386_v45 = vpop.f32.mrb[36].mxu1 }
0x18a8   :  { %v3390_v47 = vmul.f32 0.125, %v3386_v45  ;;  %v4320_v49 = vpop.f32.mrb[37].mxu1 }
0x18aa   :  { %v3392_v21 = vsub.f32 %v3390_v47, %v3391_v46 }
0x18ac   :  { %v3394_v20 = vadd.f32 1e-05, %v3392_v21 }
0x18ae   :  { %4582 = vrsqrt.f32 %v3394_v20 }
0x18b8   :  { %v4583_v51 = vpop.eup %4582 }
0x18b9   :  { %v3401_v53 = vmul.f32 %v4583_v51, %v3399_v52 }
0x18bb   :  { %4324 = vmatmul.mubr.msk.f32.vlgmr.msra.gmra.mrb[28].mxu0 %vm5510_vm14, %v3401_v53  ;;  %v3402_v54 = vmul.f32 %v3401_v53, %v3315_v44 }
0x18bc   :  { %4339 = vmatprep.mubr.msk.f32.mxu0 %vm5490_vm12, %v4637_v1  ;;  %vm5514_vm12 = vmmov %vm5504_vm4 }
0x18bd   :  { %v3407_v55 = vsub.f32 %v3405_v58, %v3402_v54 }
0x18bf   :  { %4329 = vmatmul.mubr.msk.f32.vlgmr.msra.gmra.mrb[38].mxu1 %vm5511_vm2, %v3407_v55 }
0x198e   :  { %v3477_v56 = vpop.f32.mrb[28].mxu0 }
0x198f   :  { %v4325_v57 = vpop.f32.mrb[29].mxu0  ;;  %v3554_v60 = vmul.f32 %v3477_v56, %v3241_v39 }
0x1992   :  { %v3550_v61 = vpop.f32.mrb[38].mxu1 }
0x1993   :  { %v3555_v62 = vadd.f32 %v3554_v60, %v3550_v61  ;;  %v4330_v0 = vpop.f32.mrb[39].mxu1 }
0x1995   :  { %v3556_v2 = vsel %vm4807_vm5, %v3555_v62, 0.0  ;;  %vm5513_vm5 = vmmov %vm5504_vm4  ;;  %vm5515_vm4 = vnez %v5407_v29  ;;  %v3607_v29 = vsub.s32 0, %v4717_v7 }
0x1996   :  { %v3558_v4 = vmul.f32 0.01, %v3556_v2  ;;  %vm3557_vm7 = vcmp.ge.f32.partialorder %v3556_v2, 0.0  ;;  %vm5516_vm6 = vmmov %vm5513_vm5 }
0x1997   :  { %vm5517_vm0 = vmmov %vm5513_vm5 }
0x1998   :  { %v3559_v24 = vsel %vm3557_vm7, %v3556_v2, %v3558_v4 }
0x1999   :  { %3561 = vrot.lane.b32.xlu0 %v3559_v24, %s4638_s6  ;;  %s3691_s6 = sshll.u32 %s4650_s2, 4  ;;  %s3692_s6 = int_to_ptr.vmem [resolvable:$true] %s3691_s6 }
0x199a   :  { %p4613_p9 = scmp.lt.s32.totalorder %s3692_s6, %s3692_s6 }
0x1a0b   :  { %v3562_v42 = vpop.permute.xlu0 %3561 }
0x1a0c   :  { %3564 = vst.msk [vmem:[#allocation3] sm:$0xff] %vm5512_vm13, %v3562_v42 }
0x1a13   :  { %v3572_v1 = vld [vmem:[#allocation3] sm:$0xff] }
0x1a14   :  { %3574 = vrot.lane.b32.xlu0 %v3572_v1, %s4641_s0  ;;  %3567 = vrot.lane.b32.xlu1 %v3572_v1, %s4644_s7  ;;  %s4608_s0 = scalar_lea.vmem %s3692_s6, 16 }
0x1a15   :  { %p4609_p8 = scmp.ne.s32.totalorder %s3692_s6, %s4608_s0 }
0x1a18   :  { %3588 = vrot.lane.b32.xlu0 %v3572_v1, %s4648_s11  ;;  %3581 = vrot.lane.b32.xlu1 %v3572_v1, %s4642_s1  ;;  %s4612_s1 = scalar_lea.vmem %s3692_s6, 32 }
0x1a19   :  { %p4614_p10 = scmp.lt.s32.totalorder %s4612_s1, %s4608_s0 }
0x1a1b   :  { %p4615_p11 = por %p4614_p10, %p4613_p9 }
0x1a1c   :  { %3602 = vperm.xlu1 %4559, %v3599_v59  }
0x1a1d   :  { %p4616_p12 = pnand %p4615_p11, %p4609_p8 }
0x1a86   :  { %v3575_v50 = vpop.permute.xlu0 %3574  ;;  %v3568_v6 = vpop.permute.xlu1 %3567 }
0x1a87   :  { %v3577_v63 = vsel %vm4761_vm8, %v3575_v50, 0.0  ;;  %v3570_v5 = vsel %vm4773_vm3, %v3568_v6, 0.0  ;;  %vm5518_vm8 = vmmov %vm5517_vm0  ;;  %vm3683_vm3 = vcmask 253952  }
0x1a88   :  { %3578 = vst.msk [vmem:[#allocation2 + $0x8] sm:$0xff] %vm5513_vm5, %v3577_v63 }
0x1a89   :  { %3571 = vst.msk [vmem:[#allocation2] sm:$0xff] %vm5514_vm12, %v3570_v5 }
0x1a8a   :  { %v3589_v8 = vpop.permute.xlu0 %3588  ;;  %v3582_v9 = vpop.permute.xlu1 %3581 }
0x1a8b   :  { %v3591_v10 = vsel %vm4862_vm10, %v3589_v8, 0.0  ;;  %v3584_v11 = vsel %vm5515_vm4, %v3582_v9, 0.0 }
0x1a8c   :  { %3592 = vst.msk [vmem:[#allocation2 + $0x18] sm:$0xff] %vm5516_vm6, %v3591_v10 }
0x1a8d   :  { %3585 = vst.msk [vmem:[#allocation2 + $0x10] sm:$0xff] %vm5517_vm0, %v3584_v11 }
0x1a8f   :  { %v3596_v48 = vld [vmem:[#allocation2 + $0x8] sm:$0xff] }
0x1a90   :  { %v3595_v28 = vld [vmem:[#allocation2] sm:$0xff] }
0x1a91   :  { %v4521_v34 = vpack.c.bf16 %v3596_v48, %v3595_v28 }
0x1a93   :  { %4522 = vmatpush3.bf16.msra.mxu0 %v4521_v34  ;;  %v3598_v13 = vld [vmem:[#allocation2 + $0x18] sm:$0xff] }
0x1a94   :  { %4523 = vmatprep.subr.bf16.mxu0 %v4640_v12  ;;  %v3597_v3 = vld [vmem:[#allocation2 + $0x10] sm:$0xff] }
0x1a95   :  { %v4524_v14 = vpack.c.bf16 %v3598_v13, %v3597_v3 }
0x1a97   :  { %4525 = vmatpush3.bf16.msra.mxu0 %v4524_v14 }
0x1a9a   :  { %4340 = vmatmul.mubr.msk.f32.vlgmr.msra.gmra.mrb[30].mxu0 %vm5518_vm8, %v3594_v35 }
0x1a9b   :  { %v3603_v37 = vpop.permute.xlu1 %3602 }
0x1a9c   :  { %v3608_v15 = vrot.slane %v3603_v37, %v3607_v29 }
0x1b6d   :  { %v3678_v16 = vpop.f32.mrb[30].mxu0 }
0x1b6e   :  { %v3679_v17 = vadd.f32 %v3678_v16, %v3608_v15  ;;  %v4341_v18 = vpop.f32.mrb[31].mxu0 }
0x1b70   :  { %4584 = vtanh.f32 %v3679_v17 }
0x1b7a   :  { %v4585_v12 = vpop.eup %4584 }
0x1b7b   :  { %3684 = vst.msk [vmem:[#allocation8] sm:$0x1] %vm3683_vm3, %v4585_v12 }
0x1b7c   :  { %4619 = shalt.err (!%p4616_p12)
}
0x1b7d   :  { %s4620_s11 = scalar_lea.hbm %s5392_s4, 16 }
0x1b7e   :  { %p4621_p13 = scmp.ne.s32.totalorder %s5392_s4, %s4620_s11  ;;  %p4624_p0 = scmp.lt.u32.totalorder %s4620_s11, %s5392_s4 }
0x1b80   :  { %p4626_p1 = pnand %p4624_p0, %p4621_p13 }
0x1b82   :  { %4629 = shalt.err (!%p4626_p1)
}
0x1b83   :  { %3694 = dma.vmem_to_hbm [thread:$0]  %s3692_s6, 16, %s5392_s4, [#allocation7]  }
0x1b84   :  { %4632 = dma.done.wait [#allocation7], 16  }
0x1b85   :  { %4633 = vsyncadd [#allocation7], 4294967280 }
0x1b86   :  { %3698 = vsyncpa [#allocation6], 1 }
0x1b87   :  { %3699 = vsyncpa [#allocation7], 1 }

</bundles_post_ra>
